<compile_context>
chip_gen: v7x
topology: tpu7x:2x2x1
jax: 0.10.0
libtpu: 0.0.40
codegen_flags: <defaults>
</compile_context>

<pallas_src>
import functools

import numpy as np
import jax
import jax.numpy as jnp
from jax import lax
from jax.experimental import pallas as pl
from jax.experimental.pallas import tpu as pltpu  # noqa: F401  (TPU backend module)


# ----------------------------- Pallas kernel ---------------------------------------


def _layer_norm(v, w, b, eps=1e-5):
    mu = jnp.mean(v, axis=-1, keepdims=True)
    var = jnp.mean((v - mu) ** 2, axis=-1, keepdims=True)
    return (v - mu) * lax.rsqrt(var + eps) * w + b


def fused_text_decoder_kernel(
        x_ref, mem_ref,
        wq_ref, bq_ref, wk_ref, bk_ref, wv_ref, bv_ref, wo_ref, ob_ref,
        ca_wv_ref, ca_bv_ref, ca_wo_ref, ca_bo_ref,
        ln1w_ref, ln1b_ref, ln2w_ref, ln2b_ref,
        w1_ref, b1_ref, w2_ref, b2_ref, ln3w_ref, ln3b_ref,
        fc_w_ref, fc_b_ref,
        out_ref, *, num_layers, num_heads):
    """Whole TextDecoder forward for the full batch in one kernel invocation.

    x_ref:   (B, T, E)  embedded + positionally-encoded target
    mem_ref: (B, E)     memory vector per batch element (memory seq length S = 1)
    wq/wk/wv: (L, G, E, dh)  head-grouped projection weights, G = H*B, group g = h*B + b
    wo:       (L, G, dh, E)  head-grouped output-projection weights
    out_ref: (B*T, Vp)  lane-dense (128-padded vocab) logits
    """
    B, T, E = x_ref.shape
    H = num_heads
    dh = E // H
    scale = 1.0 / float(dh) ** 0.5

    x = x_ref[...]          # (B, T, E) f32, stays in VMEM/vregs across all layers
    mem = mem_ref[...]      # (B, E)

    for l in range(num_layers):                       # static loop over layers
        # ---------- self-attention, head-batched over G = H*B groups ----------
        xg = jnp.concatenate([x] * H, axis=0)         # (G, T, E); group g = h*B + b
        qg = jnp.einsum('gte,ged->gtd', xg, wq_ref[l],
                        preferred_element_type=jnp.float32) + bq_ref[l]
        kg = jnp.einsum('gte,ged->gtd', xg, wk_ref[l],
                        preferred_element_type=jnp.float32) + bk_ref[l]
        vg = jnp.einsum('gte,ged->gtd', xg, wv_ref[l],
                        preferred_element_type=jnp.float32) + bv_ref[l]

        s = jnp.einsum('gtd,gsd->gts', qg * scale, kg,
                       preferred_element_type=jnp.float32)        # (G, T, T)
        s = s - jnp.max(s, axis=-1, keepdims=True)
        p = jnp.exp(s)
        p = p * (1.0 / jnp.sum(p, axis=-1, keepdims=True))
        og = jnp.einsum('gts,gsd->gtd', p, vg,
                        preferred_element_type=jnp.float32)       # (G, T, dh)

        # per-head output-projection contributions, then sum heads (no concat needed)
        cg = jnp.einsum('gtd,gde->gte', og, wo_ref[l],
                        preferred_element_type=jnp.float32)       # (G, T, E)
        attn = cg[0:B]
        for h in range(1, H):
            attn = attn + cg[h * B:(h + 1) * B]
        attn = attn + ob_ref[l]
        x = _layer_norm(x + attn, ln1w_ref[l], ln1b_ref[l])

        # ---------- cross-attention with memory (S == 1 => softmax == 1) ----------
        mem_v = jnp.dot(mem, ca_wv_ref[l],
                        preferred_element_type=jnp.float32) + ca_bv_ref[l]   # (B, E)
        ca = jnp.dot(mem_v, ca_wo_ref[l],
                     preferred_element_type=jnp.float32) + ca_bo_ref[l]      # (B, E)
        x = _layer_norm(x + ca[:, None, :], ln2w_ref[l], ln2b_ref[l])

        # ---------- feed-forward (Linear -> ReLU -> Linear) ----------
        x2 = x.reshape(B * T, E)
        h1 = jnp.maximum(
            jnp.dot(x2, w1_ref[l], preferred_element_type=jnp.float32) + b1_ref[l],
            0.0)
        ff = jnp.dot(h1, w2_ref[l], preferred_element_type=jnp.float32) + b2_ref[l]
        x = _layer_norm(x + ff.reshape(B, T, E), ln3w_ref[l], ln3b_ref[l])

    # ---------- fc_out, lane-dense (vocab padded to a multiple of 128) ----------
    x2 = x.reshape(B * T, E)
    out_ref[...] = (jnp.dot(x2, fc_w_ref[...], preferred_element_type=jnp.float32)
                    + fc_b_ref[...])


# ----------------------------- host-side weight packing ----------------------------


def pack_params_for_kernel(params, num_heads, batch_size):
    """Pre-transpose / head-split / layer-stack PyTorch-layout weights for the kernel."""
    V, E = params['embedding'].shape
    H = num_heads
    dh = E // H
    B = batch_size
    L = len(params['layers'])

    def split_heads_in(w_t):                # (E_in, E_out) -> (H*B, E_in, dh)
        wh = jnp.transpose(w_t.reshape(E, H, dh), (1, 0, 2))
        return jnp.repeat(wh, B, axis=0)    # group g = h*B + b

    def split_heads_bias(b_vec):            # (E,) -> (H*B, 1, dh)
        bh = b_vec.reshape(H, dh)
        return jnp.repeat(bh, B, axis=0)[:, None, :]

    keys = ['wq', 'bq', 'wk', 'bk', 'wv', 'bv', 'wo', 'ob',
            'ca_wv', 'ca_bv', 'ca_wo', 'ca_bo',
            'ln1w', 'ln1b', 'ln2w', 'ln2b',
            'w1', 'b1', 'w2', 'b2', 'ln3w', 'ln3b']
    per = {k: [] for k in keys}

    for lp in params['layers']:
        sa_w, sa_b = lp['sa_w'], lp['sa_b'][0]
        per['wq'].append(split_heads_in(sa_w[0:E].T))
        per['bq'].append(split_heads_bias(sa_b[0:E]))
        per['wk'].append(split_heads_in(sa_w[E:2 * E].T))
        per['bk'].append(split_heads_bias(sa_b[E:2 * E]))
        per['wv'].append(split_heads_in(sa_w[2 * E:3 * E].T))
        per['bv'].append(split_heads_bias(sa_b[2 * E:3 * E]))
        per['wo'].append(jnp.repeat(lp['sa_ow'].T.reshape(H, dh, E), B, axis=0))
        per['ob'].append(lp['sa_ob'])
        # cross-attention: S = 1 => only the V projection + output projection are needed
        ca_w, ca_b = lp['ca_w'], lp['ca_b'][0]
        per['ca_wv'].append(ca_w[2 * E:3 * E].T)           # (E_in, E_out)
        per['ca_bv'].append(ca_b[2 * E:3 * E][None, :])
        per['ca_wo'].append(lp['ca_ow'].T)
        per['ca_bo'].append(lp['ca_ob'])
        for k in ['ln1w', 'ln1b', 'ln2w', 'ln2b', 'ln3w', 'ln3b']:
            per[k].append(lp[k])
        per['w1'].append(lp['w1'].T)                       # (E, F)
        per['b1'].append(lp['b1'])
        per['w2'].append(lp['w2'].T)                       # (F, E)
        per['b2'].append(lp['b2'])

    packed = {k: jnp.stack(v, axis=0) for k, v in per.items()}

    Vp = ((V + 127) // 128) * 128                          # lane-dense padded vocab
    packed['fc_w'] = jnp.pad(params['fc_w'].T, ((0, 0), (0, Vp - V)))   # (E, Vp)
    packed['fc_b'] = jnp.pad(params['fc_b'], ((0, 0), (0, Vp - V)))     # (1, Vp)
    packed['embedding'] = params['embedding']
    packed['pe'] = params['pe']
    packed['weight_order'] = keys
    packed['meta'] = dict(num_heads=H, num_layers=L, vocab=V, vocab_padded=Vp, batch=B)
    return packed


# ----------------------------- forward (glue + single pallas_call) -----------------


def text_decoder_forward(packed, tgt, memory):
    """tgt: (T, B) int32, memory: (B, E) f32 -> logits (T, B, vocab)."""
    meta = packed['meta']
    T, B = tgt.shape
    assert B == meta['batch'], "weights were packed for a different batch size"
    V, E = packed['embedding'].shape
    Vp = meta['vocab_padded']

    # TODO(synk): embedding gather + positional-encoding add stay as host-side JAX glue
    # (data-dependent gather; not worth a Pallas kernel at this size).
    emb = packed['embedding'][tgt] + packed['pe'][:T]          # (T, B, E)
    x = jnp.transpose(emb, (1, 0, 2)).astype(jnp.float32)      # (B, T, E)

    operands = ([x, memory]
                + [packed[k] for k in packed['weight_order']]
                + [packed['fc_w'], packed['fc_b']])

    out = pl.pallas_call(
        functools.partial(fused_text_decoder_kernel,
                          num_layers=meta['num_layers'],
                          num_heads=meta['num_heads']),
        out_shape=jax.ShapeDtypeStruct((B * T, Vp), jnp.float32),
        # no grid / no BlockSpecs: everything (a few hundred KB) lives wholly in VMEM,
        # single grid point, single lane-dense output store.
    )(*operands)

    logits = out.reshape(B, T, Vp)[:, :, :V]
    return jnp.transpose(logits, (1, 0, 2))                    # (T, B, V)


# ----------------------------- synthetic params (PyTorch layout) -------------------


def positional_encoding_table(max_len, E):
    position = jnp.arange(max_len, dtype=jnp.float32)[:, None]
    div_term = jnp.exp(jnp.arange(0, E, 2, dtype=jnp.float32)
                       * (-jnp.log(10000.0) / E))
    pe = jnp.zeros((max_len, 1, E), dtype=jnp.float32)
    pe = pe.at[:, 0, 0::2].set(jnp.sin(position * div_term))
    pe = pe.at[:, 0, 1::2].set(jnp.cos(position * div_term))
    return pe


def init_params(key, vocab, E, F, num_layers, max_len=5000):
    keys = jax.random.split(key, 4 + num_layers)
    params = {
        'embedding': jax.random.normal(keys[0], (vocab, E), jnp.float32),
        'pe': positional_encoding_table(max_len, E),
        'fc_w': jax.random.normal(keys[1], (vocab, E), jnp.float32) * 0.02,
        'fc_b': jax.random.normal(keys[2], (1, vocab), jnp.float32) * 0.02,
        'layers': [],
    }
    for l in range(num_layers):
        k = jax.random.split(keys[4 + l], 10)
        lp = {
            'sa_w': jax.random.normal(k[0], (3 * E, E), jnp.float32) * 0.02,
            'sa_b': jax.random.normal(k[1], (1, 3 * E), jnp.float32) * 0.02,
            'sa_ow': jax.random.normal(k[2], (E, E), jnp.float32) * 0.02,
            'sa_ob': jax.random.normal(k[3], (1, E), jnp.float32) * 0.02,
            'ca_w': jax.random.normal(k[4], (3 * E, E), jnp.float32) * 0.02,
            'ca_b': jax.random.normal(k[5], (1, 3 * E), jnp.float32) * 0.02,
            'ca_ow': jax.random.normal(k[6], (E, E), jnp.float32) * 0.02,
            'ca_ob': jax.random.normal(k[7], (1, E), jnp.float32) * 0.02,
            'ln1w': jnp.ones((1, E), jnp.float32), 'ln1b': jnp.zeros((1, E), jnp.float32),
            'ln2w': jnp.ones((1, E), jnp.float32), 'ln2b': jnp.zeros((1, E), jnp.float32),
            'ln3w': jnp.ones((1, E), jnp.float32), 'ln3b': jnp.zeros((1, E), jnp.float32),
            'w1': jax.random.normal(k[8], (F, E), jnp.float32) * 0.02,
            'b1': jnp.zeros((1, F), jnp.float32),
            'w2': jax.random.normal(k[9], (E, F), jnp.float32) * 0.02,
            'b2': jnp.zeros((1, E), jnp.float32),
        }
        params['layers'].append(lp)
    return params


# ----------------------------- pure-JAX reference (for checking) -------------------


def reference_forward(params, tgt, memory, num_heads, E):
    hp = jax.lax.Precision.HIGHEST
    T, B = tgt.shape
    H = num_heads
    dh = E // H

    def lin(v, w, b):
        return jnp.einsum('...i,oi->...o', v, w, precision=hp) + b

    def mha(q_in, kv_in, in_w, in_b, out_w, out_b):
        q = lin(q_in, in_w[:E], in_b[:, :E])
        k = lin(kv_in, in_w[E:2 * E], in_b[:, E:2 * E])
        v = lin(kv_in, in_w[2 * E:], in_b[:, 2 * E:])

        def split(a):
            Bc, S, _ = a.shape
            return a.reshape(Bc, S, H, dh).transpose(0, 2, 1, 3)

        qh, kh, vh = split(q), split(k), split(v)
        s = jnp.einsum('bhtd,bhsd->bhts', qh * (dh ** -0.5), kh, precision=hp)
        p = jax.nn.softmax(s, axis=-1)
        o = jnp.einsum('bhts,bhsd->bhtd', p, vh, precision=hp)
        o = o.transpose(0, 2, 1, 3).reshape(q_in.shape[0], q_in.shape[1], E)
        return lin(o, out_w, out_b)

    def ln(v, w, b):
        mu = jnp.mean(v, axis=-1, keepdims=True)
        var = jnp.mean((v - mu) ** 2, axis=-1, keepdims=True)
        return (v - mu) / jnp.sqrt(var + 1e-5) * w + b

    emb = params['embedding'][tgt] + params['pe'][:T]
    x = jnp.transpose(emb, (1, 0, 2))         # (B, T, E)
    mem = memory[:, None, :]                  # (B, 1, E)
    for p_ in params['layers']:
        x = ln(x + mha(x, x, p_['sa_w'], p_['sa_b'], p_['sa_ow'], p_['sa_ob']),
               p_['ln1w'], p_['ln1b'])
        x = ln(x + mha(x, mem, p_['ca_w'], p_['ca_b'], p_['ca_ow'], p_['ca_ob']),
               p_['ln2w'], p_['ln2b'])
        h1 = jnp.maximum(lin(x, p_['w1'], p_['b1']), 0.0)
        x = ln(x + lin(h1, p_['w2'], p_['b2']), p_['ln3w'], p_['ln3b'])
    logits = lin(x, params['fc_w'], params['fc_b'])
    return jnp.transpose(logits, (1, 0, 2))


# ----------------------------- main -------------------------------------------------


if __name__ == "__main__":
    vocab_size, embedding_dim, decoder_dim = 64, 32, 64
    num_layers, num_heads = 2, 4
    T, B = 8, 2

    key = jax.random.PRNGKey(0)
    kp, kt, km = jax.random.split(key, 3)
    params = init_params(kp, vocab_size, embedding_dim, decoder_dim, num_layers)
    tgt = jax.random.randint(kt, (T, B), 0, vocab_size, dtype=jnp.int32)
    memory = jax.random.normal(km, (B, embedding_dim), jnp.float32)

    packed = pack_params_for_kernel(params, num_heads=num_heads, batch_size=B)

    out = text_decoder_forward(packed, tgt, memory)
    out = jax.block_until_ready(out)
    assert out.shape == (T, B, vocab_size)

    ref = reference_forward(params, tgt, memory, num_heads, embedding_dim)
    np.testing.assert_allclose(np.asarray(out), np.asarray(ref), rtol=2e-3, atol=2e-3)

    print("KERNEL_OK")
</pallas_src>

<mosaic_0001>
module attributes {stable_mosaic.version = 11 : i64} {
  func.func @fused_text_decoder_kernel(%arg0: memref<2x8x32xf32, #tpu.memory_space<vmem>>, %arg1: memref<2x32xf32, #tpu.memory_space<vmem>>, %arg2: memref<2x8x32x8xf32, #tpu.memory_space<vmem>>, %arg3: memref<2x8x1x8xf32, #tpu.memory_space<vmem>>, %arg4: memref<2x8x32x8xf32, #tpu.memory_space<vmem>>, %arg5: memref<2x8x1x8xf32, #tpu.memory_space<vmem>>, %arg6: memref<2x8x32x8xf32, #tpu.memory_space<vmem>>, %arg7: memref<2x8x1x8xf32, #tpu.memory_space<vmem>>, %arg8: memref<2x8x8x32xf32, #tpu.memory_space<vmem>>, %arg9: memref<2x1x32xf32, #tpu.memory_space<vmem>>, %arg10: memref<2x32x32xf32, #tpu.memory_space<vmem>>, %arg11: memref<2x1x32xf32, #tpu.memory_space<vmem>>, %arg12: memref<2x32x32xf32, #tpu.memory_space<vmem>>, %arg13: memref<2x1x32xf32, #tpu.memory_space<vmem>>, %arg14: memref<2x1x32xf32, #tpu.memory_space<vmem>>, %arg15: memref<2x1x32xf32, #tpu.memory_space<vmem>>, %arg16: memref<2x1x32xf32, #tpu.memory_space<vmem>>, %arg17: memref<2x1x32xf32, #tpu.memory_space<vmem>>, %arg18: memref<2x32x64xf32, #tpu.memory_space<vmem>>, %arg19: memref<2x1x64xf32, #tpu.memory_space<vmem>>, %arg20: memref<2x64x32xf32, #tpu.memory_space<vmem>>, %arg21: memref<2x1x32xf32, #tpu.memory_space<vmem>>, %arg22: memref<2x1x32xf32, #tpu.memory_space<vmem>>, %arg23: memref<2x1x32xf32, #tpu.memory_space<vmem>>, %arg24: memref<32x128xf32, #tpu.memory_space<vmem>>, %arg25: memref<1x128xf32, #tpu.memory_space<vmem>>, %arg26: memref<16x128xf32, #tpu.memory_space<vmem>>) attributes {dimension_semantics = [], scalar_prefetch = 0 : i64, scratch_operands = 0 : i64, tpu.core_type = #tpu.core_type<tc>} {
    %c0 = arith.constant 0 : index
    %c0_0 = arith.constant 0 : index
    %c0_1 = arith.constant 0 : index
    %0 = vector.load %arg0[%c0, %c0_0, %c0_1] : memref<2x8x32xf32, #tpu.memory_space<vmem>>, vector<2x8x32xf32>
    %c0_2 = arith.constant 0 : index
    %c0_3 = arith.constant 0 : index
    %1 = vector.load %arg1[%c0_2, %c0_3] : memref<2x32xf32, #tpu.memory_space<vmem>>, vector<2x32xf32>
    %2 = tpu.concatenate %0, %0, %0, %0 in 0 : vector<2x8x32xf32>, vector<2x8x32xf32>, vector<2x8x32xf32>, vector<2x8x32xf32> -> vector<8x8x32xf32>
    %c0_4 = arith.constant 0 : index
    %c0_5 = arith.constant 0 : index
    %c0_6 = arith.constant 0 : index
    %c0_7 = arith.constant 0 : index
    %3 = vector.load %arg2[%c0_4, %c0_5, %c0_6, %c0_7] : memref<2x8x32x8xf32, #tpu.memory_space<vmem>>, vector<1x8x32x8xf32>
    %4 = vector.shape_cast %3 : vector<1x8x32x8xf32> to vector<8x32x8xf32>
    "tpu.trace_start"() <{level = 10 : i32, message = "gte,ged->gtd"}> : () -> ()
    %cst = arith.constant dense<0.000000e+00> : vector<8x8x8xf32>
    %5 = tpu.matmul %2, %4, %cst {dimension_numbers = #tpu.dot_dimension_numbers<[2], [1], [1], [2], [0, 0, 0, 1, 1, 2], [0], [0]>} : vector<8x8x32xf32>, vector<8x32x8xf32>, vector<8x8x8xf32> -> vector<8x8x8xf32>
    "tpu.trace_stop"() : () -> ()
    %c0_8 = arith.constant 0 : index
    %c0_9 = arith.constant 0 : index
    %c0_10 = arith.constant 0 : index
    %c0_11 = arith.constant 0 : index
    %6 = vector.load %arg3[%c0_8, %c0_9, %c0_10, %c0_11] : memref<2x8x1x8xf32, #tpu.memory_space<vmem>>, vector<1x8x1x8xf32>
    %7 = vector.shape_cast %6 : vector<1x8x1x8xf32> to vector<8x1x8xf32>
    %8 = vector.broadcast %7 : vector<8x1x8xf32> to vector<8x8x8xf32>
    %9 = arith.addf %5, %8 : vector<8x8x8xf32>
    %c0_12 = arith.constant 0 : index
    %c0_13 = arith.constant 0 : index
    %c0_14 = arith.constant 0 : index
    %c0_15 = arith.constant 0 : index
    %10 = vector.load %arg4[%c0_12, %c0_13, %c0_14, %c0_15] : memref<2x8x32x8xf32, #tpu.memory_space<vmem>>, vector<1x8x32x8xf32>
    %11 = vector.shape_cast %10 : vector<1x8x32x8xf32> to vector<8x32x8xf32>
    "tpu.trace_start"() <{level = 10 : i32, message = "gte,ged->gtd"}> : () -> ()
    %cst_16 = arith.constant dense<0.000000e+00> : vector<8x8x8xf32>
    %12 = tpu.matmul %2, %11, %cst_16 {dimension_numbers = #tpu.dot_dimension_numbers<[2], [1], [1], [2], [0, 0, 0, 1, 1, 2], [0], [0]>} : vector<8x8x32xf32>, vector<8x32x8xf32>, vector<8x8x8xf32> -> vector<8x8x8xf32>
    "tpu.trace_stop"() : () -> ()
    %c0_17 = arith.constant 0 : index
    %c0_18 = arith.constant 0 : index
    %c0_19 = arith.constant 0 : index
    %c0_20 = arith.constant 0 : index
    %13 = vector.load %arg5[%c0_17, %c0_18, %c0_19, %c0_20] : memref<2x8x1x8xf32, #tpu.memory_space<vmem>>, vector<1x8x1x8xf32>
    %14 = vector.shape_cast %13 : vector<1x8x1x8xf32> to vector<8x1x8xf32>
    %15 = vector.broadcast %14 : vector<8x1x8xf32> to vector<8x8x8xf32>
    %16 = arith.addf %12, %15 : vector<8x8x8xf32>
    %c0_21 = arith.constant 0 : index
    %c0_22 = arith.constant 0 : index
    %c0_23 = arith.constant 0 : index
    %c0_24 = arith.constant 0 : index
    %17 = vector.load %arg6[%c0_21, %c0_22, %c0_23, %c0_24] : memref<2x8x32x8xf32, #tpu.memory_space<vmem>>, vector<1x8x32x8xf32>
    %18 = vector.shape_cast %17 : vector<1x8x32x8xf32> to vector<8x32x8xf32>
    "tpu.trace_start"() <{level = 10 : i32, message = "gte,ged->gtd"}> : () -> ()
    %cst_25 = arith.constant dense<0.000000e+00> : vector<8x8x8xf32>
    %19 = tpu.matmul %2, %18, %cst_25 {dimension_numbers = #tpu.dot_dimension_numbers<[2], [1], [1], [2], [0, 0, 0, 1, 1, 2], [0], [0]>} : vector<8x8x32xf32>, vector<8x32x8xf32>, vector<8x8x8xf32> -> vector<8x8x8xf32>
    "tpu.trace_stop"() : () -> ()
    %c0_26 = arith.constant 0 : index
    %c0_27 = arith.constant 0 : index
    %c0_28 = arith.constant 0 : index
    %c0_29 = arith.constant 0 : index
    %20 = vector.load %arg7[%c0_26, %c0_27, %c0_28, %c0_29] : memref<2x8x1x8xf32, #tpu.memory_space<vmem>>, vector<1x8x1x8xf32>
    %21 = vector.shape_cast %20 : vector<1x8x1x8xf32> to vector<8x1x8xf32>
    %22 = vector.broadcast %21 : vector<8x1x8xf32> to vector<8x8x8xf32>
    %23 = arith.addf %19, %22 : vector<8x8x8xf32>
    %cst_30 = arith.constant 0.353553385 : f32
    %24 = vector.broadcast %cst_30 : f32 to vector<8x8x8xf32>
    %25 = arith.mulf %9, %24 : vector<8x8x8xf32>
    "tpu.trace_start"() <{level = 10 : i32, message = "gtd,gsd->gts"}> : () -> ()
    %cst_31 = arith.constant dense<0.000000e+00> : vector<8x8x8xf32>
    %26 = tpu.matmul %25, %16, %cst_31 {dimension_numbers = #tpu.dot_dimension_numbers<[2], [2], [1], [1], [0, 0, 0, 1, 1, 1], [0], [0]>} : vector<8x8x8xf32>, vector<8x8x8xf32>, vector<8x8x8xf32> -> vector<8x8x8xf32>
    "tpu.trace_stop"() : () -> ()
    %cst_32 = arith.constant dense<0xFF800000> : vector<8x8xf32>
    %27 = vector.multi_reduction <maximumf>, %26, %cst_32 [2] : vector<8x8x8xf32> to vector<8x8xf32>
    %28 = vector.shape_cast %27 : vector<8x8xf32> to vector<8x8x1xf32>
    %29 = vector.broadcast %28 : vector<8x8x1xf32> to vector<8x8x8xf32>
    %30 = arith.subf %26, %29 : vector<8x8x8xf32>
    %31 = math.exp %30 : vector<8x8x8xf32>
    %cst_33 = arith.constant dense<0.000000e+00> : vector<8x8xf32>
    %32 = vector.multi_reduction <add>, %31, %cst_33 [2] : vector<8x8x8xf32> to vector<8x8xf32>
    %33 = vector.shape_cast %32 : vector<8x8xf32> to vector<8x8x1xf32>
    %cst_34 = arith.constant 1.000000e+00 : f32
    %34 = vector.broadcast %cst_34 : f32 to vector<8x8x1xf32>
    %35 = arith.divf %34, %33 : vector<8x8x1xf32>
    %36 = vector.broadcast %35 : vector<8x8x1xf32> to vector<8x8x8xf32>
    %37 = arith.mulf %31, %36 : vector<8x8x8xf32>
    "tpu.trace_start"() <{level = 10 : i32, message = "gts,gsd->gtd"}> : () -> ()
    %cst_35 = arith.constant dense<0.000000e+00> : vector<8x8x8xf32>
    %38 = tpu.matmul %37, %23, %cst_35 {dimension_numbers = #tpu.dot_dimension_numbers<[2], [1], [1], [2], [0, 0, 0, 1, 1, 2], [0], [0]>} : vector<8x8x8xf32>, vector<8x8x8xf32>, vector<8x8x8xf32> -> vector<8x8x8xf32>
    "tpu.trace_stop"() : () -> ()
    %c0_36 = arith.constant 0 : index
    %c0_37 = arith.constant 0 : index
    %c0_38 = arith.constant 0 : index
    %c0_39 = arith.constant 0 : index
    %39 = vector.load %arg8[%c0_36, %c0_37, %c0_38, %c0_39] : memref<2x8x8x32xf32, #tpu.memory_space<vmem>>, vector<1x8x8x32xf32>
    %40 = vector.shape_cast %39 : vector<1x8x8x32xf32> to vector<8x8x32xf32>
    "tpu.trace_start"() <{level = 10 : i32, message = "gtd,gde->gte"}> : () -> ()
    %cst_40 = arith.constant dense<0.000000e+00> : vector<8x8x32xf32>
    %41 = tpu.matmul %38, %40, %cst_40 {dimension_numbers = #tpu.dot_dimension_numbers<[2], [1], [1], [2], [0, 0, 0, 1, 1, 2], [0], [0]>} : vector<8x8x8xf32>, vector<8x8x32xf32>, vector<8x8x32xf32> -> vector<8x8x32xf32>
    "tpu.trace_stop"() : () -> ()
    %42 = vector.extract_strided_slice %41 {offsets = [0, 0, 0], sizes = [2, 8, 32], strides = [1, 1, 1]} : vector<8x8x32xf32> to vector<2x8x32xf32>
    %43 = vector.extract_strided_slice %41 {offsets = [2, 0, 0], sizes = [2, 8, 32], strides = [1, 1, 1]} : vector<8x8x32xf32> to vector<2x8x32xf32>
    %44 = arith.addf %42, %43 : vector<2x8x32xf32>
    %45 = vector.extract_strided_slice %41 {offsets = [4, 0, 0], sizes = [2, 8, 32], strides = [1, 1, 1]} : vector<8x8x32xf32> to vector<2x8x32xf32>
    %46 = arith.addf %44, %45 : vector<2x8x32xf32>
    %47 = vector.extract_strided_slice %41 {offsets = [6, 0, 0], sizes = [2, 8, 32], strides = [1, 1, 1]} : vector<8x8x32xf32> to vector<2x8x32xf32>
    %48 = arith.addf %46, %47 : vector<2x8x32xf32>
    %c0_41 = arith.constant 0 : index
    %c0_42 = arith.constant 0 : index
    %c0_43 = arith.constant 0 : index
    %49 = vector.load %arg9[%c0_41, %c0_42, %c0_43] : memref<2x1x32xf32, #tpu.memory_space<vmem>>, vector<1x1x32xf32>
    %50 = vector.shape_cast %49 : vector<1x1x32xf32> to vector<1x32xf32>
    %51 = vector.shape_cast %50 : vector<1x32xf32> to vector<1x1x32xf32>
    %52 = vector.broadcast %51 : vector<1x1x32xf32> to vector<2x8x32xf32>
    %53 = arith.addf %48, %52 : vector<2x8x32xf32>
    %54 = arith.addf %0, %53 : vector<2x8x32xf32>
    %c0_44 = arith.constant 0 : index
    %c0_45 = arith.constant 0 : index
    %c0_46 = arith.constant 0 : index
    %55 = vector.load %arg14[%c0_44, %c0_45, %c0_46] : memref<2x1x32xf32, #tpu.memory_space<vmem>>, vector<1x1x32xf32>
    %56 = vector.shape_cast %55 : vector<1x1x32xf32> to vector<1x32xf32>
    %c0_47 = arith.constant 0 : index
    %c0_48 = arith.constant 0 : index
    %c0_49 = arith.constant 0 : index
    %57 = vector.load %arg15[%c0_47, %c0_48, %c0_49] : memref<2x1x32xf32, #tpu.memory_space<vmem>>, vector<1x1x32xf32>
    %58 = vector.shape_cast %57 : vector<1x1x32xf32> to vector<1x32xf32>
    %cst_50 = arith.constant dense<0.000000e+00> : vector<2x8xf32>
    %59 = vector.multi_reduction <add>, %54, %cst_50 [2] : vector<2x8x32xf32> to vector<2x8xf32>
    %60 = vector.shape_cast %59 : vector<2x8xf32> to vector<2x8x1xf32>
    %cst_51 = arith.constant 3.200000e+01 : f32
    %61 = vector.broadcast %cst_51 : f32 to vector<2x8x1xf32>
    %62 = arith.divf %60, %61 : vector<2x8x1xf32>
    %63 = vector.broadcast %62 : vector<2x8x1xf32> to vector<2x8x32xf32>
    %64 = arith.subf %54, %63 : vector<2x8x32xf32>
    %65 = arith.mulf %64, %64 : vector<2x8x32xf32>
    %cst_52 = arith.constant dense<0.000000e+00> : vector<2x8xf32>
    %66 = vector.multi_reduction <add>, %65, %cst_52 [2] : vector<2x8x32xf32> to vector<2x8xf32>
    %67 = vector.shape_cast %66 : vector<2x8xf32> to vector<2x8x1xf32>
    %cst_53 = arith.constant 3.200000e+01 : f32
    %68 = vector.broadcast %cst_53 : f32 to vector<2x8x1xf32>
    %69 = arith.divf %67, %68 : vector<2x8x1xf32>
    %70 = vector.broadcast %62 : vector<2x8x1xf32> to vector<2x8x32xf32>
    %71 = arith.subf %54, %70 : vector<2x8x32xf32>
    %cst_54 = arith.constant 9.99999974E-6 : f32
    %72 = vector.broadcast %cst_54 : f32 to vector<2x8x1xf32>
    %73 = arith.addf %69, %72 : vector<2x8x1xf32>
    %74 = math.rsqrt %73 : vector<2x8x1xf32>
    %75 = vector.broadcast %74 : vector<2x8x1xf32> to vector<2x8x32xf32>
    %76 = arith.mulf %71, %75 : vector<2x8x32xf32>
    %77 = vector.shape_cast %56 : vector<1x32xf32> to vector<1x1x32xf32>
    %78 = vector.broadcast %77 : vector<1x1x32xf32> to vector<2x8x32xf32>
    %79 = arith.mulf %76, %78 : vector<2x8x32xf32>
    %80 = vector.shape_cast %58 : vector<1x32xf32> to vector<1x1x32xf32>
    %81 = vector.broadcast %80 : vector<1x1x32xf32> to vector<2x8x32xf32>
    %82 = arith.addf %79, %81 : vector<2x8x32xf32>
    %c0_55 = arith.constant 0 : index
    %c0_56 = arith.constant 0 : index
    %c0_57 = arith.constant 0 : index
    %83 = vector.load %arg10[%c0_55, %c0_56, %c0_57] : memref<2x32x32xf32, #tpu.memory_space<vmem>>, vector<1x32x32xf32>
    %84 = vector.shape_cast %83 : vector<1x32x32xf32> to vector<32x32xf32>
    %cst_58 = arith.constant dense<0.000000e+00> : vector<2x32xf32>
    %85 = tpu.matmul %1, %84, %cst_58 {dimension_numbers = #tpu.dot_dimension_numbers<[1], [0], [0], [1], [0, 0, 1, 1], [], []>} : vector<2x32xf32>, vector<32x32xf32>, vector<2x32xf32> -> vector<2x32xf32>
    %c0_59 = arith.constant 0 : index
    %c0_60 = arith.constant 0 : index
    %c0_61 = arith.constant 0 : index
    %86 = vector.load %arg11[%c0_59, %c0_60, %c0_61] : memref<2x1x32xf32, #tpu.memory_space<vmem>>, vector<1x1x32xf32>
    %87 = vector.shape_cast %86 : vector<1x1x32xf32> to vector<1x32xf32>
    %88 = vector.broadcast %87 : vector<1x32xf32> to vector<2x32xf32>
    %89 = arith.addf %85, %88 : vector<2x32xf32>
    %c0_62 = arith.constant 0 : index
    %c0_63 = arith.constant 0 : index
    %c0_64 = arith.constant 0 : index
    %90 = vector.load %arg12[%c0_62, %c0_63, %c0_64] : memref<2x32x32xf32, #tpu.memory_space<vmem>>, vector<1x32x32xf32>
    %91 = vector.shape_cast %90 : vector<1x32x32xf32> to vector<32x32xf32>
    %cst_65 = arith.constant dense<0.000000e+00> : vector<2x32xf32>
    %92 = tpu.matmul %89, %91, %cst_65 {dimension_numbers = #tpu.dot_dimension_numbers<[1], [0], [0], [1], [0, 0, 1, 1], [], []>} : vector<2x32xf32>, vector<32x32xf32>, vector<2x32xf32> -> vector<2x32xf32>
    %c0_66 = arith.constant 0 : index
    %c0_67 = arith.constant 0 : index
    %c0_68 = arith.constant 0 : index
    %93 = vector.load %arg13[%c0_66, %c0_67, %c0_68] : memref<2x1x32xf32, #tpu.memory_space<vmem>>, vector<1x1x32xf32>
    %94 = vector.shape_cast %93 : vector<1x1x32xf32> to vector<1x32xf32>
    %95 = vector.broadcast %94 : vector<1x32xf32> to vector<2x32xf32>
    %96 = arith.addf %92, %95 : vector<2x32xf32>
    %97 = vector.shape_cast %96 : vector<2x32xf32> to vector<2x1x32xf32>
    %98 = vector.broadcast %97 : vector<2x1x32xf32> to vector<2x8x32xf32>
    %99 = arith.addf %82, %98 : vector<2x8x32xf32>
    %c0_69 = arith.constant 0 : index
    %c0_70 = arith.constant 0 : index
    %c0_71 = arith.constant 0 : index
    %100 = vector.load %arg16[%c0_69, %c0_70, %c0_71] : memref<2x1x32xf32, #tpu.memory_space<vmem>>, vector<1x1x32xf32>
    %101 = vector.shape_cast %100 : vector<1x1x32xf32> to vector<1x32xf32>
    %c0_72 = arith.constant 0 : index
    %c0_73 = arith.constant 0 : index
    %c0_74 = arith.constant 0 : index
    %102 = vector.load %arg17[%c0_72, %c0_73, %c0_74] : memref<2x1x32xf32, #tpu.memory_space<vmem>>, vector<1x1x32xf32>
    %103 = vector.shape_cast %102 : vector<1x1x32xf32> to vector<1x32xf32>
    %cst_75 = arith.constant dense<0.000000e+00> : vector<2x8xf32>
    %104 = vector.multi_reduction <add>, %99, %cst_75 [2] : vector<2x8x32xf32> to vector<2x8xf32>
    %105 = vector.shape_cast %104 : vector<2x8xf32> to vector<2x8x1xf32>
    %cst_76 = arith.constant 3.200000e+01 : f32
    %106 = vector.broadcast %cst_76 : f32 to vector<2x8x1xf32>
    %107 = arith.divf %105, %106 : vector<2x8x1xf32>
    %108 = vector.broadcast %107 : vector<2x8x1xf32> to vector<2x8x32xf32>
    %109 = arith.subf %99, %108 : vector<2x8x32xf32>
    %110 = arith.mulf %109, %109 : vector<2x8x32xf32>
    %cst_77 = arith.constant dense<0.000000e+00> : vector<2x8xf32>
    %111 = vector.multi_reduction <add>, %110, %cst_77 [2] : vector<2x8x32xf32> to vector<2x8xf32>
    %112 = vector.shape_cast %111 : vector<2x8xf32> to vector<2x8x1xf32>
    %cst_78 = arith.constant 3.200000e+01 : f32
    %113 = vector.broadcast %cst_78 : f32 to vector<2x8x1xf32>
    %114 = arith.divf %112, %113 : vector<2x8x1xf32>
    %115 = vector.broadcast %107 : vector<2x8x1xf32> to vector<2x8x32xf32>
    %116 = arith.subf %99, %115 : vector<2x8x32xf32>
    %cst_79 = arith.constant 9.99999974E-6 : f32
    %117 = vector.broadcast %cst_79 : f32 to vector<2x8x1xf32>
    %118 = arith.addf %114, %117 : vector<2x8x1xf32>
    %119 = math.rsqrt %118 : vector<2x8x1xf32>
    %120 = vector.broadcast %119 : vector<2x8x1xf32> to vector<2x8x32xf32>
    %121 = arith.mulf %116, %120 : vector<2x8x32xf32>
    %122 = vector.shape_cast %101 : vector<1x32xf32> to vector<1x1x32xf32>
    %123 = vector.broadcast %122 : vector<1x1x32xf32> to vector<2x8x32xf32>
    %124 = arith.mulf %121, %123 : vector<2x8x32xf32>
    %125 = vector.shape_cast %103 : vector<1x32xf32> to vector<1x1x32xf32>
    %126 = vector.broadcast %125 : vector<1x1x32xf32> to vector<2x8x32xf32>
    %127 = arith.addf %124, %126 : vector<2x8x32xf32>
    %128 = vector.shape_cast %127 : vector<2x8x32xf32> to vector<16x32xf32>
    %c0_80 = arith.constant 0 : index
    %c0_81 = arith.constant 0 : index
    %c0_82 = arith.constant 0 : index
    %129 = vector.load %arg18[%c0_80, %c0_81, %c0_82] : memref<2x32x64xf32, #tpu.memory_space<vmem>>, vector<1x32x64xf32>
    %130 = vector.shape_cast %129 : vector<1x32x64xf32> to vector<32x64xf32>
    %cst_83 = arith.constant dense<0.000000e+00> : vector<16x64xf32>
    %131 = tpu.matmul %128, %130, %cst_83 {dimension_numbers = #tpu.dot_dimension_numbers<[1], [0], [0], [1], [0, 0, 1, 1], [], []>} : vector<16x32xf32>, vector<32x64xf32>, vector<16x64xf32> -> vector<16x64xf32>
    %c0_84 = arith.constant 0 : index
    %c0_85 = arith.constant 0 : index
    %c0_86 = arith.constant 0 : index
    %132 = vector.load %arg19[%c0_84, %c0_85, %c0_86] : memref<2x1x64xf32, #tpu.memory_space<vmem>>, vector<1x1x64xf32>
    %133 = vector.shape_cast %132 : vector<1x1x64xf32> to vector<1x64xf32>
    %134 = vector.broadcast %133 : vector<1x64xf32> to vector<16x64xf32>
    %135 = arith.addf %131, %134 : vector<16x64xf32>
    %cst_87 = arith.constant 0.000000e+00 : f32
    %136 = vector.broadcast %cst_87 : f32 to vector<16x64xf32>
    %137 = arith.maximumf %135, %136 : vector<16x64xf32>
    %c0_88 = arith.constant 0 : index
    %c0_89 = arith.constant 0 : index
    %c0_90 = arith.constant 0 : index
    %138 = vector.load %arg20[%c0_88, %c0_89, %c0_90] : memref<2x64x32xf32, #tpu.memory_space<vmem>>, vector<1x64x32xf32>
    %139 = vector.shape_cast %138 : vector<1x64x32xf32> to vector<64x32xf32>
    %cst_91 = arith.constant dense<0.000000e+00> : vector<16x32xf32>
    %140 = tpu.matmul %137, %139, %cst_91 {dimension_numbers = #tpu.dot_dimension_numbers<[1], [0], [0], [1], [0, 0, 1, 1], [], []>} : vector<16x64xf32>, vector<64x32xf32>, vector<16x32xf32> -> vector<16x32xf32>
    %c0_92 = arith.constant 0 : index
    %c0_93 = arith.constant 0 : index
    %c0_94 = arith.constant 0 : index
    %141 = vector.load %arg21[%c0_92, %c0_93, %c0_94] : memref<2x1x32xf32, #tpu.memory_space<vmem>>, vector<1x1x32xf32>
    %142 = vector.shape_cast %141 : vector<1x1x32xf32> to vector<1x32xf32>
    %143 = vector.broadcast %142 : vector<1x32xf32> to vector<16x32xf32>
    %144 = arith.addf %140, %143 : vector<16x32xf32>
    %145 = vector.shape_cast %144 : vector<16x32xf32> to vector<2x8x32xf32>
    %146 = arith.addf %127, %145 : vector<2x8x32xf32>
    %c0_95 = arith.constant 0 : index
    %c0_96 = arith.constant 0 : index
    %c0_97 = arith.constant 0 : index
    %147 = vector.load %arg22[%c0_95, %c0_96, %c0_97] : memref<2x1x32xf32, #tpu.memory_space<vmem>>, vector<1x1x32xf32>
    %148 = vector.shape_cast %147 : vector<1x1x32xf32> to vector<1x32xf32>
    %c0_98 = arith.constant 0 : index
    %c0_99 = arith.constant 0 : index
    %c0_100 = arith.constant 0 : index
    %149 = vector.load %arg23[%c0_98, %c0_99, %c0_100] : memref<2x1x32xf32, #tpu.memory_space<vmem>>, vector<1x1x32xf32>
    %150 = vector.shape_cast %149 : vector<1x1x32xf32> to vector<1x32xf32>
    %cst_101 = arith.constant dense<0.000000e+00> : vector<2x8xf32>
    %151 = vector.multi_reduction <add>, %146, %cst_101 [2] : vector<2x8x32xf32> to vector<2x8xf32>
    %152 = vector.shape_cast %151 : vector<2x8xf32> to vector<2x8x1xf32>
    %cst_102 = arith.constant 3.200000e+01 : f32
    %153 = vector.broadcast %cst_102 : f32 to vector<2x8x1xf32>
    %154 = arith.divf %152, %153 : vector<2x8x1xf32>
    %155 = vector.broadcast %154 : vector<2x8x1xf32> to vector<2x8x32xf32>
    %156 = arith.subf %146, %155 : vector<2x8x32xf32>
    %157 = arith.mulf %156, %156 : vector<2x8x32xf32>
    %cst_103 = arith.constant dense<0.000000e+00> : vector<2x8xf32>
    %158 = vector.multi_reduction <add>, %157, %cst_103 [2] : vector<2x8x32xf32> to vector<2x8xf32>
    %159 = vector.shape_cast %158 : vector<2x8xf32> to vector<2x8x1xf32>
    %cst_104 = arith.constant 3.200000e+01 : f32
    %160 = vector.broadcast %cst_104 : f32 to vector<2x8x1xf32>
    %161 = arith.divf %159, %160 : vector<2x8x1xf32>
    %162 = vector.broadcast %154 : vector<2x8x1xf32> to vector<2x8x32xf32>
    %163 = arith.subf %146, %162 : vector<2x8x32xf32>
    %cst_105 = arith.constant 9.99999974E-6 : f32
    %164 = vector.broadcast %cst_105 : f32 to vector<2x8x1xf32>
    %165 = arith.addf %161, %164 : vector<2x8x1xf32>
    %166 = math.rsqrt %165 : vector<2x8x1xf32>
    %167 = vector.broadcast %166 : vector<2x8x1xf32> to vector<2x8x32xf32>
    %168 = arith.mulf %163, %167 : vector<2x8x32xf32>
    %169 = vector.shape_cast %148 : vector<1x32xf32> to vector<1x1x32xf32>
    %170 = vector.broadcast %169 : vector<1x1x32xf32> to vector<2x8x32xf32>
    %171 = arith.mulf %168, %170 : vector<2x8x32xf32>
    %172 = vector.shape_cast %150 : vector<1x32xf32> to vector<1x1x32xf32>
    %173 = vector.broadcast %172 : vector<1x1x32xf32> to vector<2x8x32xf32>
    %174 = arith.addf %171, %173 : vector<2x8x32xf32>
    %175 = tpu.concatenate %174, %174, %174, %174 in 0 : vector<2x8x32xf32>, vector<2x8x32xf32>, vector<2x8x32xf32>, vector<2x8x32xf32> -> vector<8x8x32xf32>
    %c1 = arith.constant 1 : index
    %c0_106 = arith.constant 0 : index
    %c0_107 = arith.constant 0 : index
    %c0_108 = arith.constant 0 : index
    %176 = vector.load %arg2[%c1, %c0_106, %c0_107, %c0_108] : memref<2x8x32x8xf32, #tpu.memory_space<vmem>>, vector<1x8x32x8xf32>
    %177 = vector.shape_cast %176 : vector<1x8x32x8xf32> to vector<8x32x8xf32>
    "tpu.trace_start"() <{level = 10 : i32, message = "gte,ged->gtd"}> : () -> ()
    %cst_109 = arith.constant dense<0.000000e+00> : vector<8x8x8xf32>
    %178 = tpu.matmul %175, %177, %cst_109 {dimension_numbers = #tpu.dot_dimension_numbers<[2], [1], [1], [2], [0, 0, 0, 1, 1, 2], [0], [0]>} : vector<8x8x32xf32>, vector<8x32x8xf32>, vector<8x8x8xf32> -> vector<8x8x8xf32>
    "tpu.trace_stop"() : () -> ()
    %c1_110 = arith.constant 1 : index
    %c0_111 = arith.constant 0 : index
    %c0_112 = arith.constant 0 : index
    %c0_113 = arith.constant 0 : index
    %179 = vector.load %arg3[%c1_110, %c0_111, %c0_112, %c0_113] : memref<2x8x1x8xf32, #tpu.memory_space<vmem>>, vector<1x8x1x8xf32>
    %180 = vector.shape_cast %179 : vector<1x8x1x8xf32> to vector<8x1x8xf32>
    %181 = vector.broadcast %180 : vector<8x1x8xf32> to vector<8x8x8xf32>
    %182 = arith.addf %178, %181 : vector<8x8x8xf32>
    %c1_114 = arith.constant 1 : index
    %c0_115 = arith.constant 0 : index
    %c0_116 = arith.constant 0 : index
    %c0_117 = arith.constant 0 : index
    %183 = vector.load %arg4[%c1_114, %c0_115, %c0_116, %c0_117] : memref<2x8x32x8xf32, #tpu.memory_space<vmem>>, vector<1x8x32x8xf32>
    %184 = vector.shape_cast %183 : vector<1x8x32x8xf32> to vector<8x32x8xf32>
    "tpu.trace_start"() <{level = 10 : i32, message = "gte,ged->gtd"}> : () -> ()
    %cst_118 = arith.constant dense<0.000000e+00> : vector<8x8x8xf32>
    %185 = tpu.matmul %175, %184, %cst_118 {dimension_numbers = #tpu.dot_dimension_numbers<[2], [1], [1], [2], [0, 0, 0, 1, 1, 2], [0], [0]>} : vector<8x8x32xf32>, vector<8x32x8xf32>, vector<8x8x8xf32> -> vector<8x8x8xf32>
    "tpu.trace_stop"() : () -> ()
    %c1_119 = arith.constant 1 : index
    %c0_120 = arith.constant 0 : index
    %c0_121 = arith.constant 0 : index
    %c0_122 = arith.constant 0 : index
    %186 = vector.load %arg5[%c1_119, %c0_120, %c0_121, %c0_122] : memref<2x8x1x8xf32, #tpu.memory_space<vmem>>, vector<1x8x1x8xf32>
    %187 = vector.shape_cast %186 : vector<1x8x1x8xf32> to vector<8x1x8xf32>
    %188 = vector.broadcast %187 : vector<8x1x8xf32> to vector<8x8x8xf32>
    %189 = arith.addf %185, %188 : vector<8x8x8xf32>
    %c1_123 = arith.constant 1 : index
    %c0_124 = arith.constant 0 : index
    %c0_125 = arith.constant 0 : index
    %c0_126 = arith.constant 0 : index
    %190 = vector.load %arg6[%c1_123, %c0_124, %c0_125, %c0_126] : memref<2x8x32x8xf32, #tpu.memory_space<vmem>>, vector<1x8x32x8xf32>
    %191 = vector.shape_cast %190 : vector<1x8x32x8xf32> to vector<8x32x8xf32>
    "tpu.trace_start"() <{level = 10 : i32, message = "gte,ged->gtd"}> : () -> ()
    %cst_127 = arith.constant dense<0.000000e+00> : vector<8x8x8xf32>
    %192 = tpu.matmul %175, %191, %cst_127 {dimension_numbers = #tpu.dot_dimension_numbers<[2], [1], [1], [2], [0, 0, 0, 1, 1, 2], [0], [0]>} : vector<8x8x32xf32>, vector<8x32x8xf32>, vector<8x8x8xf32> -> vector<8x8x8xf32>
    "tpu.trace_stop"() : () -> ()
    %c1_128 = arith.constant 1 : index
    %c0_129 = arith.constant 0 : index
    %c0_130 = arith.constant 0 : index
    %c0_131 = arith.constant 0 : index
    %193 = vector.load %arg7[%c1_128, %c0_129, %c0_130, %c0_131] : memref<2x8x1x8xf32, #tpu.memory_space<vmem>>, vector<1x8x1x8xf32>
    %194 = vector.shape_cast %193 : vector<1x8x1x8xf32> to vector<8x1x8xf32>
    %195 = vector.broadcast %194 : vector<8x1x8xf32> to vector<8x8x8xf32>
    %196 = arith.addf %192, %195 : vector<8x8x8xf32>
    %cst_132 = arith.constant 0.353553385 : f32
    %197 = vector.broadcast %cst_132 : f32 to vector<8x8x8xf32>
    %198 = arith.mulf %182, %197 : vector<8x8x8xf32>
    "tpu.trace_start"() <{level = 10 : i32, message = "gtd,gsd->gts"}> : () -> ()
    %cst_133 = arith.constant dense<0.000000e+00> : vector<8x8x8xf32>
    %199 = tpu.matmul %198, %189, %cst_133 {dimension_numbers = #tpu.dot_dimension_numbers<[2], [2], [1], [1], [0, 0, 0, 1, 1, 1], [0], [0]>} : vector<8x8x8xf32>, vector<8x8x8xf32>, vector<8x8x8xf32> -> vector<8x8x8xf32>
    "tpu.trace_stop"() : () -> ()
    %cst_134 = arith.constant dense<0xFF800000> : vector<8x8xf32>
    %200 = vector.multi_reduction <maximumf>, %199, %cst_134 [2] : vector<8x8x8xf32> to vector<8x8xf32>
    %201 = vector.shape_cast %200 : vector<8x8xf32> to vector<8x8x1xf32>
    %202 = vector.broadcast %201 : vector<8x8x1xf32> to vector<8x8x8xf32>
    %203 = arith.subf %199, %202 : vector<8x8x8xf32>
    %204 = math.exp %203 : vector<8x8x8xf32>
    %cst_135 = arith.constant dense<0.000000e+00> : vector<8x8xf32>
    %205 = vector.multi_reduction <add>, %204, %cst_135 [2] : vector<8x8x8xf32> to vector<8x8xf32>
    %206 = vector.shape_cast %205 : vector<8x8xf32> to vector<8x8x1xf32>
    %cst_136 = arith.constant 1.000000e+00 : f32
    %207 = vector.broadcast %cst_136 : f32 to vector<8x8x1xf32>
    %208 = arith.divf %207, %206 : vector<8x8x1xf32>
    %209 = vector.broadcast %208 : vector<8x8x1xf32> to vector<8x8x8xf32>
    %210 = arith.mulf %204, %209 : vector<8x8x8xf32>
    "tpu.trace_start"() <{level = 10 : i32, message = "gts,gsd->gtd"}> : () -> ()
    %cst_137 = arith.constant dense<0.000000e+00> : vector<8x8x8xf32>
    %211 = tpu.matmul %210, %196, %cst_137 {dimension_numbers = #tpu.dot_dimension_numbers<[2], [1], [1], [2], [0, 0, 0, 1, 1, 2], [0], [0]>} : vector<8x8x8xf32>, vector<8x8x8xf32>, vector<8x8x8xf32> -> vector<8x8x8xf32>
    "tpu.trace_stop"() : () -> ()
    %c1_138 = arith.constant 1 : index
    %c0_139 = arith.constant 0 : index
    %c0_140 = arith.constant 0 : index
    %c0_141 = arith.constant 0 : index
    %212 = vector.load %arg8[%c1_138, %c0_139, %c0_140, %c0_141] : memref<2x8x8x32xf32, #tpu.memory_space<vmem>>, vector<1x8x8x32xf32>
    %213 = vector.shape_cast %212 : vector<1x8x8x32xf32> to vector<8x8x32xf32>
    "tpu.trace_start"() <{level = 10 : i32, message = "gtd,gde->gte"}> : () -> ()
    %cst_142 = arith.constant dense<0.000000e+00> : vector<8x8x32xf32>
    %214 = tpu.matmul %211, %213, %cst_142 {dimension_numbers = #tpu.dot_dimension_numbers<[2], [1], [1], [2], [0, 0, 0, 1, 1, 2], [0], [0]>} : vector<8x8x8xf32>, vector<8x8x32xf32>, vector<8x8x32xf32> -> vector<8x8x32xf32>
    "tpu.trace_stop"() : () -> ()
    %215 = vector.extract_strided_slice %214 {offsets = [0, 0, 0], sizes = [2, 8, 32], strides = [1, 1, 1]} : vector<8x8x32xf32> to vector<2x8x32xf32>
    %216 = vector.extract_strided_slice %214 {offsets = [2, 0, 0], sizes = [2, 8, 32], strides = [1, 1, 1]} : vector<8x8x32xf32> to vector<2x8x32xf32>
    %217 = arith.addf %215, %216 : vector<2x8x32xf32>
    %218 = vector.extract_strided_slice %214 {offsets = [4, 0, 0], sizes = [2, 8, 32], strides = [1, 1, 1]} : vector<8x8x32xf32> to vector<2x8x32xf32>
    %219 = arith.addf %217, %218 : vector<2x8x32xf32>
    %220 = vector.extract_strided_slice %214 {offsets = [6, 0, 0], sizes = [2, 8, 32], strides = [1, 1, 1]} : vector<8x8x32xf32> to vector<2x8x32xf32>
    %221 = arith.addf %219, %220 : vector<2x8x32xf32>
    %c1_143 = arith.constant 1 : index
    %c0_144 = arith.constant 0 : index
    %c0_145 = arith.constant 0 : index
    %222 = vector.load %arg9[%c1_143, %c0_144, %c0_145] : memref<2x1x32xf32, #tpu.memory_space<vmem>>, vector<1x1x32xf32>
    %223 = vector.shape_cast %222 : vector<1x1x32xf32> to vector<1x32xf32>
    %224 = vector.shape_cast %223 : vector<1x32xf32> to vector<1x1x32xf32>
    %225 = vector.broadcast %224 : vector<1x1x32xf32> to vector<2x8x32xf32>
    %226 = arith.addf %221, %225 : vector<2x8x32xf32>
    %227 = arith.addf %174, %226 : vector<2x8x32xf32>
    %c1_146 = arith.constant 1 : index
    %c0_147 = arith.constant 0 : index
    %c0_148 = arith.constant 0 : index
    %228 = vector.load %arg14[%c1_146, %c0_147, %c0_148] : memref<2x1x32xf32, #tpu.memory_space<vmem>>, vector<1x1x32xf32>
    %229 = vector.shape_cast %228 : vector<1x1x32xf32> to vector<1x32xf32>
    %c1_149 = arith.constant 1 : index
    %c0_150 = arith.constant 0 : index
    %c0_151 = arith.constant 0 : index
    %230 = vector.load %arg15[%c1_149, %c0_150, %c0_151] : memref<2x1x32xf32, #tpu.memory_space<vmem>>, vector<1x1x32xf32>
    %231 = vector.shape_cast %230 : vector<1x1x32xf32> to vector<1x32xf32>
    %cst_152 = arith.constant dense<0.000000e+00> : vector<2x8xf32>
    %232 = vector.multi_reduction <add>, %227, %cst_152 [2] : vector<2x8x32xf32> to vector<2x8xf32>
    %233 = vector.shape_cast %232 : vector<2x8xf32> to vector<2x8x1xf32>
    %cst_153 = arith.constant 3.200000e+01 : f32
    %234 = vector.broadcast %cst_153 : f32 to vector<2x8x1xf32>
    %235 = arith.divf %233, %234 : vector<2x8x1xf32>
    %236 = vector.broadcast %235 : vector<2x8x1xf32> to vector<2x8x32xf32>
    %237 = arith.subf %227, %236 : vector<2x8x32xf32>
    %238 = arith.mulf %237, %237 : vector<2x8x32xf32>
    %cst_154 = arith.constant dense<0.000000e+00> : vector<2x8xf32>
    %239 = vector.multi_reduction <add>, %238, %cst_154 [2] : vector<2x8x32xf32> to vector<2x8xf32>
    %240 = vector.shape_cast %239 : vector<2x8xf32> to vector<2x8x1xf32>
    %cst_155 = arith.constant 3.200000e+01 : f32
    %241 = vector.broadcast %cst_155 : f32 to vector<2x8x1xf32>
    %242 = arith.divf %240, %241 : vector<2x8x1xf32>
    %243 = vector.broadcast %235 : vector<2x8x1xf32> to vector<2x8x32xf32>
    %244 = arith.subf %227, %243 : vector<2x8x32xf32>
    %cst_156 = arith.constant 9.99999974E-6 : f32
    %245 = vector.broadcast %cst_156 : f32 to vector<2x8x1xf32>
    %246 = arith.addf %242, %245 : vector<2x8x1xf32>
    %247 = math.rsqrt %246 : vector<2x8x1xf32>
    %248 = vector.broadcast %247 : vector<2x8x1xf32> to vector<2x8x32xf32>
    %249 = arith.mulf %244, %248 : vector<2x8x32xf32>
    %250 = vector.shape_cast %229 : vector<1x32xf32> to vector<1x1x32xf32>
    %251 = vector.broadcast %250 : vector<1x1x32xf32> to vector<2x8x32xf32>
    %252 = arith.mulf %249, %251 : vector<2x8x32xf32>
    %253 = vector.shape_cast %231 : vector<1x32xf32> to vector<1x1x32xf32>
    %254 = vector.broadcast %253 : vector<1x1x32xf32> to vector<2x8x32xf32>
    %255 = arith.addf %252, %254 : vector<2x8x32xf32>
    %c1_157 = arith.constant 1 : index
    %c0_158 = arith.constant 0 : index
    %c0_159 = arith.constant 0 : index
    %256 = vector.load %arg10[%c1_157, %c0_158, %c0_159] : memref<2x32x32xf32, #tpu.memory_space<vmem>>, vector<1x32x32xf32>
    %257 = vector.shape_cast %256 : vector<1x32x32xf32> to vector<32x32xf32>
    %cst_160 = arith.constant dense<0.000000e+00> : vector<2x32xf32>
    %258 = tpu.matmul %1, %257, %cst_160 {dimension_numbers = #tpu.dot_dimension_numbers<[1], [0], [0], [1], [0, 0, 1, 1], [], []>} : vector<2x32xf32>, vector<32x32xf32>, vector<2x32xf32> -> vector<2x32xf32>
    %c1_161 = arith.constant 1 : index
    %c0_162 = arith.constant 0 : index
    %c0_163 = arith.constant 0 : index
    %259 = vector.load %arg11[%c1_161, %c0_162, %c0_163] : memref<2x1x32xf32, #tpu.memory_space<vmem>>, vector<1x1x32xf32>
    %260 = vector.shape_cast %259 : vector<1x1x32xf32> to vector<1x32xf32>
    %261 = vector.broadcast %260 : vector<1x32xf32> to vector<2x32xf32>
    %262 = arith.addf %258, %261 : vector<2x32xf32>
    %c1_164 = arith.constant 1 : index
    %c0_165 = arith.constant 0 : index
    %c0_166 = arith.constant 0 : index
    %263 = vector.load %arg12[%c1_164, %c0_165, %c0_166] : memref<2x32x32xf32, #tpu.memory_space<vmem>>, vector<1x32x32xf32>
    %264 = vector.shape_cast %263 : vector<1x32x32xf32> to vector<32x32xf32>
    %cst_167 = arith.constant dense<0.000000e+00> : vector<2x32xf32>
    %265 = tpu.matmul %262, %264, %cst_167 {dimension_numbers = #tpu.dot_dimension_numbers<[1], [0], [0], [1], [0, 0, 1, 1], [], []>} : vector<2x32xf32>, vector<32x32xf32>, vector<2x32xf32> -> vector<2x32xf32>
    %c1_168 = arith.constant 1 : index
    %c0_169 = arith.constant 0 : index
    %c0_170 = arith.constant 0 : index
    %266 = vector.load %arg13[%c1_168, %c0_169, %c0_170] : memref<2x1x32xf32, #tpu.memory_space<vmem>>, vector<1x1x32xf32>
    %267 = vector.shape_cast %266 : vector<1x1x32xf32> to vector<1x32xf32>
    %268 = vector.broadcast %267 : vector<1x32xf32> to vector<2x32xf32>
    %269 = arith.addf %265, %268 : vector<2x32xf32>
    %270 = vector.shape_cast %269 : vector<2x32xf32> to vector<2x1x32xf32>
    %271 = vector.broadcast %270 : vector<2x1x32xf32> to vector<2x8x32xf32>
    %272 = arith.addf %255, %271 : vector<2x8x32xf32>
    %c1_171 = arith.constant 1 : index
    %c0_172 = arith.constant 0 : index
    %c0_173 = arith.constant 0 : index
    %273 = vector.load %arg16[%c1_171, %c0_172, %c0_173] : memref<2x1x32xf32, #tpu.memory_space<vmem>>, vector<1x1x32xf32>
    %274 = vector.shape_cast %273 : vector<1x1x32xf32> to vector<1x32xf32>
    %c1_174 = arith.constant 1 : index
    %c0_175 = arith.constant 0 : index
    %c0_176 = arith.constant 0 : index
    %275 = vector.load %arg17[%c1_174, %c0_175, %c0_176] : memref<2x1x32xf32, #tpu.memory_space<vmem>>, vector<1x1x32xf32>
    %276 = vector.shape_cast %275 : vector<1x1x32xf32> to vector<1x32xf32>
    %cst_177 = arith.constant dense<0.000000e+00> : vector<2x8xf32>
    %277 = vector.multi_reduction <add>, %272, %cst_177 [2] : vector<2x8x32xf32> to vector<2x8xf32>
    %278 = vector.shape_cast %277 : vector<2x8xf32> to vector<2x8x1xf32>
    %cst_178 = arith.constant 3.200000e+01 : f32
    %279 = vector.broadcast %cst_178 : f32 to vector<2x8x1xf32>
    %280 = arith.divf %278, %279 : vector<2x8x1xf32>
    %281 = vector.broadcast %280 : vector<2x8x1xf32> to vector<2x8x32xf32>
    %282 = arith.subf %272, %281 : vector<2x8x32xf32>
    %283 = arith.mulf %282, %282 : vector<2x8x32xf32>
    %cst_179 = arith.constant dense<0.000000e+00> : vector<2x8xf32>
    %284 = vector.multi_reduction <add>, %283, %cst_179 [2] : vector<2x8x32xf32> to vector<2x8xf32>
    %285 = vector.shape_cast %284 : vector<2x8xf32> to vector<2x8x1xf32>
    %cst_180 = arith.constant 3.200000e+01 : f32
    %286 = vector.broadcast %cst_180 : f32 to vector<2x8x1xf32>
    %287 = arith.divf %285, %286 : vector<2x8x1xf32>
    %288 = vector.broadcast %280 : vector<2x8x1xf32> to vector<2x8x32xf32>
    %289 = arith.subf %272, %288 : vector<2x8x32xf32>
    %cst_181 = arith.constant 9.99999974E-6 : f32
    %290 = vector.broadcast %cst_181 : f32 to vector<2x8x1xf32>
    %291 = arith.addf %287, %290 : vector<2x8x1xf32>
    %292 = math.rsqrt %291 : vector<2x8x1xf32>
    %293 = vector.broadcast %292 : vector<2x8x1xf32> to vector<2x8x32xf32>
    %294 = arith.mulf %289, %293 : vector<2x8x32xf32>
    %295 = vector.shape_cast %274 : vector<1x32xf32> to vector<1x1x32xf32>
    %296 = vector.broadcast %295 : vector<1x1x32xf32> to vector<2x8x32xf32>
    %297 = arith.mulf %294, %296 : vector<2x8x32xf32>
    %298 = vector.shape_cast %276 : vector<1x32xf32> to vector<1x1x32xf32>
    %299 = vector.broadcast %298 : vector<1x1x32xf32> to vector<2x8x32xf32>
    %300 = arith.addf %297, %299 : vector<2x8x32xf32>
    %301 = vector.shape_cast %300 : vector<2x8x32xf32> to vector<16x32xf32>
    %c1_182 = arith.constant 1 : index
    %c0_183 = arith.constant 0 : index
    %c0_184 = arith.constant 0 : index
    %302 = vector.load %arg18[%c1_182, %c0_183, %c0_184] : memref<2x32x64xf32, #tpu.memory_space<vmem>>, vector<1x32x64xf32>
    %303 = vector.shape_cast %302 : vector<1x32x64xf32> to vector<32x64xf32>
    %cst_185 = arith.constant dense<0.000000e+00> : vector<16x64xf32>
    %304 = tpu.matmul %301, %303, %cst_185 {dimension_numbers = #tpu.dot_dimension_numbers<[1], [0], [0], [1], [0, 0, 1, 1], [], []>} : vector<16x32xf32>, vector<32x64xf32>, vector<16x64xf32> -> vector<16x64xf32>
    %c1_186 = arith.constant 1 : index
    %c0_187 = arith.constant 0 : index
    %c0_188 = arith.constant 0 : index
    %305 = vector.load %arg19[%c1_186, %c0_187, %c0_188] : memref<2x1x64xf32, #tpu.memory_space<vmem>>, vector<1x1x64xf32>
    %306 = vector.shape_cast %305 : vector<1x1x64xf32> to vector<1x64xf32>
    %307 = vector.broadcast %306 : vector<1x64xf32> to vector<16x64xf32>
    %308 = arith.addf %304, %307 : vector<16x64xf32>
    %cst_189 = arith.constant 0.000000e+00 : f32
    %309 = vector.broadcast %cst_189 : f32 to vector<16x64xf32>
    %310 = arith.maximumf %308, %309 : vector<16x64xf32>
    %c1_190 = arith.constant 1 : index
    %c0_191 = arith.constant 0 : index
    %c0_192 = arith.constant 0 : index
    %311 = vector.load %arg20[%c1_190, %c0_191, %c0_192] : memref<2x64x32xf32, #tpu.memory_space<vmem>>, vector<1x64x32xf32>
    %312 = vector.shape_cast %311 : vector<1x64x32xf32> to vector<64x32xf32>
    %cst_193 = arith.constant dense<0.000000e+00> : vector<16x32xf32>
    %313 = tpu.matmul %310, %312, %cst_193 {dimension_numbers = #tpu.dot_dimension_numbers<[1], [0], [0], [1], [0, 0, 1, 1], [], []>} : vector<16x64xf32>, vector<64x32xf32>, vector<16x32xf32> -> vector<16x32xf32>
    %c1_194 = arith.constant 1 : index
    %c0_195 = arith.constant 0 : index
    %c0_196 = arith.constant 0 : index
    %314 = vector.load %arg21[%c1_194, %c0_195, %c0_196] : memref<2x1x32xf32, #tpu.memory_space<vmem>>, vector<1x1x32xf32>
    %315 = vector.shape_cast %314 : vector<1x1x32xf32> to vector<1x32xf32>
    %316 = vector.broadcast %315 : vector<1x32xf32> to vector<16x32xf32>
    %317 = arith.addf %313, %316 : vector<16x32xf32>
    %318 = vector.shape_cast %317 : vector<16x32xf32> to vector<2x8x32xf32>
    %319 = arith.addf %300, %318 : vector<2x8x32xf32>
    %c1_197 = arith.constant 1 : index
    %c0_198 = arith.constant 0 : index
    %c0_199 = arith.constant 0 : index
    %320 = vector.load %arg22[%c1_197, %c0_198, %c0_199] : memref<2x1x32xf32, #tpu.memory_space<vmem>>, vector<1x1x32xf32>
    %321 = vector.shape_cast %320 : vector<1x1x32xf32> to vector<1x32xf32>
    %c1_200 = arith.constant 1 : index
    %c0_201 = arith.constant 0 : index
    %c0_202 = arith.constant 0 : index
    %322 = vector.load %arg23[%c1_200, %c0_201, %c0_202] : memref<2x1x32xf32, #tpu.memory_space<vmem>>, vector<1x1x32xf32>
    %323 = vector.shape_cast %322 : vector<1x1x32xf32> to vector<1x32xf32>
    %cst_203 = arith.constant dense<0.000000e+00> : vector<2x8xf32>
    %324 = vector.multi_reduction <add>, %319, %cst_203 [2] : vector<2x8x32xf32> to vector<2x8xf32>
    %325 = vector.shape_cast %324 : vector<2x8xf32> to vector<2x8x1xf32>
    %cst_204 = arith.constant 3.200000e+01 : f32
    %326 = vector.broadcast %cst_204 : f32 to vector<2x8x1xf32>
    %327 = arith.divf %325, %326 : vector<2x8x1xf32>
    %328 = vector.broadcast %327 : vector<2x8x1xf32> to vector<2x8x32xf32>
    %329 = arith.subf %319, %328 : vector<2x8x32xf32>
    %330 = arith.mulf %329, %329 : vector<2x8x32xf32>
    %cst_205 = arith.constant dense<0.000000e+00> : vector<2x8xf32>
    %331 = vector.multi_reduction <add>, %330, %cst_205 [2] : vector<2x8x32xf32> to vector<2x8xf32>
    %332 = vector.shape_cast %331 : vector<2x8xf32> to vector<2x8x1xf32>
    %cst_206 = arith.constant 3.200000e+01 : f32
    %333 = vector.broadcast %cst_206 : f32 to vector<2x8x1xf32>
    %334 = arith.divf %332, %333 : vector<2x8x1xf32>
    %335 = vector.broadcast %327 : vector<2x8x1xf32> to vector<2x8x32xf32>
    %336 = arith.subf %319, %335 : vector<2x8x32xf32>
    %cst_207 = arith.constant 9.99999974E-6 : f32
    %337 = vector.broadcast %cst_207 : f32 to vector<2x8x1xf32>
    %338 = arith.addf %334, %337 : vector<2x8x1xf32>
    %339 = math.rsqrt %338 : vector<2x8x1xf32>
    %340 = vector.broadcast %339 : vector<2x8x1xf32> to vector<2x8x32xf32>
    %341 = arith.mulf %336, %340 : vector<2x8x32xf32>
    %342 = vector.shape_cast %321 : vector<1x32xf32> to vector<1x1x32xf32>
    %343 = vector.broadcast %342 : vector<1x1x32xf32> to vector<2x8x32xf32>
    %344 = arith.mulf %341, %343 : vector<2x8x32xf32>
    %345 = vector.shape_cast %323 : vector<1x32xf32> to vector<1x1x32xf32>
    %346 = vector.broadcast %345 : vector<1x1x32xf32> to vector<2x8x32xf32>
    %347 = arith.addf %344, %346 : vector<2x8x32xf32>
    %348 = vector.shape_cast %347 : vector<2x8x32xf32> to vector<16x32xf32>
    %c0_208 = arith.constant 0 : index
    %c0_209 = arith.constant 0 : index
    %349 = vector.load %arg24[%c0_208, %c0_209] : memref<32x128xf32, #tpu.memory_space<vmem>>, vector<32x128xf32>
    %cst_210 = arith.constant dense<0.000000e+00> : vector<16x128xf32>
    %350 = tpu.matmul %348, %349, %cst_210 {dimension_numbers = #tpu.dot_dimension_numbers<[1], [0], [0], [1], [0, 0, 1, 1], [], []>} : vector<16x32xf32>, vector<32x128xf32>, vector<16x128xf32> -> vector<16x128xf32>
    %c0_211 = arith.constant 0 : index
    %c0_212 = arith.constant 0 : index
    %351 = vector.load %arg25[%c0_211, %c0_212] : memref<1x128xf32, #tpu.memory_space<vmem>>, vector<1x128xf32>
    %352 = vector.broadcast %351 : vector<1x128xf32> to vector<16x128xf32>
    %353 = arith.addf %350, %352 : vector<16x128xf32>
    %c0_213 = arith.constant 0 : index
    %c0_214 = arith.constant 0 : index
    %354 = vector.load %arg26[%c0_213, %c0_214] : memref<16x128xf32, #tpu.memory_space<vmem>>, vector<16x128xf32>
    tpu.vector_store %arg26[%c0_213, %c0_214], %353 {strides = array<i32>} : memref<16x128xf32, #tpu.memory_space<vmem>>, vector<16x128xf32>,
    return
  }
}

</mosaic_0001>

<bundles_post_ra>
// kernel: tpu_custom_call.1
= control target key start
LH: loop header
LB: loop body
LE: loop exit
PB: predicated region body
PF: predicated region fallthrough
CT: control target
= control target key end

     0   :  { %s12922_s0 = inlined_call_operand.vmem [shape: f32[2,8,32], index: 0, kind: input, shape index: {}]   ;;  %s12923_s1 = inlined_call_operand.vmem [shape: f32[2,32], index: 1, kind: input, shape index: {}]   ;;  %s12924_s2 = inlined_call_operand.vmem [shape: f32[2,8,32,8], index: 2, kind: input, shape index: {}]   ;;  %s12925_s3 = inlined_call_operand.vmem [shape: f32[2,8,1,8], index: 3, kind: input, shape index: {}]   ;;  %s12926_s4 = inlined_call_operand.vmem [shape: f32[2,8,32,8], index: 4, kind: input, shape index: {}]   ;;  %s12927_s5 = inlined_call_operand.vmem [shape: f32[2,8,1,8], index: 5, kind: input, shape index: {}]   ;;  %s12928_s6 = inlined_call_operand.vmem [shape: f32[2,8,32,8], index: 6, kind: input, shape index: {}]   ;;  %s12929_s7 = inlined_call_operand.vmem [shape: f32[2,8,1,8], index: 7, kind: input, shape index: {}]   ;;  %s12930_s8 = inlined_call_operand.vmem [shape: f32[2,8,8,32], index: 8, kind: input, shape index: {}]   ;;  %s12931_s9 = inlined_call_operand.vmem [shape: f32[2,1,32], index: 9, kind: input, shape index: {}]   ;;  %s12932_s10 = inlined_call_operand.vmem [shape: f32[2,32,32], index: 10, kind: input, shape index: {}]   ;;  %s12933_s11 = inlined_call_operand.vmem [shape: f32[2,1,32], index: 11, kind: input, shape index: {}]   ;;  %s12934_s12 = inlined_call_operand.vmem [shape: f32[2,32,32], index: 12, kind: input, shape index: {}]   ;;  %s12935_s13 = inlined_call_operand.vmem [shape: f32[2,1,32], index: 13, kind: input, shape index: {}]   ;;  %s12936_s14 = inlined_call_operand.vmem [shape: f32[2,1,32], index: 14, kind: input, shape index: {}]   ;;  %s12937_s15 = inlined_call_operand.vmem [shape: f32[2,1,32], index: 15, kind: input, shape index: {}]   ;;  %s12938_s16 = inlined_call_operand.vmem [shape: f32[2,1,32], index: 16, kind: input, shape index: {}]   ;;  %s12939_s17 = inlined_call_operand.vmem [shape: f32[2,1,32], index: 17, kind: input, shape index: {}]   ;;  %s12940_s18 = inlined_call_operand.vmem [shape: f32[2,32,64], index: 18, kind: input, shape index: {}]   ;;  %s12941_s19 = inlined_call_operand.vmem [shape: f32[2,1,64], index: 19, kind: input, shape index: {}]   ;;  %s12942_s20 = inlined_call_operand.vmem [shape: f32[2,64,32], index: 20, kind: input, shape index: {}]   ;;  %s12943_s21 = inlined_call_operand.vmem [shape: f32[2,1,32], index: 21, kind: input, shape index: {}]   ;;  %s12944_s22 = inlined_call_operand.vmem [shape: f32[2,1,32], index: 22, kind: input, shape index: {}]   ;;  %s12945_s23 = inlined_call_operand.vmem [shape: f32[2,1,32], index: 23, kind: input, shape index: {}]   ;;  %s12946_s24 = inlined_call_operand.vmem [shape: f32[32,128], index: 24, kind: input, shape index: {}]   ;;  %s12947_s25 = inlined_call_operand.vmem [shape: f32[1,128], index: 25, kind: input, shape index: {}]   ;;  %s12948_s26 = inlined_call_operand.hbm [shape: f32[16,128], index: 26, kind: output, shape index: {}]  }
   0x1   :  { %12965 = sst [smem:[#allocation5_spill]] %s12922_s0 }
   0x2   :  { %12966 = sst [smem:[#allocation6_spill]] %s12923_s1 }
   0x3   :  { %12967 = sst [smem:[#allocation7_spill]] %s12924_s2 }
   0x4   :  { %12968 = sst [smem:[#allocation8_spill]] %s12925_s3 }
   0x5   :  { %12969 = sst [smem:[#allocation9_spill]] %s12926_s4 }
   0x6   :  { %12970 = sst [smem:[#allocation10_spill]] %s12927_s5 }
   0x7   :  { %12971 = sst [smem:[#allocation11_spill]] %s12928_s6 }
   0x8   :  { %12972 = sst [smem:[#allocation12_spill]] %s12929_s7 }
   0x9   :  { %12973 = sst [smem:[#allocation13_spill]] %s12930_s8 }
   0xa   :  { %12974 = sst [smem:[#allocation14_spill]] %s12931_s9 }
   0xb   :  { %12975 = sst [smem:[#allocation15_spill]] %s12932_s10 }
   0xc   :  { %12976 = sst [smem:[#allocation16_spill]] %s12937_s15 }
   0xd   :  { %12977 = sst [smem:[#allocation17_spill]] %s12940_s18 }
   0xe   :  { %12978 = sst [smem:[#allocation18_spill]] %s12946_s24 }
   0xf   :  { %12979 = sst [smem:[#allocation19_spill]] %s12947_s25 }
  0x10   :  { %12980 = sst [smem:[#allocation20_spill]] %s12948_s26 }
  0x11   :  { %s12981_s7 = sld [smem:[#allocation7_spill]]  ;;  %v11107_v3 = vmov 0.0|0.0   ;;  %vm11108_vm0 = vmmov 0   ;;  %v11109_v11 = vmov 0.0   ;;  %s12982_s6 = sld [smem:[#allocation5_spill]]  ;;  %vm175_vm1 = vcmask 261120  }
  0x12   :  { %10617 = vmatprep.subr.bf16.mxu0 %v11107_v3  ;;  %10623 = vmatprep.subr.bf16.mxu1 %v11107_v3 }
  0x13   :  { %9742 = vmatprep.mubr.msk.f32.mxu0 %vm11108_vm0, %v11109_v11  ;;  %9753 = vmatprep.mubr.msk.f32.mxu1 %vm11108_vm0, %v11109_v11 }
  0x17   :  { %v87_v0 = vld [vmem:[%s12981_s7] sm:$0xff]  ;;  %v88_v1 = vld [vmem:[%s12981_s7 + $0x8] sm:$0xff]  ;;  %v89_v6 = vld [vmem:[%s12981_s7 + $0x10] sm:$0xff] }
  0x18   :  { %v91_v2 = vld [vmem:[%s12981_s7 + $0x20] sm:$0xff]  ;;  %v10618_v4 = vpack.c.bf16 %v88_v1, %v87_v0  ;;  %v92_v5 = vld [vmem:[%s12981_s7 + $0x28] sm:$0xff]  ;;  %v90_v7 = vld [vmem:[%s12981_s7 + $0x18] sm:$0xff] }
  0x19   :  { %v10624_v8 = vpack.c.bf16 %v92_v5, %v91_v2  ;;  %v93_v9 = vld [vmem:[%s12981_s7 + $0x30] sm:$0xff]  ;;  %v94_v10 = vld [vmem:[%s12981_s7 + $0x38] sm:$0xff]  ;;  %v10621_v12 = vpack.c.bf16 %v90_v7, %v89_v6  ;;  %v95_v14 = vld [vmem:[%s12981_s7 + $0x40] sm:$0xff] }
  0x1a   :  { %10619 = vmatpush3.bf16.msra.mxu0 %v10618_v4  ;;  %v10627_v13 = vpack.c.bf16 %v94_v10, %v93_v9  ;;  %v96_v15 = vld [vmem:[%s12981_s7 + $0x48] sm:$0xff]  ;;  %v99_v16 = vld [vmem:[%s12981_s7 + $0x60] sm:$0xff]  ;;  %v97_v22 = vld [vmem:[%s12981_s7 + $0x50] sm:$0xff] }
  0x1b   :  { %10625 = vmatpush3.bf16.msra.mxu1 %v10624_v8  ;;  %10620 = vmatprep.subr.bf16.mxu0 %v11107_v3  ;;  %v100_v17 = vld [vmem:[%s12981_s7 + $0x68] sm:$0xff]  ;;  %v11296_v18 = vld [vmem:[%s12982_s6] sm:$0xff]  ;;  %v10630_v19 = vpack.c.bf16 %v96_v15, %v95_v14  ;;  %v98_v23 = vld [vmem:[%s12981_s7 + $0x58] sm:$0xff] }
  0x1c   :  { %10626 = vmatprep.subr.bf16.mxu1 %v11107_v3  ;;  %v11302_v20 = vld [vmem:[%s12982_s6 + $0x8] sm:$0xff]  ;;  %v10636_v21 = vpack.c.bf16 %v100_v17, %v99_v16  ;;  %v101_v24 = vld [vmem:[%s12981_s7 + $0x70] sm:$0xff]  ;;  %v102_v25 = vld [vmem:[%s12981_s7 + $0x78] sm:$0xff]  ;;  %v10633_v26 = vpack.c.bf16 %v98_v23, %v97_v22 }
  0x1d   :  { %v10639_v27 = vpack.c.bf16 %v102_v25, %v101_v24  ;;  %v103_v28 = vld [vmem:[%s12981_s7 + $0x80] sm:$0xff]  ;;  %v104_v29 = vld [vmem:[%s12981_s7 + $0x88] sm:$0xff]  ;;  %v105_v34 = vld [vmem:[%s12981_s7 + $0x90] sm:$0xff] }
  0x1e   :  { %10622 = vmatpush3.bf16.msra.mxu0 %v10621_v12  ;;  %v107_v30 = vld [vmem:[%s12981_s7 + $0xa0] sm:$0xff]  ;;  %v108_v31 = vld [vmem:[%s12981_s7 + $0xa8] sm:$0xff]  ;;  %v10642_v32 = vpack.c.bf16 %v104_v29, %v103_v28  ;;  %v106_v35 = vld [vmem:[%s12981_s7 + $0x98] sm:$0xff] }
  0x1f   :  { %10628 = vmatpush3.bf16.msra.mxu1 %v10627_v13  ;;  %10629 = vmatprep.subr.bf16.mxu0 %v11107_v3  ;;  %v10648_v33 = vpack.c.bf16 %v108_v31, %v107_v30  ;;  %v109_v36 = vld [vmem:[%s12981_s7 + $0xb0] sm:$0xff]  ;;  %v110_v37 = vld [vmem:[%s12981_s7 + $0xb8] sm:$0xff]  ;;  %v10645_v38 = vpack.c.bf16 %v106_v35, %v105_v34  ;;  %v111_v40 = vld [vmem:[%s12981_s7 + $0xc0] sm:$0xff] }
  0x20   :  { %10635 = vmatprep.subr.bf16.mxu1 %v11107_v3  ;;  %v10651_v39 = vpack.c.bf16 %v110_v37, %v109_v36  ;;  %v112_v41 = vld [vmem:[%s12981_s7 + $0xc8] sm:$0xff]  ;;  %v115_v42 = vld [vmem:[%s12981_s7 + $0xe0] sm:$0xff] }
  0x21   :  { %9743 = vmatmul.mubr.msk.f32.vlgmr.msra.gmra.mrb[0].mxu0 %vm175_vm1, %v11296_v18  ;;  %v116_v43 = vld [vmem:[%s12981_s7 + $0xe8] sm:$0xff]  ;;  %v10654_v44 = vpack.c.bf16 %v112_v41, %v111_v40 }
  0x22   :  { %9754 = vmatmul.mubr.msk.f32.vlgmr.msra.gmra.mrb[0].mxu1 %vm175_vm1, %v11302_v20  ;;  %10631 = vmatpush3.bf16.msra.mxu0 %v10630_v19 }
  0x23   :  { %10637 = vmatpush3.bf16.msra.mxu1 %v10636_v21  ;;  %10632 = vmatprep.subr.bf16.mxu0 %v11107_v3 }
  0x24   :  { %10638 = vmatprep.subr.bf16.mxu1 %v11107_v3  ;;  %9764 = vmatprep.mubr.msk.f32.mxu0 %vm11108_vm0, %v11109_v11 }
  0x25   :  { %9775 = vmatprep.mubr.msk.f32.mxu1 %vm11108_vm0, %v11109_v11 }
  0x26   :  { %10634 = vmatpush3.bf16.msra.mxu0 %v10633_v26 }
  0x27   :  { %10640 = vmatpush3.bf16.msra.mxu1 %v10639_v27  ;;  %10641 = vmatprep.subr.bf16.mxu0 %v11107_v3 }
  0x28   :  { %10647 = vmatprep.subr.bf16.mxu1 %v11107_v3 }
  0x29   :  { %9765 = vmatmul.mubr.msk.f32.vlgmr.msra.gmra.mrb[2].mxu0 %vm175_vm1, %v11296_v18 }
  0x2a   :  { %9776 = vmatmul.mubr.msk.f32.vlgmr.msra.gmra.mrb[2].mxu1 %vm175_vm1, %v11302_v20  ;;  %10643 = vmatpush3.bf16.msra.mxu0 %v10642_v32 }
  0x2b   :  { %10649 = vmatpush3.bf16.msra.mxu1 %v10648_v33  ;;  %10644 = vmatprep.subr.bf16.mxu0 %v11107_v3 }
  0x2c   :  { %10650 = vmatprep.subr.bf16.mxu1 %v11107_v3  ;;  %9786 = vmatprep.mubr.msk.f32.mxu0 %vm11108_vm0, %v11109_v11 }
  0x2d   :  { %9797 = vmatprep.mubr.msk.f32.mxu1 %vm11108_vm0, %v11109_v11 }
  0x2e   :  { %10646 = vmatpush3.bf16.msra.mxu0 %v10645_v38 }
  0x2f   :  { %31 = vsyncpa [#allocation3], 0  ;;  %10652 = vmatpush3.bf16.msra.mxu1 %v10651_v39  ;;  %10653 = vmatprep.subr.bf16.mxu0 %v11107_v3  ;;  %v10660_v45 = vpack.c.bf16 %v116_v43, %v115_v42  ;;  %v113_v46 = vld [vmem:[%s12981_s7 + $0xd0] sm:$0xff]  ;;  %v114_v47 = vld [vmem:[%s12981_s7 + $0xd8] sm:$0xff]  ;;  %s12983_s4 = sld [smem:[#allocation9_spill]]  ;;  %s12984_s2 = sld [smem:[#allocation11_spill]] }
  0x30   :  { %10659 = vmatprep.subr.bf16.mxu1 %v11107_v3  ;;  %v117_v48 = vld [vmem:[%s12981_s7 + $0xf0] sm:$0xff]  ;;  %v118_v49 = vld [vmem:[%s12981_s7 + $0xf8] sm:$0xff]  ;;  %v10657_v50 = vpack.c.bf16 %v114_v47, %v113_v46  ;;  %s12985_s9 = sld [smem:[#allocation8_spill]]  ;;  %s12986_s27 = sld [smem:[#allocation10_spill]]  ;;  %vm2046_vm2 = vcmask 64512   ;;  %vm4345_vm3 = vcmask 523264  }
  0x31   :  { %9787 = vmatmul.mubr.msk.f32.vlgmr.msra.gmra.mrb[4].mxu0 %vm175_vm1, %v11296_v18  ;;  %v10663_v51 = vpack.c.bf16 %v118_v49, %v117_v48  ;;  %s12987_s28 = sld [smem:[#allocation12_spill]]  ;;  %s12988_s8 = sld [smem:[#allocation13_spill]] }
  0x32   :  { %9798 = vmatmul.mubr.msk.f32.vlgmr.msra.gmra.mrb[4].mxu1 %vm175_vm1, %v11302_v20  ;;  %10655 = vmatpush3.bf16.msra.mxu0 %v10654_v44  ;;  %s12989_s1 = sld [smem:[#allocation15_spill]]  ;;  %s12990_s3 = sld [smem:[#allocation6_spill]] }
  0x33   :  { %10661 = vmatpush3.bf16.msra.mxu1 %v10660_v45  ;;  %10656 = vmatprep.subr.bf16.mxu0 %v11107_v3  ;;  %s12991_s24 = sld [smem:[#allocation14_spill]] }
  0x34   :  { %10662 = vmatprep.subr.bf16.mxu1 %v11107_v3  ;;  %9808 = vmatprep.mubr.msk.f32.mxu0 %vm11108_vm0, %v11109_v11 }
  0x35   :  { %v742_v52 = vld [vmem:[%s12983_s4] sm:$0xff]  ;;  %v743_v53 = vld [vmem:[%s12983_s4 + $0x8] sm:$0xff]  ;;  %9819 = vmatprep.mubr.msk.f32.mxu1 %vm11108_vm0, %v11109_v11  ;;  %v744_v58 = vld [vmem:[%s12983_s4 + $0x10] sm:$0xff] }
  0x36   :  { %v746_v54 = vld [vmem:[%s12983_s4 + $0x20] sm:$0xff]  ;;  %v747_v55 = vld [vmem:[%s12983_s4 + $0x28] sm:$0xff]  ;;  %10658 = vmatpush3.bf16.msra.mxu0 %v10657_v50  ;;  %v10666_v56 = vpack.c.bf16 %v743_v53, %v742_v52  ;;  %v745_v59 = vld [vmem:[%s12983_s4 + $0x18] sm:$0xff] }
  0x37   :  { %10664 = vmatpush3.bf16.msra.mxu1 %v10663_v51  ;;  %10665 = vmatprep.subr.bf16.mxu0 %v11107_v3  ;;  %v10672_v57 = vpack.c.bf16 %v747_v55, %v746_v54  ;;  %v748_v60 = vld [vmem:[%s12983_s4 + $0x30] sm:$0xff]  ;;  %v749_v61 = vld [vmem:[%s12983_s4 + $0x38] sm:$0xff]  ;;  %v10669_v62 = vpack.c.bf16 %v745_v59, %v744_v58  ;;  %v750_v0 = vld [vmem:[%s12983_s4 + $0x40] sm:$0xff] }
  0x38   :  { %10671 = vmatprep.subr.bf16.mxu1 %v11107_v3  ;;  %v10675_v63 = vpack.c.bf16 %v749_v61, %v748_v60  ;;  %v751_v1 = vld [vmem:[%s12983_s4 + $0x48] sm:$0xff]  ;;  %v754_v2 = vld [vmem:[%s12983_s4 + $0x60] sm:$0xff]  ;;  %v752_v7 = vld [vmem:[%s12983_s4 + $0x50] sm:$0xff] }
  0x39   :  { %9809 = vmatmul.mubr.msk.f32.vlgmr.msra.gmra.mrb[6].mxu0 %vm175_vm1, %v11296_v18  ;;  %v755_v4 = vld [vmem:[%s12983_s4 + $0x68] sm:$0xff]  ;;  %v10678_v5 = vpack.c.bf16 %v751_v1, %v750_v0  ;;  %v753_v8 = vld [vmem:[%s12983_s4 + $0x58] sm:$0xff]  ;;  %v756_v9 = vld [vmem:[%s12983_s4 + $0x70] sm:$0xff] }
  0x3a   :  { %9820 = vmatmul.mubr.msk.f32.vlgmr.msra.gmra.mrb[6].mxu1 %vm175_vm1, %v11302_v20  ;;  %10667 = vmatpush3.bf16.msra.mxu0 %v10666_v56  ;;  %v10684_v6 = vpack.c.bf16 %v755_v4, %v754_v2  ;;  %v757_v10 = vld [vmem:[%s12983_s4 + $0x78] sm:$0xff]  ;;  %v10681_v12 = vpack.c.bf16 %v753_v8, %v752_v7  ;;  %v758_v14 = vld [vmem:[%s12983_s4 + $0x80] sm:$0xff]  ;;  %v759_v15 = vld [vmem:[%s12983_s4 + $0x88] sm:$0xff] }
  0x3b   :  { %10673 = vmatpush3.bf16.msra.mxu1 %v10672_v57  ;;  %10668 = vmatprep.subr.bf16.mxu0 %v11107_v3  ;;  %v10687_v13 = vpack.c.bf16 %v757_v10, %v756_v9  ;;  %v762_v16 = vld [vmem:[%s12983_s4 + $0xa0] sm:$0xff]  ;;  %v763_v17 = vld [vmem:[%s12983_s4 + $0xa8] sm:$0xff]  ;;  %v10690_v19 = vpack.c.bf16 %v759_v15, %v758_v14  ;;  %v760_v22 = vld [vmem:[%s12983_s4 + $0x90] sm:$0xff] }
  0x3c   :  { %10674 = vmatprep.subr.bf16.mxu1 %v11107_v3  ;;  %9830 = vmatprep.mubr.msk.f32.mxu0 %vm11108_vm0, %v11109_v11  ;;  %v10696_v21 = vpack.c.bf16 %v763_v17, %v762_v16  ;;  %v761_v23 = vld [vmem:[%s12983_s4 + $0x98] sm:$0xff]  ;;  %v764_v24 = vld [vmem:[%s12983_s4 + $0xb0] sm:$0xff]  ;;  %v766_v28 = vld [vmem:[%s12983_s4 + $0xc0] sm:$0xff] }
  0x3d   :  { %9841 = vmatprep.mubr.msk.f32.mxu1 %vm11108_vm0, %v11109_v11  ;;  %v765_v25 = vld [vmem:[%s12983_s4 + $0xb8] sm:$0xff]  ;;  %v10693_v26 = vpack.c.bf16 %v761_v23, %v760_v22  ;;  %v767_v29 = vld [vmem:[%s12983_s4 + $0xc8] sm:$0xff]  ;;  %v770_v30 = vld [vmem:[%s12983_s4 + $0xe0] sm:$0xff] }
  0x3e   :  { %10670 = vmatpush3.bf16.msra.mxu0 %v10669_v62  ;;  %v10699_v27 = vpack.c.bf16 %v765_v25, %v764_v24  ;;  %v771_v31 = vld [vmem:[%s12983_s4 + $0xe8] sm:$0xff]  ;;  %v10702_v32 = vpack.c.bf16 %v767_v29, %v766_v28  ;;  %v768_v34 = vld [vmem:[%s12983_s4 + $0xd0] sm:$0xff]  ;;  %v769_v35 = vld [vmem:[%s12983_s4 + $0xd8] sm:$0xff] }
  0x3f   :  { %10676 = vmatpush3.bf16.msra.mxu1 %v10675_v63  ;;  %10677 = vmatprep.subr.bf16.mxu0 %v11107_v3  ;;  %v10708_v33 = vpack.c.bf16 %v771_v31, %v770_v30  ;;  %v772_v36 = vld [vmem:[%s12983_s4 + $0xf0] sm:$0xff]  ;;  %v773_v37 = vld [vmem:[%s12983_s4 + $0xf8] sm:$0xff]  ;;  %v10705_v38 = vpack.c.bf16 %v769_v35, %v768_v34  ;;  %v1390_v40 = vld [vmem:[%s12984_s2] sm:$0xff] }
  0x40   :  { %10683 = vmatprep.subr.bf16.mxu1 %v11107_v3  ;;  %v10711_v39 = vpack.c.bf16 %v773_v37, %v772_v36  ;;  %v1391_v41 = vld [vmem:[%s12984_s2 + $0x8] sm:$0xff]  ;;  %v1394_v42 = vld [vmem:[%s12984_s2 + $0x20] sm:$0xff]  ;;  %v1392_v46 = vld [vmem:[%s12984_s2 + $0x10] sm:$0xff] }
  0x41   :  { %9831 = vmatmul.mubr.msk.f32.vlgmr.msra.gmra.mrb[8].mxu0 %vm175_vm1, %v11296_v18  ;;  %v1395_v43 = vld [vmem:[%s12984_s2 + $0x28] sm:$0xff]  ;;  %v10714_v44 = vpack.c.bf16 %v1391_v41, %v1390_v40  ;;  %v1393_v47 = vld [vmem:[%s12984_s2 + $0x18] sm:$0xff]  ;;  %v1396_v48 = vld [vmem:[%s12984_s2 + $0x30] sm:$0xff] }
  0x42   :  { %9842 = vmatmul.mubr.msk.f32.vlgmr.msra.gmra.mrb[8].mxu1 %vm175_vm1, %v11302_v20  ;;  %10679 = vmatpush3.bf16.msra.mxu0 %v10678_v5  ;;  %v10720_v45 = vpack.c.bf16 %v1395_v43, %v1394_v42  ;;  %v10717_v49 = vpack.c.bf16 %v1393_v47, %v1392_v46  ;;  %v1397_v50 = vld [vmem:[%s12984_s2 + $0x38] sm:$0xff]  ;;  %v1398_v52 = vld [vmem:[%s12984_s2 + $0x40] sm:$0xff]  ;;  %v1399_v53 = vld [vmem:[%s12984_s2 + $0x48] sm:$0xff] }
  0x43   :  { %10685 = vmatpush3.bf16.msra.mxu1 %v10684_v6  ;;  %10680 = vmatprep.subr.bf16.mxu0 %v11107_v3  ;;  %v10723_v51 = vpack.c.bf16 %v1397_v50, %v1396_v48  ;;  %v1402_v54 = vld [vmem:[%s12984_s2 + $0x60] sm:$0xff]  ;;  %v10726_v55 = vpack.c.bf16 %v1399_v53, %v1398_v52  ;;  %v1403_v56 = vld [vmem:[%s12984_s2 + $0x68] sm:$0xff]  ;;  %v1400_v58 = vld [vmem:[%s12984_s2 + $0x50] sm:$0xff] }
  0x44   :  { %10686 = vmatprep.subr.bf16.mxu1 %v11107_v3  ;;  %9852 = vmatprep.mubr.msk.f32.mxu0 %vm11108_vm0, %v11109_v11  ;;  %v10732_v57 = vpack.c.bf16 %v1403_v56, %v1402_v54  ;;  %v1401_v59 = vld [vmem:[%s12984_s2 + $0x58] sm:$0xff]  ;;  %v1404_v60 = vld [vmem:[%s12984_s2 + $0x70] sm:$0xff]  ;;  %v1406_v0 = vld [vmem:[%s12984_s2 + $0x80] sm:$0xff] }
  0x45   :  { %9863 = vmatprep.mubr.msk.f32.mxu1 %vm11108_vm0, %v11109_v11  ;;  %v10729_v61 = vpack.c.bf16 %v1401_v59, %v1400_v58  ;;  %v1405_v62 = vld [vmem:[%s12984_s2 + $0x78] sm:$0xff]  ;;  %v1407_v1 = vld [vmem:[%s12984_s2 + $0x88] sm:$0xff]  ;;  %v1410_v4 = vld [vmem:[%s12984_s2 + $0xa0] sm:$0xff] }
  0x46   :  { %10682 = vmatpush3.bf16.msra.mxu0 %v10681_v12  ;;  %v10735_v63 = vpack.c.bf16 %v1405_v62, %v1404_v60  ;;  %v10738_v2 = vpack.c.bf16 %v1407_v1, %v1406_v0  ;;  %v1411_v5 = vld [vmem:[%s12984_s2 + $0xa8] sm:$0xff]  ;;  %v1408_v7 = vld [vmem:[%s12984_s2 + $0x90] sm:$0xff]  ;;  %v1409_v8 = vld [vmem:[%s12984_s2 + $0x98] sm:$0xff] }
  0x47   :  { %10688 = vmatpush3.bf16.msra.mxu1 %v10687_v13  ;;  %10689 = vmatprep.subr.bf16.mxu0 %v11107_v3  ;;  %v10744_v6 = vpack.c.bf16 %v1411_v5, %v1410_v4  ;;  %v1412_v9 = vld [vmem:[%s12984_s2 + $0xb0] sm:$0xff]  ;;  %v10741_v10 = vpack.c.bf16 %v1409_v8, %v1408_v7  ;;  %v1413_v12 = vld [vmem:[%s12984_s2 + $0xb8] sm:$0xff]  ;;  %v1414_v14 = vld [vmem:[%s12984_s2 + $0xc0] sm:$0xff] }
  0x48   :  { %10695 = vmatprep.subr.bf16.mxu1 %v11107_v3  ;;  %v10747_v13 = vpack.c.bf16 %v1413_v12, %v1412_v9  ;;  %v1415_v15 = vld [vmem:[%s12984_s2 + $0xc8] sm:$0xff]  ;;  %v1418_v17 = vld [vmem:[%s12984_s2 + $0xe0] sm:$0xff]  ;;  %v1416_v22 = vld [vmem:[%s12984_s2 + $0xd0] sm:$0xff] }
  0x49   :  { %9853 = vmatmul.mubr.msk.f32.vlgmr.msra.gmra.mrb[10].mxu0 %vm175_vm1, %v11296_v18  ;;  %v10750_v16 = vpack.c.bf16 %v1415_v15, %v1414_v14  ;;  %v1417_v23 = vld [vmem:[%s12984_s2 + $0xd8] sm:$0xff]  ;;  %v1420_v24 = vld [vmem:[%s12984_s2 + $0xf0] sm:$0xff]  ;;  %v8984_v42 = vld [vmem:[%s12985_s9] ss:$0 sm:$0xff] }
  0x4a   :  { %9864 = vmatmul.mubr.msk.f32.vlgmr.msra.gmra.mrb[10].mxu1 %vm175_vm1, %v11302_v20  ;;  %10691 = vmatpush3.bf16.msra.mxu0 %v10690_v19  ;;  %v1419_v19 = vld [vmem:[%s12984_s2 + $0xe8] sm:$0xff]  ;;  %v10753_v25 = vpack.c.bf16 %v1417_v23, %v1416_v22  ;;  %v8985_v43 = vld [vmem:[%s12985_s9 + $0x1] ss:$0 sm:$0xff]  ;;  %v9002_v58 = vld [vmem:[%s12986_s27 + $0x2] ss:$0 sm:$0xff] }
  0x4b   :  { %10697 = vmatpush3.bf16.msra.mxu1 %v10696_v21  ;;  %10692 = vmatprep.subr.bf16.mxu0 %v11107_v3  ;;  %v10756_v21 = vpack.c.bf16 %v1419_v19, %v1418_v17  ;;  %v9003_v59 = vld [vmem:[%s12986_s27 + $0x3] ss:$0 sm:$0xff]  ;;  %v8989_v8 = vld [vmem:[%s12985_s9 + $0x5] ss:$0 sm:$0xff]  ;;  %v9004_v9 = vld [vmem:[%s12986_s27 + $0x4] ss:$0 sm:$0xff] }
  0x4c   :  { %10698 = vmatprep.subr.bf16.mxu1 %v11107_v3  ;;  %9874 = vmatprep.mubr.msk.f32.mxu0 %vm11108_vm0, %v11109_v11  ;;  %v8990_v23 = vld [vmem:[%s12985_s9 + $0x6] ss:$0 sm:$0xff] }
  0x4d   :  { %9885 = vmatprep.mubr.msk.f32.mxu1 %vm11108_vm0, %v11109_v11 }
  0x4e   :  { %10694 = vmatpush3.bf16.msra.mxu0 %v10693_v26  ;;  %v1421_v26 = vld [vmem:[%s12984_s2 + $0xf8] sm:$0xff] }
  0x4f   :  { %10700 = vmatpush3.bf16.msra.mxu1 %v10699_v27  ;;  %10701 = vmatprep.subr.bf16.mxu0 %v11107_v3  ;;  %v10759_v27 = vpack.c.bf16 %v1421_v26, %v1420_v24  ;;  %v9006_v26 = vld [vmem:[%s12986_s27 + $0x6] ss:$0 sm:$0xff] }
  0x50   :  { %10707 = vmatprep.subr.bf16.mxu1 %v11107_v3 }
  0x51   :  { %9875 = vmatmul.mubr.msk.f32.vlgmr.msra.gmra.mrb[12].mxu0 %vm175_vm1, %v11296_v18 }
  0x52   :  { %9886 = vmatmul.mubr.msk.f32.vlgmr.msra.gmra.mrb[12].mxu1 %vm175_vm1, %v11302_v20  ;;  %10703 = vmatpush3.bf16.msra.mxu0 %v10702_v32 }
  0x53   :  { %10709 = vmatpush3.bf16.msra.mxu1 %v10708_v33  ;;  %10704 = vmatprep.subr.bf16.mxu0 %v11107_v3 }
  0x54   :  { %10710 = vmatprep.subr.bf16.mxu1 %v11107_v3  ;;  %9896 = vmatprep.mubr.msk.f32.mxu0 %vm11108_vm0, %v11109_v11 }
  0x55   :  { %9907 = vmatprep.mubr.msk.f32.mxu1 %vm11108_vm0, %v11109_v11 }
  0x56   :  { %10706 = vmatpush3.bf16.msra.mxu0 %v10705_v38 }
  0x57   :  { %10712 = vmatpush3.bf16.msra.mxu1 %v10711_v39  ;;  %10713 = vmatprep.subr.bf16.mxu0 %v11107_v3 }
  0x58   :  { %10719 = vmatprep.subr.bf16.mxu1 %v11107_v3 }
  0x59   :  { %9897 = vmatmul.mubr.msk.f32.vlgmr.msra.gmra.mrb[14].mxu0 %vm175_vm1, %v11296_v18 }
  0x5a   :  { %9908 = vmatmul.mubr.msk.f32.vlgmr.msra.gmra.mrb[14].mxu1 %vm175_vm1, %v11302_v20  ;;  %10715 = vmatpush3.bf16.msra.mxu0 %v10714_v44  ;;  %v9000_v44 = vld [vmem:[%s12986_s27] ss:$0 sm:$0xff] }
  0x5b   :  { %10721 = vmatpush3.bf16.msra.mxu1 %v10720_v45  ;;  %10716 = vmatprep.subr.bf16.mxu0 %v11107_v3  ;;  %v9001_v45 = vld [vmem:[%s12986_s27 + $0x1] ss:$0 sm:$0xff] }
  0x5c   :  { %10722 = vmatprep.subr.bf16.mxu1 %v11107_v3  ;;  %9918 = vmatprep.mubr.msk.f32.mxu0 %vm11108_vm0, %v11109_v11 }
  0x5d   :  { %9929 = vmatprep.mubr.msk.f32.mxu1 %vm11108_vm0, %v11109_v11 }
  0x5e   :  { %10718 = vmatpush3.bf16.msra.mxu0 %v10717_v49 }
  0x5f   :  { %10724 = vmatpush3.bf16.msra.mxu1 %v10723_v51  ;;  %10725 = vmatprep.subr.bf16.mxu0 %v11107_v3 }
  0x60   :  { %10731 = vmatprep.subr.bf16.mxu1 %v11107_v3 }
  0x61   :  { %9919 = vmatmul.mubr.msk.f32.vlgmr.msra.gmra.mrb[16].mxu0 %vm175_vm1, %v11296_v18 }
  0x62   :  { %9930 = vmatmul.mubr.msk.f32.vlgmr.msra.gmra.mrb[16].mxu1 %vm175_vm1, %v11302_v20  ;;  %10727 = vmatpush3.bf16.msra.mxu0 %v10726_v55  ;;  %v8986_v55 = vld [vmem:[%s12985_s9 + $0x2] ss:$0 sm:$0xff] }
  0x63   :  { %10733 = vmatpush3.bf16.msra.mxu1 %v10732_v57  ;;  %10728 = vmatprep.subr.bf16.mxu0 %v11107_v3  ;;  %v8987_v57 = vld [vmem:[%s12985_s9 + $0x3] ss:$0 sm:$0xff] }
  0x64   :  { %10734 = vmatprep.subr.bf16.mxu1 %v11107_v3  ;;  %9940 = vmatprep.mubr.msk.f32.mxu0 %vm11108_vm0, %v11109_v11 }
  0x65   :  { %9951 = vmatprep.mubr.msk.f32.mxu1 %vm11108_vm0, %v11109_v11 }
  0x66   :  { %10730 = vmatpush3.bf16.msra.mxu0 %v10729_v61 }
  0x67   :  { %10736 = vmatpush3.bf16.msra.mxu1 %v10735_v63  ;;  %10737 = vmatprep.subr.bf16.mxu0 %v11107_v3 }
  0x68   :  { %10743 = vmatprep.subr.bf16.mxu1 %v11107_v3 }
  0x69   :  { %9941 = vmatmul.mubr.msk.f32.vlgmr.msra.gmra.mrb[18].mxu0 %vm175_vm1, %v11296_v18 }
  0x6a   :  { %9952 = vmatmul.mubr.msk.f32.vlgmr.msra.gmra.mrb[18].mxu1 %vm175_vm1, %v11302_v20  ;;  %10739 = vmatpush3.bf16.msra.mxu0 %v10738_v2 }
  0x6b   :  { %10745 = vmatpush3.bf16.msra.mxu1 %v10744_v6  ;;  %10740 = vmatprep.subr.bf16.mxu0 %v11107_v3  ;;  %v8988_v6 = vld [vmem:[%s12985_s9 + $0x4] ss:$0 sm:$0xff] }
  0x6c   :  { %10746 = vmatprep.subr.bf16.mxu1 %v11107_v3  ;;  %9962 = vmatprep.mubr.msk.f32.mxu0 %vm11108_vm0, %v11109_v11 }
  0x6d   :  { %9973 = vmatprep.mubr.msk.f32.mxu1 %vm11108_vm0, %v11109_v11 }
  0x6e   :  { %10742 = vmatpush3.bf16.msra.mxu0 %v10741_v10  ;;  %v9005_v10 = vld [vmem:[%s12986_s27 + $0x5] ss:$0 sm:$0xff] }
  0x6f   :  { %10748 = vmatpush3.bf16.msra.mxu1 %v10747_v13  ;;  %10749 = vmatprep.subr.bf16.mxu0 %v11107_v3 }
  0x70   :  { %10755 = vmatprep.subr.bf16.mxu1 %v11107_v3 }
  0x71   :  { %9963 = vmatmul.mubr.msk.f32.vlgmr.msra.gmra.mrb[20].mxu0 %vm175_vm1, %v11296_v18 }
  0x72   :  { %9974 = vmatmul.mubr.msk.f32.vlgmr.msra.gmra.mrb[20].mxu1 %vm175_vm1, %v11302_v20  ;;  %10751 = vmatpush3.bf16.msra.mxu0 %v10750_v16 }
  0x73   :  { %10757 = vmatpush3.bf16.msra.mxu1 %v10756_v21  ;;  %10752 = vmatprep.subr.bf16.mxu0 %v11107_v3 }
  0x74   :  { %10758 = vmatprep.subr.bf16.mxu1 %v11107_v3  ;;  %9984 = vmatprep.mubr.msk.f32.mxu0 %vm11108_vm0, %v11109_v11 }
  0x75   :  { %9995 = vmatprep.mubr.msk.f32.mxu1 %vm11108_vm0, %v11109_v11 }
  0x76   :  { %10754 = vmatpush3.bf16.msra.mxu0 %v10753_v25  ;;  %v8991_v25 = vld [vmem:[%s12985_s9 + $0x7] ss:$0 sm:$0xff] }
  0x77   :  { %10760 = vmatpush3.bf16.msra.mxu1 %v10759_v27  ;;  %9998 = vmatprep.subr.mxu0 %v11109_v11  ;;  %v9007_v27 = vld [vmem:[%s12986_s27 + $0x7] ss:$0 sm:$0xff] }
  0x78   :  { %10003 = vmatprep.subr.mxu1 %v11109_v11 }
  0x79   :  { %9985 = vmatmul.mubr.msk.f32.vlgmr.msra.gmra.mrb[22].mxu0 %vm175_vm1, %v11296_v18 }
  0x7a   :  { %9996 = vmatmul.mubr.msk.f32.vlgmr.msra.gmra.mrb[22].mxu1 %vm175_vm1, %v11302_v20  ;;  %10000 = vmatprep.mubr.msk.f32.mxu0 %vm11108_vm0, %v11109_v11 }
  0x7b   :  { %10005 = vmatprep.mubr.msk.f32.mxu1 %vm11108_vm0, %v11109_v11 }
  0xf4   :  { %v245_v28 = vpop.f32.mrb[0].mxu0 }
  0xf5   :  { %v9744_v29 = vpop.f32.mrb[1].mxu0  ;;  %v318_v30 = vpop.f32.mrb[0].mxu1  ;;  %v246_v46 = vadd.f32 %v8984_v42, %v245_v28 }
  0xf6   :  { %v9755_v31 = vpop.f32.mrb[1].mxu1  ;;  %v319_v48 = vadd.f32 %v8985_v43, %v318_v30 }
  0xf7   :  { %v2038_v54 = vmul.f32 0.35355338, %v246_v46 }
  0xf8   :  { %v2039_v56 = vmul.f32 0.35355338, %v319_v48 }
  0xfc   :  { %v388_v32 = vpop.f32.mrb[2].mxu0 }
  0xfd   :  { %v9766_v33 = vpop.f32.mrb[3].mxu0  ;;  %v458_v34 = vpop.f32.mrb[2].mxu1  ;;  %v389_v60 = vadd.f32 %v8986_v55, %v388_v32 }
  0xfe   :  { %v9777_v35 = vpop.f32.mrb[3].mxu1  ;;  %v459_v62 = vadd.f32 %v8987_v57, %v458_v34 }
  0xff   :  { %v2040_v5 = vmul.f32 0.35355338, %v389_v60 }
 0x100   :  { %v2041_v7 = vmul.f32 0.35355338, %v459_v62 }
 0x104   :  { %v528_v36 = vpop.f32.mrb[4].mxu0 }
 0x105   :  { %v9788_v37 = vpop.f32.mrb[5].mxu0  ;;  %v598_v18 = vpop.f32.mrb[4].mxu1  ;;  %v529_v12 = vadd.f32 %v8988_v6, %v528_v36 }
 0x106   :  { %v9799_v38 = vpop.f32.mrb[5].mxu1  ;;  %v599_v14 = vadd.f32 %v8989_v8, %v598_v18  ;;  %v9016_v18 = vld [vmem:[%s12987_s28] ss:$0 sm:$0xff] }
 0x107   :  { %v2042_v22 = vmul.f32 0.35355338, %v529_v12  ;;  %v9017_v38 = vld [vmem:[%s12987_s28 + $0x1] ss:$0 sm:$0xff] }
 0x108   :  { %v2043_v24 = vmul.f32 0.35355338, %v599_v14 }
 0x10c   :  { %v11697_v39 = vpop.f32.mrb[6].mxu0 }
 0x10d   :  { %v9810_v20 = vpop.f32.mrb[7].mxu0  ;;  %v11699_v40 = vpop.f32.mrb[6].mxu1  ;;  %v669_v28 = vadd.f32 %v8990_v23, %v11697_v39 }
 0x10e   :  { %v9821_v41 = vpop.f32.mrb[7].mxu1  ;;  %v739_v30 = vadd.f32 %v8991_v25, %v11699_v40 }
 0x10f   :  { %v2044_v36 = vmul.f32 0.35355338, %v669_v28 }
 0x110   :  { %v2045_v37 = vmul.f32 0.35355338, %v739_v30 }
 0x114   :  { %v896_v47 = vpop.f32.mrb[8].mxu0 }
 0x115   :  { %v897_v49 = vadd.f32 %v9000_v44, %v896_v47  ;;  %v966_v50 = vpop.f32.mrb[8].mxu1  ;;  %v9832_v51 = vpop.f32.mrb[9].mxu0 }
 0x116   :  { %v967_v52 = vadd.f32 %v9001_v45, %v966_v50  ;;  %v9843_v53 = vpop.f32.mrb[9].mxu1 }
 0x117   :  { %9999 = vmatpush3.xpose.msk.msra.mxu0 %vm2046_vm2, %v897_v49 }
 0x118   :  { %10004 = vmatpush3.xpose.msk.msra.mxu1 %vm2046_vm2, %v967_v52  ;;  %10008 = vmatprep.subr.mxu0 %v11109_v11 }
 0x119   :  { %10013 = vmatprep.subr.mxu1 %v11109_v11 }
 0x11a   :  { %10001 = vmatmul.mubr.msk.f32.vlgmr.msra.gmra.mrb[24].mxu0 %vm2046_vm2, %v2038_v54 }
 0x11b   :  { %10006 = vmatmul.mubr.msk.f32.vlgmr.msra.gmra.mrb[24].mxu1 %vm2046_vm2, %v2039_v56  ;;  %10010 = vmatprep.mubr.msk.f32.mxu0 %vm11108_vm0, %v11109_v11 }
 0x11c   :  { %v1036_v61 = vpop.f32.mrb[10].mxu0  ;;  %10015 = vmatprep.mubr.msk.f32.mxu1 %vm11108_vm0, %v11109_v11 }
 0x11d   :  { %v1037_v63 = vadd.f32 %v9002_v58, %v1036_v61  ;;  %v1106_v0 = vpop.f32.mrb[10].mxu1  ;;  %v9854_v1 = vpop.f32.mrb[11].mxu0 }
 0x11e   :  { %v1107_v2 = vadd.f32 %v9003_v59, %v1106_v0  ;;  %v9865_v4 = vpop.f32.mrb[11].mxu1 }
 0x11f   :  { %10009 = vmatpush3.xpose.msk.msra.mxu0 %vm2046_vm2, %v1037_v63 }
 0x120   :  { %10014 = vmatpush3.xpose.msk.msra.mxu1 %vm2046_vm2, %v1107_v2  ;;  %10018 = vmatprep.subr.mxu0 %v11109_v11 }
 0x121   :  { %10023 = vmatprep.subr.mxu1 %v11109_v11 }
 0x122   :  { %10011 = vmatmul.mubr.msk.f32.vlgmr.msra.gmra.mrb[26].mxu0 %vm2046_vm2, %v2040_v5 }
 0x123   :  { %10016 = vmatmul.mubr.msk.f32.vlgmr.msra.gmra.mrb[26].mxu1 %vm2046_vm2, %v2041_v7  ;;  %10020 = vmatprep.mubr.msk.f32.mxu0 %vm11108_vm0, %v11109_v11 }
 0x124   :  { %v1176_v13 = vpop.f32.mrb[12].mxu0  ;;  %10025 = vmatprep.mubr.msk.f32.mxu1 %vm11108_vm0, %v11109_v11 }
 0x125   :  { %v1177_v15 = vadd.f32 %v9004_v9, %v1176_v13  ;;  %v1246_v16 = vpop.f32.mrb[12].mxu1  ;;  %v9876_v17 = vpop.f32.mrb[13].mxu0 }
 0x126   :  { %v1247_v19 = vadd.f32 %v9005_v10, %v1246_v16  ;;  %v9887_v21 = vpop.f32.mrb[13].mxu1 }
 0x127   :  { %10019 = vmatpush3.xpose.msk.msra.mxu0 %vm2046_vm2, %v1177_v15 }
 0x128   :  { %10024 = vmatpush3.xpose.msk.msra.mxu1 %vm2046_vm2, %v1247_v19  ;;  %10028 = vmatprep.subr.mxu0 %v11109_v11 }
 0x129   :  { %10033 = vmatprep.subr.mxu1 %v11109_v11 }
 0x12a   :  { %10021 = vmatmul.mubr.msk.f32.vlgmr.msra.gmra.mrb[28].mxu0 %vm2046_vm2, %v2042_v22 }
 0x12b   :  { %10026 = vmatmul.mubr.msk.f32.vlgmr.msra.gmra.mrb[28].mxu1 %vm2046_vm2, %v2043_v24  ;;  %10030 = vmatprep.mubr.msk.f32.mxu0 %vm11108_vm0, %v11109_v11 }
 0x12c   :  { %v1316_v29 = vpop.f32.mrb[14].mxu0  ;;  %10035 = vmatprep.mubr.msk.f32.mxu1 %vm11108_vm0, %v11109_v11 }
 0x12d   :  { %v1317_v31 = vadd.f32 %v9006_v26, %v1316_v29  ;;  %v1386_v32 = vpop.f32.mrb[14].mxu1  ;;  %v9898_v33 = vpop.f32.mrb[15].mxu0 }
 0x12e   :  { %v1387_v34 = vadd.f32 %v9007_v27, %v1386_v32  ;;  %v9909_v35 = vpop.f32.mrb[15].mxu1 }
 0x12f   :  { %10029 = vmatpush3.xpose.msk.msra.mxu0 %vm2046_vm2, %v1317_v31 }
 0x130   :  { %10034 = vmatpush3.xpose.msk.msra.mxu1 %vm2046_vm2, %v1387_v34  ;;  %10038 = vmatprep.subr.mxu0 %v11109_v11 }
 0x131   :  { %10043 = vmatprep.subr.mxu1 %v11109_v11 }
 0x132   :  { %10031 = vmatmul.mubr.msk.f32.vlgmr.msra.gmra.mrb[30].mxu0 %vm2046_vm2, %v2044_v36 }
 0x133   :  { %10036 = vmatmul.mubr.msk.f32.vlgmr.msra.gmra.mrb[30].mxu1 %vm2046_vm2, %v2045_v37  ;;  %10040 = vmatprep.mubr.msk.f32.mxu0 %vm11108_vm0, %v11109_v11 }
 0x134   :  { %10045 = vmatprep.mubr.msk.f32.mxu1 %vm11108_vm0, %v11109_v11  ;;  %v1544_v39 = vpop.f32.mrb[16].mxu0 }
 0x135   :  { %v1545_v20 = vadd.f32 %v9016_v18, %v1544_v39  ;;  %v9920_v40 = vpop.f32.mrb[17].mxu0  ;;  %v1614_v41 = vpop.f32.mrb[16].mxu1 }
 0x136   :  { %v1615_v42 = vadd.f32 %v9017_v38, %v1614_v41  ;;  %v9931_v43 = vpop.f32.mrb[17].mxu1 }
 0x137   :  { %10039 = vmatpush3.msra.mxu0 %v1545_v20 }
 0x138   :  { %10044 = vmatpush3.msra.mxu1 %v1615_v42  ;;  %10048 = vmatprep.subr.mxu0 %v11109_v11 }
 0x139   :  { %10053 = vmatprep.subr.mxu1 %v11109_v11 }
 0x13c   :  { %v11799_v44 = vpop.f32.mrb[18].mxu0 }
 0x13d   :  { %v9942_v45 = vpop.f32.mrb[19].mxu0  ;;  %v11801_v46 = vpop.f32.mrb[18].mxu1 }
 0x13e   :  { %v9953_v47 = vpop.f32.mrb[19].mxu1 }
 0x144   :  { %v11803_v48 = vpop.f32.mrb[20].mxu0 }
 0x145   :  { %v9964_v49 = vpop.f32.mrb[21].mxu0  ;;  %v11805_v50 = vpop.f32.mrb[20].mxu1 }
 0x146   :  { %v9975_v51 = vpop.f32.mrb[21].mxu1 }
 0x14c   :  { %v11807_v52 = vpop.f32.mrb[22].mxu0 }
 0x14d   :  { %v11809_v53 = vpop.f32.mrb[22].mxu1  ;;  %v9986_v54 = vpop.f32.mrb[23].mxu0 }
 0x14e   :  { %v9997_v55 = vpop.f32.mrb[23].mxu1 }
 0x1ed   :  { %v2119_v56 = vpop.f32.mrb[24].mxu0 }
 0x1ee   :  { %v2195_v57 = vpop.f32.mrb[24].mxu1  ;;  %v10002_v58 = vpop.f32.mrb[25].mxu0  ;;  %v2655_v59 = vsel %vm2046_vm2, %v2119_v56, -inf }
 0x1ef   :  { %v10007_v60 = vpop.f32.mrb[25].mxu1  ;;  %2656 = vmax.xlane.f32.xlu0 %v2655_v59  ;;  %v2658_v2 = vsel %vm2046_vm2, %v2195_v57, -inf }
 0x1f5   :  { %v2271_v61 = vpop.f32.mrb[26].mxu0 }
 0x1f6   :  { %v2347_v62 = vpop.f32.mrb[26].mxu1  ;;  %v10012_v63 = vpop.f32.mrb[27].mxu0  ;;  %v2661_v0 = vsel %vm2046_vm2, %v2271_v61, -inf }
 0x1f7   :  { %v10017_v1 = vpop.f32.mrb[27].mxu1  ;;  %2662 = vmax.xlane.f32.xlu0 %v2661_v0  ;;  %v2664_v16 = vsel %vm2046_vm2, %v2347_v62, -inf }
 0x1fb   :  { %2659 = vmax.xlane.f32.xlu0 %v2658_v2  ;;  %v9018_v2 = vld [vmem:[%s12987_s28 + $0x2] ss:$0 sm:$0xff] }
 0x1fd   :  { %v2423_v4 = vpop.f32.mrb[28].mxu0 }
 0x1fe   :  { %v2499_v5 = vpop.f32.mrb[28].mxu1  ;;  %v10022_v6 = vpop.f32.mrb[29].mxu0  ;;  %v2667_v7 = vsel %vm2046_vm2, %v2423_v4, -inf }
 0x1ff   :  { %v10027_v8 = vpop.f32.mrb[29].mxu1  ;;  %v2670_v9 = vsel %vm2046_vm2, %v2499_v5, -inf  ;;  %2668 = vmax.xlane.f32.xlu1 %v2667_v7  ;;  %v1685_v6 = vadd.f32 %v9018_v2, %v11799_v44 }
 0x200   :  { %2671 = vmax.xlane.f32.xlu0 %v2670_v9  ;;  %v9020_v8 = vld [vmem:[%s12987_s28 + $0x4] ss:$0 sm:$0xff] }
 0x205   :  { %v2575_v10 = vpop.f32.mrb[30].mxu0 }
 0x206   :  { %v2651_v12 = vpop.f32.mrb[30].mxu1  ;;  %v10032_v13 = vpop.f32.mrb[31].mxu0  ;;  %v2673_v14 = vsel %vm2046_vm2, %v2575_v10, -inf }
 0x207   :  { %v10037_v15 = vpop.f32.mrb[31].mxu1  ;;  %2674 = vmax.xlane.f32.xlu1 %v2673_v14  ;;  %v2676_v17 = vsel %vm2046_vm2, %v2651_v12, -inf  ;;  %v1825_v13 = vadd.f32 %v9020_v8, %v11803_v48  ;;  %v9022_v14 = vld [vmem:[%s12987_s28 + $0x6] ss:$0 sm:$0xff] }
 0x208   :  { %v1965_v48 = vadd.f32 %v9022_v14, %v11807_v52 }
 0x20b   :  { %2665 = vmax.xlane.f32.xlu1 %v2664_v16 }
 0x20f   :  { %2677 = vmax.xlane.f32.xlu1 %v2676_v17 }
 0x27c   :  { %v2657_v19 = vpop.xlane.xlu0 %2656 }
 0x27d   :  { %v2679_v21 = vsub.f32 %v2119_v56, %v2657_v19 }
 0x27f   :  { %v2687_v22 = vmul.f32 1.442695, %v2679_v21  ;;  %v9019_v21 = vld [vmem:[%s12987_s28 + $0x3] ss:$0 sm:$0xff] }
 0x281   :  { %10992 = vpow2.f32 %v2687_v22 }
 0x284   :  { %v2663_v23 = vpop.xlane.xlu0 %2662 }
 0x285   :  { %v2681_v24 = vsub.f32 %v2271_v61, %v2663_v23 }
 0x287   :  { %v2691_v25 = vmul.f32 1.442695, %v2681_v24 }
 0x288   :  { %v2660_v26 = vpop.xlane.xlu0 %2659 }
 0x289   :  { %10994 = vpow2.f32 %v2691_v25  ;;  %v2680_v28 = vsub.f32 %v2195_v57, %v2660_v26  ;;  %v1755_v25 = vadd.f32 %v9019_v21, %v11801_v46 }
 0x28b   :  { %v10993_v27 = vpop.eup %10992  ;;  %v2689_v33 = vmul.f32 1.442695, %v2680_v28 }
 0x28c   :  { %v2669_v29 = vpop.xlane.xlu1 %2668  ;;  %v2703_v30 = vsel %vm2046_vm2, %v10993_v27, 0.0 }
 0x28d   :  { %v2672_v31 = vpop.xlane.xlu0 %2671  ;;  %v2683_v32 = vsub.f32 %v2423_v4, %v2669_v29  ;;  %2704 = vadd.xlane.f32.xlu0 %v2703_v30 }
 0x28e   :  { %v2684_v34 = vsub.f32 %v2499_v5, %v2672_v31  ;;  %v9023_v31 = vld [vmem:[%s12987_s28 + $0x7] ss:$0 sm:$0xff] }
 0x28f   :  { %v2695_v35 = vmul.f32 1.442695, %v2683_v32 }
 0x290   :  { %v2697_v37 = vmul.f32 1.442695, %v2684_v34  ;;  %v2035_v34 = vadd.f32 %v9023_v31, %v11809_v53  ;;  %v3336_v53 = vld [vmem:[%s12988_s8 + $0x8] sm:$0xff] }
 0x291   :  { %10996 = vpow2.f32 %v2695_v35  ;;  %v3335_v35 = vld [vmem:[%s12988_s8] sm:$0xff] }
 0x292   :  { %10998 = vpow2.f32 %v2689_v33 }
 0x293   :  { %v10995_v36 = vpop.eup %10994  ;;  %11000 = vpow2.f32 %v2697_v37 }
 0x294   :  { %v2675_v18 = vpop.xlane.xlu1 %2674  ;;  %v2709_v38 = vsel %vm2046_vm2, %v10995_v36, 0.0 }
 0x295   :  { %v2685_v39 = vsub.f32 %v2575_v10, %v2675_v18  ;;  %2710 = vadd.xlane.f32.xlu1 %v2709_v38  ;;  %v3339_v38 = vld [vmem:[%s12988_s8 + $0x20] sm:$0xff] }
 0x297   :  { %v2699_v20 = vmul.f32 1.442695, %v2685_v39 }
 0x298   :  { %v2666_v40 = vpop.xlane.xlu1 %2665 }
 0x299   :  { %11002 = vpow2.f32 %v2699_v20  ;;  %v2682_v41 = vsub.f32 %v2347_v62, %v2666_v40  ;;  %v3341_v40 = vld [vmem:[%s12988_s8 + $0x30] sm:$0xff] }
 0x29b   :  { %v10997_v42 = vpop.eup %10996  ;;  %v2693_v43 = vmul.f32 1.442695, %v2682_v41 }
 0x29c   :  { %v2678_v45 = vpop.xlane.xlu1 %2677  ;;  %v2715_v47 = vsel %vm2046_vm2, %v10997_v42, 0.0  ;;  %v10999_v49 = vpop.eup %10998 }
 0x29d   :  { %11004 = vpow2.f32 %v2693_v43  ;;  %v2686_v51 = vsub.f32 %v2651_v12, %v2678_v45  ;;  %2716 = vadd.xlane.f32.xlu0 %v2715_v47  ;;  %v2706_v55 = vsel %vm2046_vm2, %v10999_v49, 0.0  ;;  %v11823_v56 = vpop.eup %11000  ;;  %v3338_v43 = vld [vmem:[%s12988_s8 + $0x18] sm:$0xff]  ;;  %v3989_v47 = vld [vmem:[%s12989_s1] sm:$0xff] }
 0x29e   :  { %v2718_v58 = vsel %vm2046_vm2, %v11823_v56, 0.0 }
 0x29f   :  { %v2701_v54 = vmul.f32 1.442695, %v2686_v51 }
 0x2a1   :  { %11006 = vpow2.f32 %v2701_v54  ;;  %2707 = vadd.xlane.f32.xlu0 %v2706_v55  ;;  %v3991_v55 = vld [vmem:[%s12989_s1 + $0x10] sm:$0xff] }
 0x2a3   :  { %v11003_v57 = vpop.eup %11002 }
 0x2a4   :  { %v2721_v59 = vsel %vm2046_vm2, %v11003_v57, 0.0 }
 0x2a5   :  { %2719 = vadd.xlane.f32.xlu0 %v2718_v58  ;;  %2722 = vadd.xlane.f32.xlu1 %v2721_v59  ;;  %v3340_v59 = vld [vmem:[%s12988_s8 + $0x28] sm:$0xff] }
 0x2a7   :  { %v11005_v60 = vpop.eup %11004 }
 0x2a8   :  { %v2712_v61 = vsel %vm2046_vm2, %v11005_v60, 0.0 }
 0x2a9   :  { %2713 = vadd.xlane.f32.xlu1 %v2712_v61 }
 0x2ab   :  { %v11829_v62 = vpop.eup %11006 }
 0x2ac   :  { %v2724_v63 = vsel %vm2046_vm2, %v11829_v62, 0.0 }
 0x2ad   :  { %2725 = vadd.xlane.f32.xlu1 %v2724_v63  ;;  %v3342_v63 = vld [vmem:[%s12988_s8 + $0x38] sm:$0xff] }
 0x31a   :  { %v2705_v0 = vpop.xlane.xlu0 %2704 }
 0x31b   :  { %11008 = vrcp.f32 %v2705_v0 }
 0x322   :  { %v2711_v1 = vpop.xlane.xlu1 %2710 }
 0x323   :  { %11010 = vrcp.f32 %v2711_v1  ;;  %v86_v1 = vld [vmem:[%s12990_s3] sm:$0x3] }
 0x325   :  { %v11009_v4 = vpop.eup %11008 }
 0x326   :  { %v2743_v5 = vmul.f32 %v11009_v4, %v10993_v27  ;;  %v9021_v27 = vld [vmem:[%s12987_s28 + $0x5] ss:$0 sm:$0xff] }
 0x327   :  { %v1895_v30 = vadd.f32 %v9021_v27, %v11805_v50 }
 0x328   :  { %10041 = vmatmul.mubr.msk.f32.vlgmr.msra.gmra.mrb[32].mxu0 %vm2046_vm2, %v2743_v5 }
 0x329   :  { %10049 = vmatpush3.msra.mxu0 %v1685_v6  ;;  %10050 = vmatprep.mubr.msk.f32.mxu0 %vm11108_vm0, %v11109_v11  ;;  %v4073_v6 = vld [vmem:[%s12934_s12] sm:$0xff] }
 0x32a   :  { %v2717_v7 = vpop.xlane.xlu0 %2716  ;;  %10058 = vmatprep.subr.mxu0 %v11109_v11 }
 0x32b   :  { %11012 = vrcp.f32 %v2717_v7  ;;  %v4074_v7 = vld [vmem:[%s12934_s12 + $0x8] sm:$0xff] }
 0x32c   :  { %v10768_v8 = vpack.c.bf16 %v4074_v7, %v4073_v6 }
 0x32d   :  { %v11011_v9 = vpop.eup %11010 }
 0x32e   :  { %v2745_v10 = vmul.f32 %v11011_v9, %v10995_v36  ;;  %v2708_v12 = vpop.xlane.xlu0 %2707  ;;  %v3337_v36 = vld [vmem:[%s12988_s8 + $0x10] sm:$0xff] }
 0x32f   :  { %11014 = vrcp.f32 %v2708_v12  ;;  %v4075_v9 = vld [vmem:[%s12934_s12 + $0x10] sm:$0xff] }
 0x330   :  { %10051 = vmatmul.mubr.msk.f32.vlgmr.msra.gmra.mrb[34].mxu0 %vm2046_vm2, %v2745_v10  ;;  %v4076_v10 = vld [vmem:[%s12934_s12 + $0x18] sm:$0xff] }
 0x331   :  { %10059 = vmatpush3.msra.mxu0 %v1825_v13  ;;  %10060 = vmatprep.mubr.msk.f32.mxu0 %vm11108_vm0, %v11109_v11  ;;  %v10771_v12 = vpack.c.bf16 %v4076_v10, %v4075_v9 }
 0x332   :  { %v2723_v44 = vpop.xlane.xlu1 %2722  ;;  %10068 = vmatprep.subr.mxu0 %v11109_v11  ;;  %v2720_v17 = vpop.xlane.xlu0 %2719 }
 0x333   :  { %11016 = vrcp.f32 %v2723_v44 }
 0x335   :  { %v11013_v15 = vpop.eup %11012 }
 0x336   :  { %v2747_v16 = vmul.f32 %v11013_v15, %v10997_v42  ;;  %v2714_v19 = vpop.xlane.xlu1 %2713 }
 0x337   :  { %11018 = vrcp.f32 %v2714_v19 }
 0x338   :  { %10061 = vmatmul.mubr.msk.f32.vlgmr.msra.gmra.mrb[36].mxu0 %vm2046_vm2, %v2747_v16  ;;  %11020 = vrcp.f32 %v2720_v17 }
 0x339   :  { %v11015_v22 = vpop.eup %11014  ;;  %10069 = vmatpush3.msra.mxu0 %v1965_v48  ;;  %10070 = vmatprep.mubr.msk.f32.mxu0 %vm11108_vm0, %v11109_v11 }
 0x33a   :  { %v2744_v23 = vmul.f32 %v11015_v22, %v10999_v49  ;;  %v2726_v24 = vpop.xlane.xlu1 %2725  ;;  %10078 = vmatprep.subr.mxu0 %v11109_v11  ;;  %v3990_v49 = vld [vmem:[%s12989_s1 + $0x8] sm:$0xff] }
 0x33b   :  { %11022 = vrcp.f32 %v2726_v24  ;;  %v10762_v54 = vpack.c.bf16 %v3990_v49, %v3989_v47  ;;  %v9064_v24 = vld [vmem:[%s12991_s24] ss:$0 sm:$0xff] }
 0x33c   :  { %10046 = vmatmul.mubr.msk.f32.vlgmr.msra.gmra.mrb[32].mxu1 %vm2046_vm2, %v2744_v23 }
 0x33d   :  { %10054 = vmatpush3.msra.mxu1 %v1755_v25  ;;  %10055 = vmatprep.mubr.msk.f32.mxu1 %vm11108_vm0, %v11109_v11  ;;  %v11017_v52 = vpop.eup %11016 }
 0x33e   :  { %10063 = vmatprep.subr.mxu1 %v11109_v11  ;;  %v2749_v26 = vmul.f32 %v11017_v52, %v11003_v57 }
 0x340   :  { %10071 = vmatmul.mubr.msk.f32.vlgmr.msra.gmra.mrb[38].mxu0 %vm2046_vm2, %v2749_v26 }
 0x341   :  { %v11019_v28 = vpop.eup %11018  ;;  %10080 = vmatprep.mubr.msk.f32.mxu0 %vm11108_vm0, %v11109_v11  ;;  %10079 = vmatpush3.msra.mxu0 %v3335_v35 }
 0x342   :  { %v2746_v29 = vmul.f32 %v11019_v28, %v11005_v60  ;;  %v11021_v46 = vpop.eup %11020  ;;  %10088 = vmatprep.subr.mxu0 %v11109_v11 }
 0x343   :  { %v2748_v32 = vmul.f32 %v11021_v46, %v11823_v56  ;;  %v3992_v56 = vld [vmem:[%s12989_s1 + $0x18] sm:$0xff]  ;;  %v11080_v46 = vld [vmem:[%s12982_s6] sm:$0xff] }
 0x344   :  { %10056 = vmatmul.mubr.msk.f32.vlgmr.msra.gmra.mrb[34].mxu1 %vm2046_vm2, %v2746_v29  ;;  %v10765_v60 = vpack.c.bf16 %v3992_v56, %v3991_v55 }
 0x345   :  { %10064 = vmatpush3.msra.mxu1 %v1895_v30  ;;  %10065 = vmatprep.mubr.msk.f32.mxu1 %vm11108_vm0, %v11109_v11  ;;  %v11023_v33 = vpop.eup %11022 }
 0x346   :  { %10073 = vmatprep.subr.mxu1 %v11109_v11  ;;  %v2750_v50 = vmul.f32 %v11023_v33, %v11829_v62  ;;  %v9067_v33 = vld [vmem:[%s12933_s11] ss:$0 sm:$0xff] }
 0x348   :  { %10066 = vmatmul.mubr.msk.f32.vlgmr.msra.gmra.mrb[36].mxu1 %vm2046_vm2, %v2748_v32 }
 0x349   :  { %10074 = vmatpush3.msra.mxu1 %v2035_v34  ;;  %10075 = vmatprep.mubr.msk.f32.mxu1 %vm11108_vm0, %v11109_v11 }
 0x34a   :  { %10083 = vmatprep.subr.mxu1 %v11109_v11 }
 0x34c   :  { %10076 = vmatmul.mubr.msk.f32.vlgmr.msra.gmra.mrb[38].mxu1 %vm2046_vm2, %v2750_v50 }
 0x34d   :  { %10085 = vmatprep.mubr.msk.f32.mxu1 %vm11108_vm0, %v11109_v11  ;;  %10084 = vmatpush3.msra.mxu1 %v3336_v53 }
 0x34e   :  { %10093 = vmatprep.subr.mxu1 %v11109_v11 }
 0x3fb   :  { %v2820_v37 = vpop.f32.mrb[32].mxu0 }
 0x3fc   :  { %v10042_v18 = vpop.f32.mrb[33].mxu0  ;;  %10081 = vmatmul.mubr.msk.f32.vlgmr.msra.gmra.mrb[40].mxu0 %vm2046_vm2, %v2820_v37 }
 0x3fd   :  { %10089 = vmatpush3.msra.mxu0 %v3337_v36  ;;  %10090 = vmatprep.mubr.msk.f32.mxu0 %vm11108_vm0, %v11109_v11 }
 0x3fe   :  { %10098 = vmatprep.subr.mxu0 %v11109_v11 }
 0x403   :  { %v2966_v39 = vpop.f32.mrb[34].mxu0 }
 0x404   :  { %v10052_v20 = vpop.f32.mrb[35].mxu0  ;;  %10091 = vmatmul.mubr.msk.f32.vlgmr.msra.gmra.mrb[42].mxu0 %vm2046_vm2, %v2966_v39 }
 0x405   :  { %10099 = vmatpush3.msra.mxu0 %v3339_v38  ;;  %10100 = vmatprep.mubr.msk.f32.mxu0 %vm11108_vm0, %v11109_v11  ;;  %v11081_v20 = vld [vmem:[%s12982_s6 + $0x8] sm:$0xff] }
 0x406   :  { %10108 = vmatprep.subr.mxu0 %v11109_v11 }
 0x40b   :  { %v3112_v41 = vpop.f32.mrb[36].mxu0 }
 0x40c   :  { %v10062_v42 = vpop.f32.mrb[37].mxu0  ;;  %10101 = vmatmul.mubr.msk.f32.vlgmr.msra.gmra.mrb[44].mxu0 %vm2046_vm2, %v3112_v41 }
 0x40d   :  { %10109 = vmatpush3.msra.mxu0 %v3341_v40  ;;  %10110 = vmatprep.mubr.msk.f32.mxu0 %vm11108_vm0, %v11109_v11 }
 0x40e   :  { %10761 = vmatprep.subr.bf16.mxu0 %v11107_v3 }
 0x40f   :  { %v2893_v45 = vpop.f32.mrb[32].mxu1 }
 0x410   :  { %v10047_v51 = vpop.f32.mrb[33].mxu1  ;;  %10086 = vmatmul.mubr.msk.f32.vlgmr.msra.gmra.mrb[40].mxu1 %vm2046_vm2, %v2893_v45 }
 0x411   :  { %10094 = vmatpush3.msra.mxu1 %v3338_v43  ;;  %10095 = vmatprep.mubr.msk.f32.mxu1 %vm11108_vm0, %v11109_v11 }
 0x412   :  { %10103 = vmatprep.subr.mxu1 %v11109_v11 }
 0x413   :  { %v3258_v57 = vpop.f32.mrb[38].mxu0 }
 0x414   :  { %v10072_v58 = vpop.f32.mrb[39].mxu0  ;;  %10111 = vmatmul.mubr.msk.f32.vlgmr.msra.gmra.mrb[46].mxu0 %vm2046_vm2, %v3258_v57 }
 0x415   :  { %10763 = vmatpush3.bf16.msra.mxu0 %v10762_v54  ;;  %10126 = vmatprep.mubr.msk.f32.mxu0 %vm11108_vm0, %v11109_v11 }
 0x416   :  { %10764 = vmatprep.subr.bf16.mxu0 %v11107_v3 }
 0x417   :  { %v3039_v61 = vpop.f32.mrb[34].mxu1 }
 0x418   :  { %v10057_v62 = vpop.f32.mrb[35].mxu1  ;;  %10096 = vmatmul.mubr.msk.f32.vlgmr.msra.gmra.mrb[42].mxu1 %vm2046_vm2, %v3039_v61 }
 0x419   :  { %10104 = vmatpush3.msra.mxu1 %v3340_v59  ;;  %10105 = vmatprep.mubr.msk.f32.mxu1 %vm11108_vm0, %v11109_v11  ;;  %v4161_v62 = vlaneseq }
 0x41a   :  { %10113 = vmatprep.subr.mxu1 %v11109_v11  ;;  %10766 = vmatpush3.bf16.msra.mxu0 %v10765_v60  ;;  %v11110_v60 = vmov 1966171168  }
 0x41b   :  { %v3185_v0 = vpop.f32.mrb[36].mxu1  ;;  %v4159_v61 = vunpack.c.l.s4 %v11110_v60 }
 0x41c   :  { %v10067_v2 = vpop.f32.mrb[37].mxu1  ;;  %10106 = vmatmul.mubr.msk.f32.vlgmr.msra.gmra.mrb[44].mxu1 %vm2046_vm2, %v3185_v0 }
 0x41d   :  { %10114 = vmatpush3.msra.mxu1 %v3342_v63  ;;  %10115 = vmatprep.mubr.msk.f32.mxu1 %vm11108_vm0, %v11109_v11  ;;  %v4162_v2 = vshrl.u32 %v4161_v62, 7 }
 0x41e   :  { %10127 = vmatmul.mubr.msk.f32.vlgmr.msra.gmra.mrb[48].mxu0 %vm175_vm1, %v86_v1  ;;  %10767 = vmatprep.subr.bf16.mxu1 %v11107_v3  ;;  %v4160_v1 = vunpack.c.0.s8 %v4159_v61 }
 0x41f   :  { %v3331_v4 = vpop.f32.mrb[38].mxu1 }
 0x420   :  { %v10077_v5 = vpop.f32.mrb[39].mxu1  ;;  %10116 = vmatmul.mubr.msk.f32.vlgmr.msra.gmra.mrb[46].mxu1 %vm2046_vm2, %v3331_v4  ;;  %v11995_v7 = vsub.s32 %v4160_v1, %v4162_v2  ;;  %v9071_v1 = vld [vmem:[%s12938_s16] ss:$0 sm:$0xff] }
 0x421   :  { %10137 = vmatprep.mubr.msk.f32.mxu1 %vm11108_vm0, %v11109_v11  ;;  %10769 = vmatpush3.bf16.msra.mxu1 %v10768_v8  ;;  %v9069_v5 = vld [vmem:[%s12935_s13] ss:$0 sm:$0xff] }
 0x422   :  { %10770 = vmatprep.subr.bf16.mxu1 %v11107_v3 }
 0x425   :  { %10772 = vmatpush3.bf16.msra.mxu1 %v10771_v12 }
 0x4cf   :  { %v3412_v13 = vpop.f32.mrb[40].mxu0 }
 0x4d0   :  { %v10082_v44 = vpop.f32.mrb[41].mxu0 }
 0x4d1   :  { %v11999_v44 = vsub.s32 0, %v4162_v2 }
 0x4d7   :  { %v3558_v14 = vpop.f32.mrb[42].mxu0 }
 0x4d8   :  { %v3927_v15 = vadd.f32 %v3558_v14, %v3412_v13  ;;  %v10092_v16 = vpop.f32.mrb[43].mxu0 }
 0x4df   :  { %v3704_v17 = vpop.f32.mrb[44].mxu0 }
 0x4e0   :  { %v3929_v19 = vadd.f32 %v3927_v15, %v3704_v17  ;;  %v10102_v48 = vpop.f32.mrb[45].mxu0  ;;  %v9065_v15 = vld [vmem:[%s12936_s14] ss:$0 sm:$0xff] }
 0x4e1   :  { %v9066_v17 = vld [vmem:[%s12937_s15] ss:$0 sm:$0xff] }
 0x4e3   :  { %v3485_v21 = vpop.f32.mrb[40].mxu1 }
 0x4e4   :  { %v10087_v22 = vpop.f32.mrb[41].mxu1 }
 0x4e7   :  { %v3850_v23 = vpop.f32.mrb[46].mxu0 }
 0x4e8   :  { %v3931_v25 = vadd.f32 %v3929_v19, %v3850_v23  ;;  %v10112_v52 = vpop.f32.mrb[47].mxu0 }
 0x4ea   :  { %v3940_v26 = vadd.f32 %v9064_v24, %v3931_v25 }
 0x4eb   :  { %v3631_v27 = vpop.f32.mrb[42].mxu1 }
 0x4ec   :  { %v3928_v28 = vadd.f32 %v3631_v27, %v3485_v21  ;;  %v10097_v29 = vpop.f32.mrb[43].mxu1  ;;  %v3942_v30 = vadd.f32 %v11080_v46, %v3940_v26 }
 0x4ee   :  { %v3946_v32 = vsel %vm175_vm1, %v3942_v30, 0.0 }
 0x4ef   :  { %v3777_v31 = vpop.f32.mrb[44].mxu1  ;;  %3947 = vadd.xlane.f32.xlu0 %v3946_v32 }
 0x4f0   :  { %v3930_v34 = vadd.f32 %v3928_v28, %v3777_v31  ;;  %v10107_v50 = vpop.f32.mrb[45].mxu1 }
 0x4f1   :  { %v4069_v35 = vpop.f32.mrb[48].mxu0 }
 0x4f2   :  { %v4070_v53 = vadd.f32 %v9067_v33, %v4069_v35  ;;  %v10128_v36 = vpop.f32.mrb[49].mxu0 }
 0x4f3   :  { %v3923_v37 = vpop.f32.mrb[46].mxu1 }
 0x4f4   :  { %v3932_v18 = vadd.f32 %v3930_v34, %v3923_v37  ;;  %v10117_v38 = vpop.f32.mrb[47].mxu1  ;;  %10138 = vmatmul.mubr.msk.f32.vlgmr.msra.gmra.mrb[48].mxu1 %vm175_vm1, %v4070_v53 }
 0x4f5   :  { %v4236_v38 = vld [vmem:[%s12940_s18] sm:$0xff] }
 0x4f6   :  { %v3941_v39 = vadd.f32 %v9064_v24, %v3932_v18 }
 0x4f8   :  { %v3943_v40 = vadd.f32 %v11081_v20, %v3941_v39  ;;  %v4237_v39 = vld [vmem:[%s12940_s18 + $0x8] sm:$0xff] }
 0x4f9   :  { %v10773_v20 = vpack.c.bf16 %v4237_v39, %v4236_v38  ;;  %v9081_v38 = vld [vmem:[%s12981_s7 + $0x100] sm:$0xff]  ;;  %v9082_v39 = vld [vmem:[%s12981_s7 + $0x108] sm:$0xff] }
 0x4fa   :  { %v3949_v41 = vsel %vm175_vm1, %v3943_v40, 0.0 }
 0x4fb   :  { %3950 = vadd.xlane.f32.xlu1 %v3949_v41  ;;  %10774 = vmatprep.subr.bf16.mxu0 %v10773_v20  ;;  %v4239_v41 = vld [vmem:[%s12940_s18 + $0x18] sm:$0xff] }
 0x4fc   :  { %10776 = vmatpush3.bf16.msra.mxu0 %v10773_v20  ;;  %v9089_v20 = vld [vmem:[%s12981_s7 + $0x140] sm:$0xff] }
 0x57c   :  { %v3948_v42 = vpop.xlane.xlu0 %3947 }
 0x57d   :  { %v3953_v43 = vmul.f32 0.03125, %v3948_v42 }
 0x57f   :  { %v3955_v45 = vsub.f32 %v3942_v30, %v3953_v43  ;;  %v4330_v43 = vld [vmem:[%s12942_s20] sm:$0xff] }
 0x581   :  { %v3957_v47 = vmul.f32 %v3955_v45, %v3955_v45 }
 0x583   :  { %v3959_v49 = vsel %vm175_vm1, %v3957_v47, 0.0  ;;  %v4332_v47 = vld [vmem:[%s12942_s20 + $0x10] sm:$0xff] }
 0x584   :  { %3960 = vadd.xlane.f32.xlu0 %v3959_v49 }
 0x588   :  { %v3951_v51 = vpop.xlane.xlu1 %3950 }
 0x589   :  { %v3954_v54 = vmul.f32 0.03125, %v3951_v51  ;;  %v4333_v51 = vld [vmem:[%s12942_s20 + $0x18] sm:$0xff] }
 0x58b   :  { %v3956_v55 = vsub.f32 %v3943_v40, %v3954_v54  ;;  %v4238_v40 = vld [vmem:[%s12940_s18 + $0x10] sm:$0xff]  ;;  %v10785_v54 = vpack.c.bf16 %v4333_v51, %v4332_v47  ;;  %v9092_v51 = vld [vmem:[%s12981_s7 + $0x158] sm:$0xff]  ;;  %s12993_s18 = sld [smem:[#allocation17_spill]] }
 0x58c   :  { %v10777_v42 = vpack.c.bf16 %v4239_v41, %v4238_v40  ;;  %v10798_v40 = vpack.c.bf16 %v9082_v39, %v9081_v38  ;;  %v9090_v41 = vld [vmem:[%s12981_s7 + $0x148] sm:$0xff]  ;;  %v9091_v47 = vld [vmem:[%s12981_s7 + $0x150] sm:$0xff]  ;;  %v9140_v39 = vld [vmem:[%s12983_s4 + $0x118] sm:$0xff] }
 0x58d   :  { %v3958_v56 = vmul.f32 %v3956_v55, %v3956_v55  ;;  %v9139_v38 = vld [vmem:[%s12983_s4 + $0x110] sm:$0xff] }
 0x58e   :  { %10778 = vmatprep.subr.bf16.mxu0 %v10777_v42 }
 0x58f   :  { %v3962_v57 = vsel %vm175_vm1, %v3958_v56, 0.0  ;;  %10780 = vmatpush3.bf16.msra.mxu0 %v10777_v42  ;;  %v4335_v56 = vld [vmem:[%s12942_s20 + $0x28] sm:$0xff]  ;;  %v10810_v42 = vpack.c.bf16 %v9090_v41, %v9089_v20  ;;  %v9109_v41 = vld [vmem:[%s12981_s7 + $0x1e0] sm:$0xff] }
 0x590   :  { %3963 = vadd.xlane.f32.xlu1 %v3962_v57  ;;  %10797 = vmatprep.subr.bf16.mxu0 %v11107_v3 }
 0x5c7   :  { %v4153_v58 = vpop.f32.mrb[48].mxu1 }
 0x5c8   :  { %v10139_v59 = vpop.f32.mrb[49].mxu1  ;;  %v4154_v6 = vadd.f32 %v9069_v5, %v4153_v58 }
 0x5ca   :  { %v4164_v8 = vrot.slane %v4154_v6, %v11995_v7 }
 0x5cc   :  { %v4172_v13 = vrot.slane %v4164_v8, %v11995_v7  ;;  %v4165_v22 = vcombine.high %v4164_v8, %v4164_v8 }
 0x5ce   :  { %v4183_v48 = vrot.slane %v4172_v13, %v11999_v44  ;;  %v4179_v25 = vrot.slane %v4165_v22, %v11995_v7  ;;  %v4336_v13 = vld [vmem:[%s12942_s20 + $0x30] sm:$0xff] }
 0x5d0   :  { %v4187_v28 = vrot.slane %v4179_v25, %v11999_v44 }
 0x611   :  { %v3961_v63 = vpop.xlane.xlu0 %3960 }
 0x612   :  { %v3965_v0 = vmul.f32 0.03125, %v3961_v63 }
 0x614   :  { %v3967_v4 = vadd.f32 1e-05, %v3965_v0 }
 0x616   :  { %11024 = vrsqrt.f32 %v3967_v4  ;;  %v9072_v4 = vld [vmem:[%s12939_s17] ss:$0 sm:$0xff] }
 0x61d   :  { %v3964_v9 = vpop.xlane.xlu1 %3963 }
 0x61e   :  { %v3966_v10 = vmul.f32 0.03125, %v3964_v9 }
 0x620   :  { %v3968_v12 = vadd.f32 1e-05, %v3966_v10  ;;  %v11025_v14 = vpop.eup %11024 }
 0x621   :  { %v3971_v16 = vmul.f32 %v11025_v14, %v3955_v45  ;;  %v4331_v45 = vld [vmem:[%s12942_s20 + $0x8] sm:$0xff]  ;;  %v4337_v14 = vld [vmem:[%s12942_s20 + $0x38] sm:$0xff] }
 0x622   :  { %11026 = vrsqrt.f32 %v3968_v12  ;;  %v10781_v49 = vpack.c.bf16 %v4331_v45, %v4330_v43  ;;  %v9083_v43 = vld [vmem:[%s12981_s7 + $0x110] sm:$0xff]  ;;  %v9084_v45 = vld [vmem:[%s12981_s7 + $0x118] sm:$0xff] }
 0x623   :  { %v3979_v19 = vmul.f32 %v9065_v15, %v3971_v16  ;;  %v9073_v16 = vld [vmem:[%s12941_s19] ss:$0 sm:$0xff] }
 0x624   :  { %10782 = vmatprep.subr.bf16.mxu1 %v10781_v49 }
 0x625   :  { %v3987_v21 = vadd.f32 %v9066_v17, %v3979_v19  ;;  %10784 = vmatpush3.bf16.msra.mxu1 %v10781_v49  ;;  %v10801_v49 = vpack.c.bf16 %v9084_v45, %v9083_v43  ;;  %v9145_v43 = vld [vmem:[%s12983_s4 + $0x140] sm:$0xff]  ;;  %v9146_v45 = vld [vmem:[%s12983_s4 + $0x148] sm:$0xff] }
 0x626   :  { %10786 = vmatprep.subr.bf16.mxu1 %v10785_v54 }
 0x627   :  { %v4190_v23 = vadd.f32 %v4183_v48, %v3987_v21 }
 0x629   :  { %v4194_v24 = vsel %vm175_vm1, %v4190_v23, 0.0  ;;  %10788 = vmatpush3.bf16.msra.mxu1 %v10785_v54  ;;  %v10813_v54 = vpack.c.bf16 %v9092_v51, %v9091_v47  ;;  %v9111_v51 = vld [vmem:[%s12981_s7 + $0x1f0] sm:$0xff] }
 0x62a   :  { %4195 = vadd.xlane.f32.xlu0 %v4194_v24  ;;  %v9076_v24 = vld [vmem:[%s12943_s21] ss:$0 sm:$0xff] }
 0x62c   :  { %v11027_v52 = vpop.eup %11026 }
 0x62d   :  { %v3972_v26 = vmul.f32 %v11027_v52, %v3956_v55  ;;  %v4334_v55 = vld [vmem:[%s12942_s20 + $0x20] sm:$0xff] }
 0x62e   :  { %v10789_v57 = vpack.c.bf16 %v4335_v56, %v4334_v55 }
 0x62f   :  { %v3980_v27 = vmul.f32 %v9065_v15, %v3972_v26  ;;  %v10793_v15 = vpack.c.bf16 %v4337_v14, %v4336_v13 }
 0x630   :  { %10790 = vmatprep.subr.bf16.mxu1 %v10789_v57 }
 0x631   :  { %v3988_v29 = vadd.f32 %v9066_v17, %v3980_v27  ;;  %10792 = vmatpush3.bf16.msra.mxu1 %v10789_v57 }
 0x632   :  { %10794 = vmatprep.subr.bf16.mxu1 %v10793_v15 }
 0x633   :  { %v4191_v46 = vadd.f32 %v4187_v28, %v3988_v29 }
 0x635   :  { %v4197_v30 = vsel %vm175_vm1, %v4191_v46, 0.0  ;;  %10796 = vmatpush3.bf16.msra.mxu1 %v10793_v15  ;;  %v9088_v15 = vld [vmem:[%s12981_s7 + $0x138] sm:$0xff] }
 0x636   :  { %4198 = vadd.xlane.f32.xlu1 %v4197_v30  ;;  %10809 = vmatprep.subr.bf16.mxu1 %v11107_v3 }
 0x6b7   :  { %v4196_v31 = vpop.xlane.xlu0 %4195 }
 0x6b8   :  { %v4200_v32 = vmul.f32 0.03125, %v4196_v31 }
 0x6ba   :  { %v4202_v33 = vsub.f32 %v4190_v23, %v4200_v32 }
 0x6bc   :  { %v4204_v34 = vmul.f32 %v4202_v33, %v4202_v33 }
 0x6be   :  { %v4206_v50 = vsel %vm175_vm1, %v4204_v34, 0.0 }
 0x6bf   :  { %4207 = vadd.xlane.f32.xlu0 %v4206_v50 }
 0x6c3   :  { %v4199_v35 = vpop.xlane.xlu1 %4198 }
 0x6c4   :  { %v4201_v53 = vmul.f32 0.03125, %v4199_v35 }
 0x6c6   :  { %v4203_v36 = vsub.f32 %v4191_v46, %v4201_v53 }
 0x6c8   :  { %v4205_v37 = vmul.f32 %v4203_v36, %v4203_v36 }
 0x6ca   :  { %v4209_v18 = vsel %vm175_vm1, %v4205_v37, 0.0 }
 0x6cb   :  { %4210 = vadd.xlane.f32.xlu1 %v4209_v18 }
 0x74c   :  { %v4208_v58 = vpop.xlane.xlu0 %4207 }
 0x74d   :  { %v4212_v59 = vmul.f32 0.03125, %v4208_v58 }
 0x74f   :  { %v4214_v60 = vadd.f32 1e-05, %v4212_v59 }
 0x751   :  { %11028 = vrsqrt.f32 %v4214_v60 }
 0x758   :  { %v4211_v61 = vpop.xlane.xlu1 %4210 }
 0x759   :  { %v4213_v62 = vmul.f32 0.03125, %v4211_v61 }
 0x75b   :  { %v4215_v63 = vadd.f32 1e-05, %v4213_v62  ;;  %v11029_v0 = vpop.eup %11028  ;;  %v9079_v62 = vld [vmem:[%s12944_s22] ss:$0 sm:$0xff] }
 0x75c   :  { %v4218_v2 = vmul.f32 %v11029_v0, %v4202_v33 }
 0x75d   :  { %11030 = vrsqrt.f32 %v4215_v63  ;;  %v9085_v63 = vld [vmem:[%s12981_s7 + $0x120] sm:$0xff] }
 0x75e   :  { %v4226_v5 = vmul.f32 %v9071_v1, %v4218_v2  ;;  %v9097_v2 = vld [vmem:[%s12981_s7 + $0x180] sm:$0xff] }
 0x760   :  { %v4234_v6 = vadd.f32 %v9072_v4, %v4226_v5 }
 0x762   :  { %10148 = vmatprep.mubr.msk.f32.mxu0 %vm175_vm1, %v4234_v6 }
 0x767   :  { %v11031_v8 = vpop.eup %11030 }
 0x768   :  { %v4219_v9 = vmul.f32 %v11031_v8, %v4203_v36 }
 0x76a   :  { %v4227_v10 = vmul.f32 %v9071_v1, %v4219_v9  ;;  %v9086_v1 = vld [vmem:[%s12981_s7 + $0x128] sm:$0xff] }
 0x76b   :  { %v10804_v9 = vpack.c.bf16 %v9086_v1, %v9085_v63  ;;  %v9143_v1 = vld [vmem:[%s12983_s4 + $0x130] sm:$0xff] }
 0x76c   :  { %v4235_v12 = vadd.f32 %v9072_v4, %v4227_v10  ;;  %v9098_v4 = vld [vmem:[%s12981_s7 + $0x188] sm:$0xff] }
 0x76d   :  { %v10822_v10 = vpack.c.bf16 %v9098_v4, %v9097_v2  ;;  %v9144_v2 = vld [vmem:[%s12983_s4 + $0x138] sm:$0xff]  ;;  %v9155_v4 = vld [vmem:[%s12983_s4 + $0x190] sm:$0xff] }
 0x76e   :  { %10149 = vmatmul.mubr.msk.f32.vlgmr.msra.gmra.mrb[50].mxu0 %vm175_vm1, %v4235_v12 }
 0x76f   :  { %10178 = vmatprep.mubr.msk.f32.mxu0 %vm11108_vm0, %v11109_v11  ;;  %10799 = vmatpush3.bf16.msra.mxu0 %v10798_v40  ;;  %v10849_v40 = vpack.c.bf16 %v9140_v39, %v9139_v38  ;;  %v9167_v38 = vld [vmem:[%s12983_s4 + $0x1f0] sm:$0xff]  ;;  %v9168_v39 = vld [vmem:[%s12983_s4 + $0x1f8] sm:$0xff] }
 0x770   :  { %10800 = vmatprep.subr.bf16.mxu0 %v11107_v3 }
 0x773   :  { %10802 = vmatpush3.bf16.msra.mxu0 %v10801_v49  ;;  %v10858_v49 = vpack.c.bf16 %v9146_v45, %v9145_v43  ;;  %v9197_v43 = vld [vmem:[%s12984_s2 + $0x120] sm:$0xff]  ;;  %v9198_v45 = vld [vmem:[%s12984_s2 + $0x128] sm:$0xff] }
 0x774   :  { %10803 = vmatprep.subr.bf16.mxu0 %v11107_v3 }
 0x841   :  { %v10150_v17 = vpop.f32.mrb[50].mxu0 }
 0x842   :  { %v4325_v19 = vadd.f32 %v10150_v17, %v9073_v16  ;;  %v4319_v48 = vpop.f32.mrb[51].mxu0  ;;  %v9100_v17 = vld [vmem:[%s12981_s7 + $0x198] sm:$0xff] }
 0x843   :  { %v4320_v21 = vadd.f32 %v9073_v16, %v4319_v48  ;;  %v9099_v16 = vld [vmem:[%s12981_s7 + $0x190] sm:$0xff] }
 0x844   :  { %v4329_v23 = vmax.f32 %v4325_v19, 0.0  ;;  %v10825_v48 = vpack.c.bf16 %v9100_v17, %v9099_v16  ;;  %v9151_v17 = vld [vmem:[%s12983_s4 + $0x170] sm:$0xff] }
 0x845   :  { %v4328_v22 = vmax.f32 %v4320_v21, 0.0  ;;  %v9093_v21 = vld [vmem:[%s12981_s7 + $0x160] sm:$0xff] }
 0x847   :  { %10167 = vmatprep.mubr.msk.f32.mxu1 %vm4345_vm3, %v4328_v22 }
 0x848   :  { %10168 = vmatmul.mubr.msk.f32.vlgmr.msra.gmra.mrb[50].mxu1 %vm4345_vm3, %v4329_v23  ;;  %v9094_v23 = vld [vmem:[%s12981_s7 + $0x168] sm:$0xff] }
 0x849   :  { %10200 = vmatprep.mubr.msk.f32.mxu1 %vm11108_vm0, %v11109_v11  ;;  %10811 = vmatpush3.bf16.msra.mxu1 %v10810_v42  ;;  %v9110_v42 = vld [vmem:[%s12981_s7 + $0x1e8] sm:$0xff] }
 0x84a   :  { %10812 = vmatprep.subr.bf16.mxu1 %v11107_v3  ;;  %v10840_v47 = vpack.c.bf16 %v9110_v42, %v9109_v41  ;;  %v10891_v41 = vpack.c.bf16 %v9168_v39, %v9167_v38 }
 0x84d   :  { %10814 = vmatpush3.bf16.msra.mxu1 %v10813_v54  ;;  %v9112_v54 = vld [vmem:[%s12981_s7 + $0x1f8] sm:$0xff] }
 0x84e   :  { %10821 = vmatprep.subr.bf16.mxu1 %v11107_v3 }
 0x91b   :  { %v10169_v25 = vpop.f32.mrb[50].mxu1 }
 0x91c   :  { %v4424_v52 = vadd.f32 %v10169_v25, %v9076_v24  ;;  %v4418_v26 = vpop.f32.mrb[51].mxu1  ;;  %v9106_v25 = vld [vmem:[%s12981_s7 + $0x1c8] sm:$0xff] }
 0x91d   :  { %v4419_v27 = vadd.f32 %v9076_v24, %v4418_v26  ;;  %v9105_v24 = vld [vmem:[%s12981_s7 + $0x1c0] sm:$0xff] }
 0x91e   :  { %v4428_v28 = vadd.f32 %v4424_v52, %v4235_v12  ;;  %v9087_v12 = vld [vmem:[%s12981_s7 + $0x130] sm:$0xff]  ;;  %v10816_v52 = vpack.c.bf16 %v9094_v23, %v9093_v21  ;;  %v10834_v26 = vpack.c.bf16 %v9106_v25, %v9105_v24  ;;  %v9164_v21 = vld [vmem:[%s12983_s4 + $0x1d8] sm:$0xff]  ;;  %v9157_v24 = vld [vmem:[%s12983_s4 + $0x1a0] sm:$0xff] }
 0x91f   :  { %v4427_v29 = vadd.f32 %v4419_v27, %v4234_v6  ;;  %v9080_v6 = vld [vmem:[%s12945_s23] ss:$0 sm:$0xff]  ;;  %v10807_v19 = vpack.c.bf16 %v9088_v15, %v9087_v12  ;;  %v9095_v27 = vld [vmem:[%s12981_s7 + $0x170] sm:$0xff]  ;;  %v9158_v25 = vld [vmem:[%s12983_s4 + $0x1a8] sm:$0xff] }
 0x920   :  { %v4434_v46 = vsel %vm175_vm1, %v4428_v28, 0.0  ;;  %v9161_v12 = vld [vmem:[%s12983_s4 + $0x1c0] sm:$0xff] }
 0x921   :  { %4435 = vadd.xlane.f32.xlu1 %v4434_v46  ;;  %v4431_v30 = vsel %vm175_vm1, %v4427_v29, 0.0  ;;  %v9107_v46 = vld [vmem:[%s12981_s7 + $0x1d0] sm:$0xff] }
 0x922   :  { %4432 = vadd.xlane.f32.xlu0 %v4431_v30  ;;  %v9108_v30 = vld [vmem:[%s12981_s7 + $0x1d8] sm:$0xff] }
 0x9ae   :  { %v4436_v31 = vpop.xlane.xlu1 %4435 }
 0x9af   :  { %v4438_v32 = vmul.f32 0.03125, %v4436_v31  ;;  %v4433_v33 = vpop.xlane.xlu0 %4432 }
 0x9b0   :  { %v4437_v34 = vmul.f32 0.03125, %v4433_v33  ;;  %v9101_v33 = vld [vmem:[%s12981_s7 + $0x1a0] sm:$0xff] }
 0x9b1   :  { %v4440_v50 = vsub.f32 %v4428_v28, %v4438_v32  ;;  %v10837_v32 = vpack.c.bf16 %v9108_v30, %v9107_v46  ;;  %v9159_v46 = vld [vmem:[%s12983_s4 + $0x1b0] sm:$0xff]  ;;  %v9160_v30 = vld [vmem:[%s12983_s4 + $0x1b8] sm:$0xff] }
 0x9b2   :  { %v4439_v35 = vsub.f32 %v4427_v29, %v4437_v34  ;;  %v9096_v29 = vld [vmem:[%s12981_s7 + $0x178] sm:$0xff]  ;;  %v9102_v34 = vld [vmem:[%s12981_s7 + $0x1a8] sm:$0xff] }
 0x9b3   :  { %v4442_v53 = vmul.f32 %v4440_v50, %v4440_v50  ;;  %v10819_v31 = vpack.c.bf16 %v9096_v29, %v9095_v27  ;;  %v10876_v27 = vpack.c.bf16 %v9158_v25, %v9157_v24  ;;  %v9224_v24 = vld [vmem:[%s12984_s2 + $0x1f8] sm:$0xff] }
 0x9b4   :  { %v4441_v36 = vmul.f32 %v4439_v35, %v4439_v35 }
 0x9b5   :  { %v4446_v37 = vsel %vm175_vm1, %v4442_v53, 0.0  ;;  %v10828_v53 = vpack.c.bf16 %v9102_v34, %v9101_v33  ;;  %v10879_v33 = vpack.c.bf16 %v9160_v30, %v9159_v46 }
 0x9b6   :  { %4447 = vadd.xlane.f32.xlu1 %v4446_v37  ;;  %v4443_v18 = vsel %vm175_vm1, %v4441_v36, 0.0  ;;  %v9103_v37 = vld [vmem:[%s12981_s7 + $0x1b0] sm:$0xff] }
 0x9b7   :  { %4444 = vadd.xlane.f32.xlu0 %v4443_v18  ;;  %v9104_v18 = vld [vmem:[%s12981_s7 + $0x1b8] sm:$0xff] }
 0x9b8   :  { %v10831_v20 = vpack.c.bf16 %v9104_v18, %v9103_v37 }
 0xa43   :  { %v4448_v55 = vpop.xlane.xlu1 %4447 }
 0xa44   :  { %v4450_v56 = vmul.f32 0.03125, %v4448_v55  ;;  %v4445_v57 = vpop.xlane.xlu0 %4444  ;;  %v9147_v55 = vld [vmem:[%s12983_s4 + $0x150] sm:$0xff] }
 0xa45   :  { %v4449_v58 = vmul.f32 0.03125, %v4445_v57  ;;  %v10843_v57 = vpack.c.bf16 %v9112_v54, %v9111_v51  ;;  %v10900_v51 = vpack.c.bf16 %v9198_v45, %v9197_v43  ;;  %v9179_v43 = vld [vmem:[%s12986_s27 + $0xa] ss:$0 sm:$0xff] }
 0xa46   :  { %v4452_v59 = vadd.f32 1e-05, %v4450_v56  ;;  %v9148_v56 = vld [vmem:[%s12983_s4 + $0x158] sm:$0xff] }
 0xa47   :  { %v4451_v60 = vadd.f32 1e-05, %v4449_v58  ;;  %v10861_v58 = vpack.c.bf16 %v9148_v56, %v9147_v55  ;;  %v9199_v55 = vld [vmem:[%s12984_s2 + $0x130] sm:$0xff]  ;;  %v9200_v56 = vld [vmem:[%s12984_s2 + $0x138] sm:$0xff] }
 0xa49   :  { %11032 = vrsqrt.f32 %v4451_v60  ;;  %v9142_v60 = vld [vmem:[%s12983_s4 + $0x128] sm:$0xff] }
 0xa4a   :  { %11034 = vrsqrt.f32 %v4452_v59  ;;  %v9141_v59 = vld [vmem:[%s12983_s4 + $0x120] sm:$0xff] }
 0xa4b   :  { %v10852_v63 = vpack.c.bf16 %v9142_v60, %v9141_v59  ;;  %v10903_v59 = vpack.c.bf16 %v9200_v56, %v9199_v55 }
 0xa53   :  { %v11033_v61 = vpop.eup %11032 }
 0xa54   :  { %v4455_v0 = vmul.f32 %v11033_v61, %v4439_v35  ;;  %v11035_v5 = vpop.eup %11034  ;;  %v9138_v35 = vld [vmem:[%s12983_s4 + $0x108] sm:$0xff]  ;;  %v9153_v61 = vld [vmem:[%s12983_s4 + $0x180] sm:$0xff] }
 0xa55   :  { %v4456_v13 = vmul.f32 %v11035_v5, %v4440_v50  ;;  %v9137_v50 = vld [vmem:[%s12983_s4 + $0x100] sm:$0xff]  ;;  %v9156_v5 = vld [vmem:[%s12983_s4 + $0x198] sm:$0xff] }
 0xa56   :  { %v4463_v8 = vmul.f32 %v9079_v62, %v4455_v0  ;;  %v10846_v36 = vpack.c.bf16 %v9138_v35, %v9137_v50  ;;  %v9165_v50 = vld [vmem:[%s12983_s4 + $0x1e0] sm:$0xff]  ;;  %v9166_v35 = vld [vmem:[%s12983_s4 + $0x1e8] sm:$0xff] }
 0xa57   :  { %v4464_v22 = vmul.f32 %v9079_v62, %v4456_v13  ;;  %v9154_v62 = vld [vmem:[%s12983_s4 + $0x188] sm:$0xff]  ;;  %v10888_v37 = vpack.c.bf16 %v9166_v35, %v9165_v50 }
 0xa58   :  { %v12125_v14 = vadd.f32 %v9080_v6, %v4463_v8  ;;  %v10870_v0 = vpack.c.bf16 %v9154_v62, %v9153_v61  ;;  %v10873_v8 = vpack.c.bf16 %v9156_v5, %v9155_v4  ;;  %v9162_v13 = vld [vmem:[%s12983_s4 + $0x1c8] sm:$0xff]  ;;  %v9205_v61 = vld [vmem:[%s12984_s2 + $0x160] sm:$0xff]  ;;  %v9207_v4 = vld [vmem:[%s12984_s2 + $0x170] sm:$0xff] }
 0xa59   :  { %v12161_v28 = vadd.f32 %v9080_v6, %v4464_v22  ;;  %v10855_v6 = vpack.c.bf16 %v9144_v2, %v9143_v1  ;;  %v10882_v16 = vpack.c.bf16 %v9162_v13, %v9161_v12  ;;  %v9206_v62 = vld [vmem:[%s12984_s2 + $0x168] sm:$0xff]  ;;  %v9208_v5 = vld [vmem:[%s12984_s2 + $0x178] sm:$0xff]  ;;  %v9213_v12 = vld [vmem:[%s12984_s2 + $0x1a0] sm:$0xff] }
 0xa5a   :  { %10179 = vmatmul.mubr.msk.f32.vlgmr.msra.gmra.mrb[52].mxu0 %vm175_vm1, %v12125_v14  ;;  %10201 = vmatmul.mubr.msk.f32.vlgmr.msra.gmra.mrb[52].mxu1 %vm175_vm1, %v12125_v14  ;;  %v10912_v1 = vpack.c.bf16 %v9206_v62, %v9205_v61  ;;  %v9214_v13 = vld [vmem:[%s12984_s2 + $0x1a8] sm:$0xff] }
 0xa5b   :  { %10805 = vmatpush3.bf16.msra.mxu0 %v10804_v9  ;;  %10823 = vmatpush3.bf16.msra.mxu1 %v10822_v10  ;;  %v9149_v9 = vld [vmem:[%s12983_s4 + $0x160] sm:$0xff]  ;;  %v9150_v10 = vld [vmem:[%s12983_s4 + $0x168] sm:$0xff] }
 0xa5c   :  { %10806 = vmatprep.subr.bf16.mxu0 %v11107_v3  ;;  %10824 = vmatprep.subr.bf16.mxu1 %v11107_v3  ;;  %v10864_v15 = vpack.c.bf16 %v9150_v10, %v9149_v9  ;;  %v10915_v9 = vpack.c.bf16 %v9208_v5, %v9207_v4 }
 0xa5d   :  { %10189 = vmatprep.mubr.msk.f32.mxu0 %vm11108_vm0, %v11109_v11  ;;  %10222 = vmatprep.mubr.msk.f32.mxu1 %vm11108_vm0, %v11109_v11 }
 0xa5f   :  { %10808 = vmatpush3.bf16.msra.mxu0 %v10807_v19  ;;  %10826 = vmatpush3.bf16.msra.mxu1 %v10825_v48  ;;  %v9152_v19 = vld [vmem:[%s12983_s4 + $0x178] sm:$0xff]  ;;  %v9163_v48 = vld [vmem:[%s12983_s4 + $0x1d0] sm:$0xff] }
 0xa60   :  { %10815 = vmatprep.subr.bf16.mxu0 %v11107_v3  ;;  %10833 = vmatprep.subr.bf16.mxu1 %v11107_v3  ;;  %v10867_v22 = vpack.c.bf16 %v9152_v19, %v9151_v17  ;;  %v10885_v23 = vpack.c.bf16 %v9164_v21, %v9163_v48  ;;  %v9216_v17 = vld [vmem:[%s12984_s2 + $0x1b8] sm:$0xff]  ;;  %v9221_v48 = vld [vmem:[%s12984_s2 + $0x1e0] sm:$0xff]  ;;  %v9222_v21 = vld [vmem:[%s12984_s2 + $0x1e8] sm:$0xff] }
 0xa62   :  { %10190 = vmatmul.mubr.msk.f32.vlgmr.msra.gmra.mrb[54].mxu0 %vm175_vm1, %v12161_v28  ;;  %10223 = vmatmul.mubr.msk.f32.vlgmr.msra.gmra.mrb[54].mxu1 %vm175_vm1, %v12125_v14 }
 0xa63   :  { %10817 = vmatpush3.bf16.msra.mxu0 %v10816_v52  ;;  %10835 = vmatpush3.bf16.msra.mxu1 %v10834_v26  ;;  %v9193_v52 = vld [vmem:[%s12984_s2 + $0x100] sm:$0xff]  ;;  %v9194_v26 = vld [vmem:[%s12984_s2 + $0x108] sm:$0xff] }
 0xa64   :  { %10818 = vmatprep.subr.bf16.mxu0 %v11107_v3  ;;  %10836 = vmatprep.subr.bf16.mxu1 %v11107_v3  ;;  %v10894_v29 = vpack.c.bf16 %v9194_v26, %v9193_v52 }
 0xa65   :  { %10211 = vmatprep.mubr.msk.f32.mxu0 %vm11108_vm0, %v11109_v11  ;;  %10244 = vmatprep.mubr.msk.f32.mxu1 %vm11108_vm0, %v11109_v11 }
 0xa67   :  { %10820 = vmatpush3.bf16.msra.mxu0 %v10819_v31  ;;  %10838 = vmatpush3.bf16.msra.mxu1 %v10837_v32  ;;  %v9195_v31 = vld [vmem:[%s12984_s2 + $0x110] sm:$0xff]  ;;  %v9196_v32 = vld [vmem:[%s12984_s2 + $0x118] sm:$0xff] }
 0xa68   :  { %10827 = vmatprep.subr.bf16.mxu0 %v11107_v3  ;;  %10845 = vmatprep.subr.bf16.mxu1 %v11107_v3  ;;  %v10897_v34 = vpack.c.bf16 %v9196_v32, %v9195_v31 }
 0xa6a   :  { %10212 = vmatmul.mubr.msk.f32.vlgmr.msra.gmra.mrb[56].mxu0 %vm175_vm1, %v12161_v28  ;;  %10245 = vmatmul.mubr.msk.f32.vlgmr.msra.gmra.mrb[56].mxu1 %vm175_vm1, %v12125_v14 }
 0xa6b   :  { %10829 = vmatpush3.bf16.msra.mxu0 %v10828_v53  ;;  %10847 = vmatpush3.bf16.msra.mxu1 %v10846_v36  ;;  %v9201_v53 = vld [vmem:[%s12984_s2 + $0x140] sm:$0xff]  ;;  %v9202_v36 = vld [vmem:[%s12984_s2 + $0x148] sm:$0xff] }
 0xa6c   :  { %10830 = vmatprep.subr.bf16.mxu0 %v11107_v3  ;;  %10848 = vmatprep.subr.bf16.mxu1 %v11107_v3  ;;  %v10906_v18 = vpack.c.bf16 %v9202_v36, %v9201_v53  ;;  %v9121_v53 = vld [vmem:[%s12985_s9 + $0x8] ss:$0 sm:$0xff] }
 0xa6d   :  { %10233 = vmatprep.mubr.msk.f32.mxu0 %vm11108_vm0, %v11109_v11  ;;  %10266 = vmatprep.mubr.msk.f32.mxu1 %vm11108_vm0, %v11109_v11  ;;  %v9177_v36 = vld [vmem:[%s12986_s27 + $0x8] ss:$0 sm:$0xff] }
 0xa6f   :  { %10832 = vmatpush3.bf16.msra.mxu0 %v10831_v20  ;;  %10850 = vmatpush3.bf16.msra.mxu1 %v10849_v40  ;;  %v9203_v20 = vld [vmem:[%s12984_s2 + $0x150] sm:$0xff]  ;;  %v9204_v40 = vld [vmem:[%s12984_s2 + $0x158] sm:$0xff] }
 0xa70   :  { %10839 = vmatprep.subr.bf16.mxu0 %v11107_v3  ;;  %10857 = vmatprep.subr.bf16.mxu1 %v11107_v3  ;;  %v10909_v42 = vpack.c.bf16 %v9204_v40, %v9203_v20 }
 0xa72   :  { %10234 = vmatmul.mubr.msk.f32.vlgmr.msra.gmra.mrb[58].mxu0 %vm175_vm1, %v12161_v28  ;;  %10267 = vmatmul.mubr.msk.f32.vlgmr.msra.gmra.mrb[58].mxu1 %vm175_vm1, %v12125_v14 }
 0xa73   :  { %10841 = vmatpush3.bf16.msra.mxu0 %v10840_v47  ;;  %10859 = vmatpush3.bf16.msra.mxu1 %v10858_v49  ;;  %v9209_v47 = vld [vmem:[%s12984_s2 + $0x180] sm:$0xff]  ;;  %v9210_v49 = vld [vmem:[%s12984_s2 + $0x188] sm:$0xff] }
 0xa74   :  { %10842 = vmatprep.subr.bf16.mxu0 %v11107_v3  ;;  %10860 = vmatprep.subr.bf16.mxu1 %v11107_v3  ;;  %v10918_v54 = vpack.c.bf16 %v9210_v49, %v9209_v47 }
 0xa75   :  { %10255 = vmatprep.mubr.msk.f32.mxu0 %vm11108_vm0, %v11109_v11  ;;  %10288 = vmatprep.mubr.msk.f32.mxu1 %vm11108_vm0, %v11109_v11 }
 0xa77   :  { %10844 = vmatpush3.bf16.msra.mxu0 %v10843_v57  ;;  %10862 = vmatpush3.bf16.msra.mxu1 %v10861_v58  ;;  %v9211_v57 = vld [vmem:[%s12984_s2 + $0x190] sm:$0xff]  ;;  %v9212_v58 = vld [vmem:[%s12984_s2 + $0x198] sm:$0xff] }
 0xa78   :  { %10851 = vmatprep.subr.bf16.mxu0 %v11107_v3  ;;  %10869 = vmatprep.subr.bf16.mxu1 %v11107_v3  ;;  %v10921_v60 = vpack.c.bf16 %v9212_v58, %v9211_v57  ;;  %v9122_v57 = vld [vmem:[%s12985_s9 + $0x9] ss:$0 sm:$0xff]  ;;  %v9125_v58 = vld [vmem:[%s12985_s9 + $0xc] ss:$0 sm:$0xff] }
 0xa7a   :  { %10256 = vmatmul.mubr.msk.f32.vlgmr.msra.gmra.mrb[60].mxu0 %vm175_vm1, %v12161_v28  ;;  %10289 = vmatmul.mubr.msk.f32.vlgmr.msra.gmra.mrb[60].mxu1 %vm175_vm1, %v12125_v14 }
 0xa7b   :  { %10853 = vmatpush3.bf16.msra.mxu0 %v10852_v63  ;;  %10871 = vmatpush3.bf16.msra.mxu1 %v10870_v0  ;;  %v9217_v63 = vld [vmem:[%s12984_s2 + $0x1c0] sm:$0xff]  ;;  %v9218_v0 = vld [vmem:[%s12984_s2 + $0x1c8] sm:$0xff] }
 0xa7c   :  { %10854 = vmatprep.subr.bf16.mxu0 %v11107_v3  ;;  %10872 = vmatprep.subr.bf16.mxu1 %v11107_v3  ;;  %v10930_v2 = vpack.c.bf16 %v9218_v0, %v9217_v63 }
 0xa7d   :  { %10277 = vmatprep.mubr.msk.f32.mxu0 %vm11108_vm0, %v11109_v11  ;;  %10310 = vmatprep.mubr.msk.f32.mxu1 %vm11108_vm0, %v11109_v11 }
 0xa7f   :  { %10856 = vmatpush3.bf16.msra.mxu0 %v10855_v6  ;;  %10874 = vmatpush3.bf16.msra.mxu1 %v10873_v8  ;;  %v9219_v6 = vld [vmem:[%s12984_s2 + $0x1d0] sm:$0xff]  ;;  %v9220_v8 = vld [vmem:[%s12984_s2 + $0x1d8] sm:$0xff] }
 0xa80   :  { %10863 = vmatprep.subr.bf16.mxu0 %v11107_v3  ;;  %10881 = vmatprep.subr.bf16.mxu1 %v11107_v3  ;;  %v10933_v10 = vpack.c.bf16 %v9220_v8, %v9219_v6 }
 0xa82   :  { %10278 = vmatmul.mubr.msk.f32.vlgmr.msra.gmra.mrb[62].mxu0 %vm175_vm1, %v12161_v28  ;;  %10311 = vmatmul.mubr.msk.f32.vlgmr.msra.gmra.mrb[62].mxu1 %vm175_vm1, %v12125_v14 }
 0xa83   :  { %10865 = vmatpush3.bf16.msra.mxu0 %v10864_v15  ;;  %10883 = vmatpush3.bf16.msra.mxu1 %v10882_v16  ;;  %v10924_v15 = vpack.c.bf16 %v9214_v13, %v9213_v12  ;;  %v9215_v16 = vld [vmem:[%s12984_s2 + $0x1b0] sm:$0xff]  ;;  %v9180_v12 = vld [vmem:[%s12986_s27 + $0xb] ss:$0 sm:$0xff]  ;;  %v9183_v13 = vld [vmem:[%s12986_s27 + $0xe] ss:$0 sm:$0xff] }
 0xa84   :  { %10866 = vmatprep.subr.bf16.mxu0 %v11107_v3  ;;  %10884 = vmatprep.subr.bf16.mxu1 %v11107_v3  ;;  %v10927_v19 = vpack.c.bf16 %v9216_v17, %v9215_v16 }
 0xa85   :  { %10299 = vmatprep.mubr.msk.f32.mxu0 %vm11108_vm0, %v11109_v11  ;;  %10332 = vmatprep.mubr.msk.f32.mxu1 %vm11108_vm0, %v11109_v11 }
 0xa87   :  { %10868 = vmatpush3.bf16.msra.mxu0 %v10867_v22  ;;  %10886 = vmatpush3.bf16.msra.mxu1 %v10885_v23  ;;  %v10936_v22 = vpack.c.bf16 %v9222_v21, %v9221_v48  ;;  %v9223_v23 = vld [vmem:[%s12984_s2 + $0x1f0] sm:$0xff] }
 0xa88   :  { %10875 = vmatprep.subr.bf16.mxu0 %v11107_v3  ;;  %10893 = vmatprep.subr.bf16.mxu1 %v11107_v3  ;;  %v10939_v25 = vpack.c.bf16 %v9224_v24, %v9223_v23 }
 0xa8a   :  { %10300 = vmatmul.mubr.msk.f32.vlgmr.msra.gmra.mrb[64].mxu0 %vm175_vm1, %v12161_v28  ;;  %10333 = vmatmul.mubr.msk.f32.vlgmr.msra.gmra.mrb[64].mxu1 %vm175_vm1, %v12125_v14 }
 0xa8b   :  { %10877 = vmatpush3.bf16.msra.mxu0 %v10876_v27  ;;  %10895 = vmatpush3.bf16.msra.mxu1 %v10894_v29 }
 0xa8c   :  { %10878 = vmatprep.subr.bf16.mxu0 %v11107_v3  ;;  %10896 = vmatprep.subr.bf16.mxu1 %v11107_v3 }
 0xa8d   :  { %10321 = vmatprep.mubr.msk.f32.mxu0 %vm11108_vm0, %v11109_v11  ;;  %10354 = vmatprep.mubr.msk.f32.mxu1 %vm11108_vm0, %v11109_v11 }
 0xa8f   :  { %10880 = vmatpush3.bf16.msra.mxu0 %v10879_v33  ;;  %10898 = vmatpush3.bf16.msra.mxu1 %v10897_v34 }
 0xa90   :  { %10887 = vmatprep.subr.bf16.mxu0 %v11107_v3  ;;  %10905 = vmatprep.subr.bf16.mxu1 %v11107_v3 }
 0xa92   :  { %10322 = vmatmul.mubr.msk.f32.vlgmr.msra.gmra.mrb[66].mxu0 %vm175_vm1, %v12161_v28  ;;  %10355 = vmatmul.mubr.msk.f32.vlgmr.msra.gmra.mrb[66].mxu1 %vm175_vm1, %v12125_v14 }
 0xa93   :  { %10889 = vmatpush3.bf16.msra.mxu0 %v10888_v37  ;;  %10907 = vmatpush3.bf16.msra.mxu1 %v10906_v18 }
 0xa94   :  { %10890 = vmatprep.subr.bf16.mxu0 %v11107_v3  ;;  %10908 = vmatprep.subr.bf16.mxu1 %v11107_v3 }
 0xa95   :  { %10343 = vmatprep.mubr.msk.f32.mxu0 %vm11108_vm0, %v11109_v11  ;;  %10376 = vmatprep.mubr.msk.f32.mxu1 %vm11108_vm0, %v11109_v11 }
 0xa97   :  { %10892 = vmatpush3.bf16.msra.mxu0 %v10891_v41  ;;  %10910 = vmatpush3.bf16.msra.mxu1 %v10909_v42  ;;  %v9123_v42 = vld [vmem:[%s12985_s9 + $0xa] ss:$0 sm:$0xff] }
 0xa98   :  { %10899 = vmatprep.subr.bf16.mxu0 %v11107_v3  ;;  %10917 = vmatprep.subr.bf16.mxu1 %v11107_v3 }
 0xa9a   :  { %10344 = vmatmul.mubr.msk.f32.vlgmr.msra.gmra.mrb[68].mxu0 %vm175_vm1, %v12161_v28  ;;  %10377 = vmatmul.mubr.msk.f32.vlgmr.msra.gmra.mrb[68].mxu1 %vm175_vm1, %v12125_v14 }
 0xa9b   :  { %10901 = vmatpush3.bf16.msra.mxu0 %v10900_v51  ;;  %10919 = vmatpush3.bf16.msra.mxu1 %v10918_v54 }
 0xa9c   :  { %10902 = vmatprep.subr.bf16.mxu0 %v11107_v3  ;;  %10920 = vmatprep.subr.bf16.mxu1 %v11107_v3 }
 0xa9d   :  { %10365 = vmatprep.mubr.msk.f32.mxu0 %vm11108_vm0, %v11109_v11  ;;  %10398 = vmatprep.mubr.msk.f32.mxu1 %vm11108_vm0, %v11109_v11 }
 0xa9f   :  { %10904 = vmatpush3.bf16.msra.mxu0 %v10903_v59  ;;  %10922 = vmatpush3.bf16.msra.mxu1 %v10921_v60  ;;  %v9178_v59 = vld [vmem:[%s12986_s27 + $0x9] ss:$0 sm:$0xff]  ;;  %v9181_v60 = vld [vmem:[%s12986_s27 + $0xc] ss:$0 sm:$0xff] }
 0xaa0   :  { %10911 = vmatprep.subr.bf16.mxu0 %v11107_v3  ;;  %10929 = vmatprep.subr.bf16.mxu1 %v11107_v3 }
 0xaa2   :  { %10366 = vmatmul.mubr.msk.f32.vlgmr.msra.gmra.mrb[70].mxu0 %vm175_vm1, %v12161_v28  ;;  %10399 = vmatmul.mubr.msk.f32.vlgmr.msra.gmra.mrb[70].mxu1 %vm175_vm1, %v12125_v14 }
 0xaa3   :  { %10913 = vmatpush3.bf16.msra.mxu0 %v10912_v1  ;;  %10931 = vmatpush3.bf16.msra.mxu1 %v10930_v2 }
 0xaa4   :  { %10914 = vmatprep.subr.bf16.mxu0 %v11107_v3  ;;  %10932 = vmatprep.subr.bf16.mxu1 %v11107_v3 }
 0xaa5   :  { %10387 = vmatprep.mubr.msk.f32.mxu0 %vm11108_vm0, %v11109_v11  ;;  %10420 = vmatprep.mubr.msk.f32.mxu1 %vm11108_vm0, %v11109_v11 }
 0xaa7   :  { %10916 = vmatpush3.bf16.msra.mxu0 %v10915_v9  ;;  %10934 = vmatpush3.bf16.msra.mxu1 %v10933_v10  ;;  %v9124_v9 = vld [vmem:[%s12985_s9 + $0xb] ss:$0 sm:$0xff]  ;;  %v9127_v10 = vld [vmem:[%s12985_s9 + $0xe] ss:$0 sm:$0xff] }
 0xaa8   :  { %10923 = vmatprep.subr.bf16.mxu0 %v11107_v3  ;;  %10434 = vmatprep.subr.mxu1 %v11109_v11 }
 0xaaa   :  { %10388 = vmatmul.mubr.msk.f32.vlgmr.msra.gmra.mrb[72].mxu0 %vm175_vm1, %v12161_v28  ;;  %10421 = vmatmul.mubr.msk.f32.vlgmr.msra.gmra.mrb[72].mxu1 %vm175_vm1, %v12125_v14 }
 0xaab   :  { %10925 = vmatpush3.bf16.msra.mxu0 %v10924_v15  ;;  %10409 = vmatprep.mubr.msk.f32.mxu0 %vm11108_vm0, %v11109_v11 }
 0xaac   :  { %10926 = vmatprep.subr.bf16.mxu0 %v11107_v3  ;;  %10436 = vmatprep.mubr.msk.f32.mxu1 %vm11108_vm0, %v11109_v11 }
 0xaaf   :  { %10928 = vmatpush3.bf16.msra.mxu0 %v10927_v19 }
 0xab0   :  { %10935 = vmatprep.subr.bf16.mxu0 %v11107_v3 }
 0xab2   :  { %10410 = vmatmul.mubr.msk.f32.vlgmr.msra.gmra.mrb[74].mxu0 %vm175_vm1, %v12161_v28 }
 0xab3   :  { %10937 = vmatpush3.bf16.msra.mxu0 %v10936_v22  ;;  %10431 = vmatprep.mubr.msk.f32.mxu0 %vm11108_vm0, %v11109_v11 }
 0xab4   :  { %10938 = vmatprep.subr.bf16.mxu0 %v11107_v3 }
 0xab7   :  { %10940 = vmatpush3.bf16.msra.mxu0 %v10939_v25 }
 0xab8   :  { %10444 = vmatprep.subr.mxu0 %v11109_v11 }
 0xaba   :  { %10432 = vmatmul.mubr.msk.f32.vlgmr.msra.gmra.mrb[76].mxu0 %vm175_vm1, %v12161_v28 }
 0xabb   :  { %10446 = vmatprep.mubr.msk.f32.mxu0 %vm11108_vm0, %v11109_v11 }
 0xb2d   :  { %v4632_v52 = vpop.f32.mrb[52].mxu0  ;;  %v4775_v26 = vpop.f32.mrb[52].mxu1 }
 0xb2e   :  { %v10180_v27 = vpop.f32.mrb[53].mxu0  ;;  %v10202_v29 = vpop.f32.mrb[53].mxu1  ;;  %v4633_v37 = vadd.f32 %v9121_v53, %v4632_v52  ;;  %v4776_v45 = vadd.f32 %v9123_v42, %v4775_v26  ;;  %v9126_v52 = vld [vmem:[%s12985_s9 + $0xd] ss:$0 sm:$0xff]  ;;  %v9184_v53 = vld [vmem:[%s12986_s27 + $0xf] ss:$0 sm:$0xff] }
 0xb2f   :  { %v9182_v26 = vld [vmem:[%s12986_s27 + $0xd] ss:$0 sm:$0xff]  ;;  %v9233_v27 = vld [vmem:[%s12987_s28 + $0x8] ss:$0 sm:$0xff] }
 0xb30   :  { %v6429_v41 = vmul.f32 0.35355338, %v4633_v37  ;;  %v6431_v56 = vmul.f32 0.35355338, %v4776_v45 }
 0xb35   :  { %v4705_v46 = vpop.f32.mrb[54].mxu0  ;;  %v4915_v30 = vpop.f32.mrb[54].mxu1 }
 0xb36   :  { %v10191_v31 = vpop.f32.mrb[55].mxu0  ;;  %v10224_v32 = vpop.f32.mrb[55].mxu1  ;;  %v4706_v61 = vadd.f32 %v9122_v57, %v4705_v46  ;;  %v4916_v62 = vadd.f32 %v9125_v58, %v4915_v30 }
 0xb38   :  { %v6430_v6 = vmul.f32 0.35355338, %v4706_v61  ;;  %v6433_v8 = vmul.f32 0.35355338, %v4916_v62 }
 0xb3d   :  { %v4845_v33 = vpop.f32.mrb[56].mxu0  ;;  %v5055_v34 = vpop.f32.mrb[56].mxu1 }
 0xb3e   :  { %v10213_v50 = vpop.f32.mrb[57].mxu0  ;;  %v10246_v35 = vpop.f32.mrb[57].mxu1  ;;  %v4846_v15 = vadd.f32 %v9124_v9, %v4845_v33  ;;  %v5056_v16 = vadd.f32 %v9127_v10, %v5055_v34 }
 0xb3f   :  { %v9128_v35 = vld [vmem:[%s12985_s9 + $0xf] ss:$0 sm:$0xff]  ;;  %s12995_s9 = sld [smem:[#allocation19_spill]] }
 0xb40   :  { %v6432_v24 = vmul.f32 0.35355338, %v4846_v15  ;;  %v6435_v25 = vmul.f32 0.35355338, %v5056_v16 }
 0xb45   :  { %v12524_v18 = vpop.f32.mrb[58].mxu0  ;;  %v5285_v38 = vpop.f32.mrb[58].mxu1 }
 0xb46   :  { %v5286_v39 = vadd.f32 %v9177_v36, %v5285_v38  ;;  %v10235_v20 = vpop.f32.mrb[59].mxu0  ;;  %v10268_v40 = vpop.f32.mrb[59].mxu1  ;;  %v4986_v29 = vadd.f32 %v9126_v52, %v12524_v18 }
 0xb48   :  { %10435 = vmatpush3.xpose.msk.msra.mxu1 %vm2046_vm2, %v5286_v39  ;;  %v6434_v50 = vmul.f32 0.35355338, %v4986_v29 }
 0xb49   :  { %10439 = vmatprep.subr.mxu1 %v11109_v11 }
 0xb4b   :  { %10437 = vmatmul.mubr.msk.f32.vlgmr.msra.gmra.mrb[74].mxu1 %vm2046_vm2, %v6429_v41  ;;  %v9234_v41 = vld [vmem:[%s12987_s28 + $0x9] ss:$0 sm:$0xff] }
 0xb4c   :  { %10441 = vmatprep.mubr.msk.f32.mxu1 %vm11108_vm0, %v11109_v11 }
 0xb4d   :  { %v12537_v47 = vpop.f32.mrb[60].mxu0  ;;  %v5425_v49 = vpop.f32.mrb[60].mxu1 }
 0xb4e   :  { %v5426_v51 = vadd.f32 %v9179_v43, %v5425_v49  ;;  %v10257_v54 = vpop.f32.mrb[61].mxu0  ;;  %v10290_v55 = vpop.f32.mrb[61].mxu1  ;;  %v5126_v36 = vadd.f32 %v9128_v35, %v12537_v47 }
 0xb50   :  { %10445 = vmatpush3.xpose.msk.msra.mxu0 %vm2046_vm2, %v5426_v51  ;;  %v6436_v40 = vmul.f32 0.35355338, %v5126_v36 }
 0xb51   :  { %10454 = vmatprep.subr.mxu0 %v11109_v11 }
 0xb53   :  { %10447 = vmatmul.mubr.msk.f32.vlgmr.msra.gmra.mrb[78].mxu0 %vm2046_vm2, %v6431_v56 }
 0xb54   :  { %10456 = vmatprep.mubr.msk.f32.mxu0 %vm11108_vm0, %v11109_v11 }
 0xb55   :  { %v5355_v63 = vpop.f32.mrb[62].mxu0  ;;  %v5565_v0 = vpop.f32.mrb[62].mxu1 }
 0xb56   :  { %v5356_v1 = vadd.f32 %v9178_v59, %v5355_v63  ;;  %v5566_v2 = vadd.f32 %v9181_v60, %v5565_v0  ;;  %v10279_v4 = vpop.f32.mrb[63].mxu0  ;;  %v10312_v5 = vpop.f32.mrb[63].mxu1 }
 0xb58   :  { %10440 = vmatpush3.xpose.msk.msra.mxu1 %vm2046_vm2, %v5356_v1  ;;  %10455 = vmatpush3.xpose.msk.msra.mxu0 %vm2046_vm2, %v5566_v2 }
 0xb59   :  { %10449 = vmatprep.subr.mxu1 %v11109_v11  ;;  %10464 = vmatprep.subr.mxu0 %v11109_v11 }
 0xb5b   :  { %10442 = vmatmul.mubr.msk.f32.vlgmr.msra.gmra.mrb[76].mxu1 %vm2046_vm2, %v6430_v6  ;;  %10457 = vmatmul.mubr.msk.f32.vlgmr.msra.gmra.mrb[80].mxu0 %vm2046_vm2, %v6433_v8 }
 0xb5c   :  { %10451 = vmatprep.mubr.msk.f32.mxu1 %vm11108_vm0, %v11109_v11  ;;  %10466 = vmatprep.mubr.msk.f32.mxu0 %vm11108_vm0, %v11109_v11 }
 0xb5d   :  { %v5495_v17 = vpop.f32.mrb[64].mxu0  ;;  %v5705_v19 = vpop.f32.mrb[64].mxu1 }
 0xb5e   :  { %v5496_v48 = vadd.f32 %v9180_v12, %v5495_v17  ;;  %v5706_v21 = vadd.f32 %v9183_v13, %v5705_v19  ;;  %v10301_v22 = vpop.f32.mrb[65].mxu0  ;;  %v10334_v23 = vpop.f32.mrb[65].mxu1 }
 0xb60   :  { %10450 = vmatpush3.xpose.msk.msra.mxu1 %vm2046_vm2, %v5496_v48  ;;  %10465 = vmatpush3.xpose.msk.msra.mxu0 %vm2046_vm2, %v5706_v21 }
 0xb61   :  { %10459 = vmatprep.subr.mxu1 %v11109_v11  ;;  %10474 = vmatprep.subr.mxu0 %v11109_v11 }
 0xb63   :  { %10452 = vmatmul.mubr.msk.f32.vlgmr.msra.gmra.mrb[78].mxu1 %vm2046_vm2, %v6432_v24  ;;  %10467 = vmatmul.mubr.msk.f32.vlgmr.msra.gmra.mrb[82].mxu0 %vm2046_vm2, %v6435_v25 }
 0xb64   :  { %10461 = vmatprep.mubr.msk.f32.mxu1 %vm11108_vm0, %v11109_v11  ;;  %10476 = vmatprep.mubr.msk.f32.mxu0 %vm11108_vm0, %v11109_v11 }
 0xb65   :  { %v5635_v46 = vpop.f32.mrb[66].mxu0  ;;  %v5935_v30 = vpop.f32.mrb[66].mxu1 }
 0xb66   :  { %v5636_v31 = vadd.f32 %v9182_v26, %v5635_v46  ;;  %v5936_v32 = vadd.f32 %v9233_v27, %v5935_v30  ;;  %v10323_v33 = vpop.f32.mrb[67].mxu0  ;;  %v10356_v34 = vpop.f32.mrb[67].mxu1 }
 0xb68   :  { %10460 = vmatpush3.xpose.msk.msra.mxu1 %vm2046_vm2, %v5636_v31  ;;  %10475 = vmatpush3.msra.mxu0 %v5936_v32 }
 0xb69   :  { %10469 = vmatprep.subr.mxu1 %v11109_v11  ;;  %10484 = vmatprep.subr.mxu0 %v11109_v11 }
 0xb6b   :  { %10462 = vmatmul.mubr.msk.f32.vlgmr.msra.gmra.mrb[80].mxu1 %vm2046_vm2, %v6434_v50 }
 0xb6c   :  { %10471 = vmatprep.mubr.msk.f32.mxu1 %vm11108_vm0, %v11109_v11 }
 0xb6d   :  { %v5775_v37 = vpop.f32.mrb[68].mxu0  ;;  %v12611_v18 = vpop.f32.mrb[68].mxu1 }
 0xb6e   :  { %v5776_v38 = vadd.f32 %v9184_v53, %v5775_v37  ;;  %v10345_v39 = vpop.f32.mrb[69].mxu0  ;;  %v10378_v20 = vpop.f32.mrb[69].mxu1 }
 0xb70   :  { %10470 = vmatpush3.xpose.msk.msra.mxu1 %vm2046_vm2, %v5776_v38 }
 0xb71   :  { %10479 = vmatprep.subr.mxu1 %v11109_v11 }
 0xb73   :  { %10472 = vmatmul.mubr.msk.f32.vlgmr.msra.gmra.mrb[82].mxu1 %vm2046_vm2, %v6436_v40 }
 0xb74   :  { %10481 = vmatprep.mubr.msk.f32.mxu1 %vm11108_vm0, %v11109_v11 }
 0xb75   :  { %v6005_v42 = vpop.f32.mrb[70].mxu0  ;;  %v12621_v43 = vpop.f32.mrb[70].mxu1 }
 0xb76   :  { %v6006_v45 = vadd.f32 %v9234_v41, %v6005_v42  ;;  %v10367_v47 = vpop.f32.mrb[71].mxu0  ;;  %v10400_v49 = vpop.f32.mrb[71].mxu1 }
 0xb78   :  { %10480 = vmatpush3.msra.mxu1 %v6006_v45 }
 0xb79   :  { %10489 = vmatprep.subr.mxu1 %v11109_v11 }
 0xb7d   :  { %v12624_v51 = vpop.f32.mrb[72].mxu0  ;;  %v12626_v54 = vpop.f32.mrb[72].mxu1 }
 0xb7e   :  { %v10389_v55 = vpop.f32.mrb[73].mxu0  ;;  %v10422_v56 = vpop.f32.mrb[73].mxu1 }
 0xb85   :  { %v12628_v57 = vpop.f32.mrb[74].mxu0 }
 0xb86   :  { %v10411_v58 = vpop.f32.mrb[75].mxu0 }
 0xb8d   :  { %v12630_v59 = vpop.f32.mrb[76].mxu0 }
 0xb8e   :  { %v10433_v60 = vpop.f32.mrb[77].mxu0 }
 0xc1e   :  { %v6509_v61 = vpop.f32.mrb[74].mxu1 }
 0xc1f   :  { %v10438_v62 = vpop.f32.mrb[75].mxu1  ;;  %v7045_v63 = vsel %vm2046_vm2, %v6509_v61, -inf }
 0xc20   :  { %7046 = vmax.xlane.f32.xlu0 %v7045_v63 }
 0xc26   :  { %v6661_v0 = vpop.f32.mrb[78].mxu0 }
 0xc27   :  { %v10448_v1 = vpop.f32.mrb[79].mxu0  ;;  %v7051_v2 = vsel %vm2046_vm2, %v6661_v0, -inf }
 0xc28   :  { %7052 = vmax.xlane.f32.xlu1 %v7051_v2 }
 0xc2e   :  { %v6585_v4 = vpop.f32.mrb[76].mxu1  ;;  %v6813_v5 = vpop.f32.mrb[80].mxu0 }
 0xc2f   :  { %v10443_v6 = vpop.f32.mrb[77].mxu1  ;;  %v10458_v8 = vpop.f32.mrb[81].mxu0  ;;  %v7057_v9 = vsel %vm2046_vm2, %v6813_v5, -inf  ;;  %v7048_v10 = vsel %vm2046_vm2, %v6585_v4, -inf }
 0xc30   :  { %7058 = vmax.xlane.f32.xlu0 %v7057_v9 }
 0xc34   :  { %7049 = vmax.xlane.f32.xlu0 %v7048_v10 }
 0xc36   :  { %v6737_v12 = vpop.f32.mrb[78].mxu1  ;;  %v6965_v13 = vpop.f32.mrb[82].mxu0 }
 0xc37   :  { %v10453_v15 = vpop.f32.mrb[79].mxu1  ;;  %v10468_v16 = vpop.f32.mrb[83].mxu0  ;;  %v7063_v17 = vsel %vm2046_vm2, %v6965_v13, -inf  ;;  %v7054_v19 = vsel %vm2046_vm2, %v6737_v12, -inf }
 0xc38   :  { %7064 = vmax.xlane.f32.xlu1 %v7063_v17  ;;  %v9235_v15 = vld [vmem:[%s12987_s28 + $0xa] ss:$0 sm:$0xff] }
 0xc3c   :  { %7055 = vmax.xlane.f32.xlu1 %v7054_v19  ;;  %v6076_v19 = vadd.f32 %v9235_v15, %v12611_v18 }
 0xc3e   :  { %v6889_v48 = vpop.f32.mrb[80].mxu1 }
 0xc3f   :  { %v10463_v21 = vpop.f32.mrb[81].mxu1  ;;  %v7060_v22 = vsel %vm2046_vm2, %v6889_v48, -inf }
 0xc40   :  { %7061 = vmax.xlane.f32.xlu0 %v7060_v22  ;;  %v9237_v21 = vld [vmem:[%s12987_s28 + $0xc] ss:$0 sm:$0xff] }
 0xc46   :  { %v7041_v23 = vpop.f32.mrb[82].mxu1 }
 0xc47   :  { %v10473_v24 = vpop.f32.mrb[83].mxu1  ;;  %v7066_v25 = vsel %vm2046_vm2, %v7041_v23, -inf }
 0xc48   :  { %7067 = vmax.xlane.f32.xlu1 %v7066_v25  ;;  %v6216_v25 = vadd.f32 %v9237_v21, %v12621_v43 }
 0xcad   :  { %v7047_v52 = vpop.xlane.xlu0 %7046 }
 0xcae   :  { %v7069_v26 = vsub.f32 %v6509_v61, %v7047_v52  ;;  %v9239_v52 = vld [vmem:[%s12987_s28 + $0xe] ss:$0 sm:$0xff] }
 0xcaf   :  { %v6356_v43 = vadd.f32 %v9239_v52, %v12626_v54  ;;  %v9305_v52 = vld [vmem:[%s12934_s12 + $0x38] sm:$0xff] }
 0xcb0   :  { %v7077_v27 = vmul.f32 1.442695, %v7069_v26 }
 0xcb2   :  { %11036 = vpow2.f32 %v7077_v27 }
 0xcb5   :  { %v7053_v29 = vpop.xlane.xlu1 %7052 }
 0xcb6   :  { %v7071_v46 = vsub.f32 %v6661_v0, %v7053_v29 }
 0xcb8   :  { %v7081_v30 = vmul.f32 1.442695, %v7071_v46  ;;  %v9236_v46 = vld [vmem:[%s12987_s28 + $0xb] ss:$0 sm:$0xff] }
 0xcba   :  { %11038 = vpow2.f32 %v7081_v30 }
 0xcbc   :  { %v11037_v31 = vpop.eup %11036 }
 0xcbd   :  { %v7059_v32 = vpop.xlane.xlu0 %7058  ;;  %v7093_v33 = vsel %vm2046_vm2, %v11037_v31, 0.0 }
 0xcbe   :  { %v7073_v34 = vsub.f32 %v6813_v5, %v7059_v32  ;;  %7094 = vadd.xlane.f32.xlu0 %v7093_v33  ;;  %v6146_v33 = vadd.f32 %v9236_v46, %v12624_v51 }
 0xcc0   :  { %v7085_v50 = vmul.f32 1.442695, %v7073_v34 }
 0xcc1   :  { %v7050_v35 = vpop.xlane.xlu0 %7049 }
 0xcc2   :  { %11040 = vpow2.f32 %v7085_v50  ;;  %v7070_v53 = vsub.f32 %v6585_v4, %v7050_v35  ;;  %v9238_v50 = vld [vmem:[%s12987_s28 + $0xd] ss:$0 sm:$0xff] }
 0xcc4   :  { %v11039_v36 = vpop.eup %11038  ;;  %v7079_v37 = vmul.f32 1.442695, %v7070_v53 }
 0xcc5   :  { %v7065_v38 = vpop.xlane.xlu1 %7064  ;;  %v7099_v39 = vsel %vm2046_vm2, %v11039_v36, 0.0 }
 0xcc6   :  { %11042 = vpow2.f32 %v7079_v37  ;;  %v7075_v20 = vsub.f32 %v6965_v13, %v7065_v38  ;;  %7100 = vadd.xlane.f32.xlu1 %v7099_v39  ;;  %v9240_v37 = vld [vmem:[%s12987_s28 + $0xf] ss:$0 sm:$0xff] }
 0xcc8   :  { %v7089_v40 = vmul.f32 1.442695, %v7075_v20  ;;  %v6426_v20 = vadd.f32 %v9240_v37, %v12630_v59  ;;  %v9273_v59 = vld [vmem:[%s12988_s8 + $0x40] sm:$0xff] }
 0xcc9   :  { %v7056_v41 = vpop.xlane.xlu1 %7055 }
 0xcca   :  { %11044 = vpow2.f32 %v7089_v40  ;;  %v7072_v42 = vsub.f32 %v6737_v12, %v7056_v41  ;;  %v9274_v41 = vld [vmem:[%s12988_s8 + $0x48] sm:$0xff] }
 0xccc   :  { %v11041_v45 = vpop.eup %11040  ;;  %v7083_v47 = vmul.f32 1.442695, %v7072_v42  ;;  %v9275_v42 = vld [vmem:[%s12988_s8 + $0x50] sm:$0xff] }
 0xccd   :  { %v7062_v49 = vpop.xlane.xlu0 %7061  ;;  %v7105_v55 = vsel %vm2046_vm2, %v11041_v45, 0.0 }
 0xcce   :  { %11046 = vpow2.f32 %v7083_v47  ;;  %v7074_v56 = vsub.f32 %v6889_v48, %v7062_v49  ;;  %7106 = vadd.xlane.f32.xlu0 %v7105_v55  ;;  %v9277_v49 = vld [vmem:[%s12988_s8 + $0x60] sm:$0xff] }
 0xcd0   :  { %v11043_v58 = vpop.eup %11042  ;;  %v7087_v60 = vmul.f32 1.442695, %v7074_v56 }
 0xcd1   :  { %v7096_v61 = vsel %vm2046_vm2, %v11043_v58, 0.0 }
 0xcd2   :  { %11048 = vpow2.f32 %v7087_v60  ;;  %7097 = vadd.xlane.f32.xlu0 %v7096_v61 }
 0xcd4   :  { %v11045_v62 = vpop.eup %11044 }
 0xcd5   :  { %v7068_v63 = vpop.xlane.xlu1 %7067  ;;  %v7111_v0 = vsel %vm2046_vm2, %v11045_v62, 0.0 }
 0xcd6   :  { %v7076_v1 = vsub.f32 %v7041_v23, %v7068_v63  ;;  %7112 = vadd.xlane.f32.xlu1 %v7111_v0  ;;  %v9295_v63 = vld [vmem:[%s12989_s1 + $0x20] sm:$0xff]  ;;  %v9296_v0 = vld [vmem:[%s12989_s1 + $0x28] sm:$0xff] }
 0xcd8   :  { %v12645_v2 = vpop.eup %11046  ;;  %v7091_v4 = vmul.f32 1.442695, %v7076_v1 }
 0xcd9   :  { %v7102_v5 = vsel %vm2046_vm2, %v12645_v2, 0.0 }
 0xcda   :  { %11050 = vpow2.f32 %v7091_v4  ;;  %7103 = vadd.xlane.f32.xlu1 %v7102_v5  ;;  %v10942_v4 = vpack.c.bf16 %v9296_v0, %v9295_v63 }
 0xcdc   :  { %v12649_v6 = vpop.eup %11048 }
 0xcdd   :  { %v7108_v8 = vsel %vm2046_vm2, %v12649_v6, 0.0 }
 0xcde   :  { %7109 = vadd.xlane.f32.xlu0 %v7108_v8  ;;  %v9298_v8 = vld [vmem:[%s12989_s1 + $0x38] sm:$0xff] }
 0xce4   :  { %v12653_v9 = vpop.eup %11050 }
 0xce5   :  { %v7114_v10 = vsel %vm2046_vm2, %v12653_v9, 0.0 }
 0xce6   :  { %7115 = vadd.xlane.f32.xlu1 %v7114_v10  ;;  %v9278_v10 = vld [vmem:[%s12988_s8 + $0x68] sm:$0xff] }
 0xd4b   :  { %v7095_v12 = vpop.xlane.xlu0 %7094 }
 0xd4c   :  { %11052 = vrcp.f32 %v7095_v12 }
 0xd53   :  { %v7101_v13 = vpop.xlane.xlu1 %7100 }
 0xd54   :  { %11054 = vrcp.f32 %v7101_v13 }
 0xd56   :  { %v11053_v16 = vpop.eup %11052 }
 0xd57   :  { %v7133_v17 = vmul.f32 %v11053_v16, %v11037_v31  ;;  %v9280_v16 = vld [vmem:[%s12988_s8 + $0x78] sm:$0xff] }
 0xd59   :  { %10477 = vmatmul.mubr.msk.f32.vlgmr.msra.gmra.mrb[84].mxu0 %vm2046_vm2, %v7133_v17 }
 0xd5a   :  { %10485 = vmatpush3.msra.mxu0 %v6076_v19  ;;  %10486 = vmatprep.mubr.msk.f32.mxu0 %vm11108_vm0, %v11109_v11 }
 0xd5b   :  { %v7107_v48 = vpop.xlane.xlu0 %7106  ;;  %10494 = vmatprep.subr.mxu0 %v11109_v11 }
 0xd5c   :  { %11056 = vrcp.f32 %v7107_v48  ;;  %v11082_v48 = vld [vmem:[%s12990_s3] sm:$0x3] }
 0xd5e   :  { %v11055_v22 = vpop.eup %11054 }
 0xd5f   :  { %v7135_v23 = vmul.f32 %v11055_v22, %v11039_v36  ;;  %v7098_v24 = vpop.xlane.xlu0 %7097  ;;  %v6286_v36 = vadd.f32 %v9238_v50, %v12628_v57  ;;  %v9290_v50 = vld [vmem:[%s12991_s24 + $0x1] ss:$0 sm:$0xff] }
 0xd60   :  { %11058 = vrcp.f32 %v7098_v24  ;;  %v9303_v24 = vld [vmem:[%s12934_s12 + $0x28] sm:$0xff] }
 0xd61   :  { %10487 = vmatmul.mubr.msk.f32.vlgmr.msra.gmra.mrb[86].mxu0 %vm2046_vm2, %v7135_v23  ;;  %v9302_v23 = vld [vmem:[%s12934_s12 + $0x20] sm:$0xff] }
 0xd62   :  { %10495 = vmatpush3.msra.mxu0 %v6216_v25  ;;  %10496 = vmatprep.mubr.msk.f32.mxu0 %vm11108_vm0, %v11109_v11  ;;  %v10948_v25 = vpack.c.bf16 %v9303_v24, %v9302_v23 }
 0xd63   :  { %v7113_v18 = vpop.xlane.xlu1 %7112  ;;  %10504 = vmatprep.subr.mxu0 %v11109_v11 }
 0xd64   :  { %11060 = vrcp.f32 %v7113_v18  ;;  %v9304_v18 = vld [vmem:[%s12934_s12 + $0x30] sm:$0xff] }
 0xd66   :  { %v11057_v26 = vpop.eup %11056 }
 0xd67   :  { %v7137_v27 = vmul.f32 %v11057_v26, %v11041_v45  ;;  %v7104_v29 = vpop.xlane.xlu1 %7103  ;;  %v10951_v26 = vpack.c.bf16 %v9305_v52, %v9304_v18 }
 0xd68   :  { %11062 = vrcp.f32 %v7104_v29 }
 0xd69   :  { %10497 = vmatmul.mubr.msk.f32.vlgmr.msra.gmra.mrb[88].mxu0 %vm2046_vm2, %v7137_v27 }
 0xd6a   :  { %v11059_v30 = vpop.eup %11058  ;;  %10505 = vmatpush3.msra.mxu0 %v6356_v43  ;;  %10506 = vmatprep.mubr.msk.f32.mxu0 %vm11108_vm0, %v11109_v11 }
 0xd6b   :  { %v7134_v31 = vmul.f32 %v11059_v30, %v11043_v58  ;;  %v7110_v32 = vpop.xlane.xlu0 %7109  ;;  %10514 = vmatprep.subr.mxu0 %v11109_v11  ;;  %v9279_v58 = vld [vmem:[%s12988_s8 + $0x70] sm:$0xff] }
 0xd6c   :  { %11064 = vrcp.f32 %v7110_v32 }
 0xd6d   :  { %10482 = vmatmul.mubr.msk.f32.vlgmr.msra.gmra.mrb[84].mxu1 %vm2046_vm2, %v7134_v31 }
 0xd6e   :  { %v11061_v54 = vpop.eup %11060  ;;  %10490 = vmatpush3.msra.mxu1 %v6146_v33  ;;  %10491 = vmatprep.mubr.msk.f32.mxu1 %vm11108_vm0, %v11109_v11 }
 0xd6f   :  { %v7139_v34 = vmul.f32 %v11061_v54, %v11045_v62  ;;  %10499 = vmatprep.subr.mxu1 %v11109_v11  ;;  %v9276_v62 = vld [vmem:[%s12988_s8 + $0x58] sm:$0xff] }
 0xd71   :  { %10507 = vmatmul.mubr.msk.f32.vlgmr.msra.gmra.mrb[90].mxu0 %vm2046_vm2, %v7139_v34 }
 0xd72   :  { %v11063_v35 = vpop.eup %11062  ;;  %10516 = vmatprep.mubr.msk.f32.mxu0 %vm11108_vm0, %v11109_v11  ;;  %10515 = vmatpush3.msra.mxu0 %v9273_v59 }
 0xd73   :  { %v7136_v51 = vmul.f32 %v11063_v35, %v12645_v2  ;;  %v7116_v53 = vpop.xlane.xlu1 %7115  ;;  %10524 = vmatprep.subr.mxu0 %v11109_v11 }
 0xd74   :  { %11066 = vrcp.f32 %v7116_v53 }
 0xd75   :  { %10492 = vmatmul.mubr.msk.f32.vlgmr.msra.gmra.mrb[86].mxu1 %vm2046_vm2, %v7136_v51 }
 0xd76   :  { %v11065_v38 = vpop.eup %11064  ;;  %10500 = vmatpush3.msra.mxu1 %v6286_v36  ;;  %10501 = vmatprep.mubr.msk.f32.mxu1 %vm11108_vm0, %v11109_v11 }
 0xd77   :  { %v7138_v39 = vmul.f32 %v11065_v38, %v12649_v6  ;;  %10509 = vmatprep.subr.mxu1 %v11109_v11  ;;  %v9297_v6 = vld [vmem:[%s12989_s1 + $0x30] sm:$0xff]  ;;  %s12992_s1 = sld [smem:[#allocation16_spill]] }
 0xd78   :  { %v10945_v12 = vpack.c.bf16 %v9298_v8, %v9297_v6 }
 0xd79   :  { %10502 = vmatmul.mubr.msk.f32.vlgmr.msra.gmra.mrb[88].mxu1 %vm2046_vm2, %v7138_v39 }
 0xd7a   :  { %10510 = vmatpush3.msra.mxu1 %v6426_v20  ;;  %10511 = vmatprep.mubr.msk.f32.mxu1 %vm11108_vm0, %v11109_v11 }
 0xd7b   :  { %10519 = vmatprep.subr.mxu1 %v11109_v11 }
 0xd7d   :  { %v9294_v24 = vld [vmem:[%s12992_s1 + $0x1] ss:$0 sm:$0xff] }
 0xd7e   :  { %v11067_v57 = vpop.eup %11066 }
 0xd7f   :  { %v7140_v40 = vmul.f32 %v11067_v57, %v12653_v9  ;;  %v9300_v57 = vld [vmem:[%s12933_s11 + $0x1] ss:$0 sm:$0xff] }
 0xd81   :  { %10512 = vmatmul.mubr.msk.f32.vlgmr.msra.gmra.mrb[90].mxu1 %vm2046_vm2, %v7140_v40 }
 0xd82   :  { %10521 = vmatprep.mubr.msk.f32.mxu1 %vm11108_vm0, %v11109_v11  ;;  %10520 = vmatpush3.msra.mxu1 %v9274_v41 }
 0xd83   :  { %10529 = vmatprep.subr.mxu1 %v11109_v11 }
 0xe2c   :  { %v7210_v45 = vpop.f32.mrb[84].mxu0 }
 0xe2d   :  { %v10478_v47 = vpop.f32.mrb[85].mxu0  ;;  %10517 = vmatmul.mubr.msk.f32.vlgmr.msra.gmra.mrb[92].mxu0 %vm2046_vm2, %v7210_v45 }
 0xe2e   :  { %10525 = vmatpush3.msra.mxu0 %v9275_v42  ;;  %10526 = vmatprep.mubr.msk.f32.mxu0 %vm11108_vm0, %v11109_v11 }
 0xe2f   :  { %10534 = vmatprep.subr.mxu0 %v11109_v11 }
 0xe34   :  { %v7356_v55 = vpop.f32.mrb[86].mxu0 }
 0xe35   :  { %v10488_v56 = vpop.f32.mrb[87].mxu0  ;;  %10527 = vmatmul.mubr.msk.f32.vlgmr.msra.gmra.mrb[94].mxu0 %vm2046_vm2, %v7356_v55 }
 0xe36   :  { %10535 = vmatpush3.msra.mxu0 %v9277_v49  ;;  %10536 = vmatprep.mubr.msk.f32.mxu0 %vm11108_vm0, %v11109_v11 }
 0xe37   :  { %10544 = vmatprep.subr.mxu0 %v11109_v11 }
 0xe3c   :  { %v7502_v60 = vpop.f32.mrb[88].mxu0 }
 0xe3d   :  { %v10498_v61 = vpop.f32.mrb[89].mxu0  ;;  %10537 = vmatmul.mubr.msk.f32.vlgmr.msra.gmra.mrb[96].mxu0 %vm2046_vm2, %v7502_v60 }
 0xe3e   :  { %10545 = vmatpush3.msra.mxu0 %v9279_v58  ;;  %10546 = vmatprep.mubr.msk.f32.mxu0 %vm11108_vm0, %v11109_v11 }
 0xe3f   :  { %10941 = vmatprep.subr.bf16.mxu0 %v11107_v3 }
 0xe40   :  { %v7283_v1 = vpop.f32.mrb[84].mxu1 }
 0xe41   :  { %v10483_v2 = vpop.f32.mrb[85].mxu1  ;;  %10522 = vmatmul.mubr.msk.f32.vlgmr.msra.gmra.mrb[92].mxu1 %vm2046_vm2, %v7283_v1 }
 0xe42   :  { %10530 = vmatpush3.msra.mxu1 %v9276_v62  ;;  %10531 = vmatprep.mubr.msk.f32.mxu1 %vm11108_vm0, %v11109_v11 }
 0xe43   :  { %10539 = vmatprep.subr.mxu1 %v11109_v11 }
 0xe44   :  { %v7648_v5 = vpop.f32.mrb[90].mxu0 }
 0xe45   :  { %v10508_v9 = vpop.f32.mrb[91].mxu0  ;;  %10547 = vmatmul.mubr.msk.f32.vlgmr.msra.gmra.mrb[98].mxu0 %vm2046_vm2, %v7648_v5 }
 0xe46   :  { %10943 = vmatpush3.bf16.msra.mxu0 %v10942_v4  ;;  %10562 = vmatprep.mubr.msk.f32.mxu0 %vm11108_vm0, %v11109_v11 }
 0xe47   :  { %10944 = vmatprep.subr.bf16.mxu0 %v11107_v3 }
 0xe48   :  { %v7429_v13 = vpop.f32.mrb[86].mxu1 }
 0xe49   :  { %v10493_v15 = vpop.f32.mrb[87].mxu1  ;;  %10532 = vmatmul.mubr.msk.f32.vlgmr.msra.gmra.mrb[94].mxu1 %vm2046_vm2, %v7429_v13  ;;  %v9307_v13 = vld [vmem:[%s12935_s13 + $0x1] ss:$0 sm:$0xff] }
 0xe4a   :  { %10540 = vmatpush3.msra.mxu1 %v9278_v10  ;;  %10541 = vmatprep.mubr.msk.f32.mxu1 %vm11108_vm0, %v11109_v11 }
 0xe4b   :  { %10549 = vmatprep.subr.mxu1 %v11109_v11  ;;  %10946 = vmatpush3.bf16.msra.mxu0 %v10945_v12 }
 0xe4c   :  { %v7575_v17 = vpop.f32.mrb[88].mxu1 }
 0xe4d   :  { %v10503_v19 = vpop.f32.mrb[89].mxu1  ;;  %10542 = vmatmul.mubr.msk.f32.vlgmr.msra.gmra.mrb[96].mxu1 %vm2046_vm2, %v7575_v17 }
 0xe4e   :  { %10550 = vmatpush3.msra.mxu1 %v9280_v16  ;;  %10551 = vmatprep.mubr.msk.f32.mxu1 %vm11108_vm0, %v11109_v11 }
 0xe4f   :  { %10563 = vmatmul.mubr.msk.f32.vlgmr.msra.gmra.mrb[100].mxu0 %vm175_vm1, %v11082_v48  ;;  %10947 = vmatprep.subr.bf16.mxu1 %v11107_v3  ;;  %v9293_v48 = vld [vmem:[%s12936_s14 + $0x1] ss:$0 sm:$0xff] }
 0xe54   :  { %v7721_v21 = vpop.f32.mrb[90].mxu1 }
 0xe55   :  { %v10513_v22 = vpop.f32.mrb[91].mxu1  ;;  %10552 = vmatmul.mubr.msk.f32.vlgmr.msra.gmra.mrb[98].mxu1 %vm2046_vm2, %v7721_v21 }
 0xe56   :  { %10573 = vmatprep.mubr.msk.f32.mxu1 %vm11108_vm0, %v11109_v11  ;;  %10949 = vmatpush3.bf16.msra.mxu1 %v10948_v25 }
 0xe57   :  { %10950 = vmatprep.subr.bf16.mxu1 %v11107_v3 }
 0xe5a   :  { %10952 = vmatpush3.bf16.msra.mxu1 %v10951_v26 }
 0xf00   :  { %v7803_v11 = vpop.f32.mrb[92].mxu0 }
 0xf01   :  { %v10518_v27 = vpop.f32.mrb[93].mxu0 }
 0xf08   :  { %v7949_v29 = vpop.f32.mrb[94].mxu0 }
 0xf09   :  { %v8318_v43 = vadd.f32 %v7949_v29, %v7803_v11  ;;  %v10528_v46 = vpop.f32.mrb[95].mxu0 }
 0xf10   :  { %v8095_v30 = vpop.f32.mrb[96].mxu0 }
 0xf11   :  { %v8320_v31 = vadd.f32 %v8318_v43, %v8095_v30  ;;  %v10538_v32 = vpop.f32.mrb[97].mxu0 }
 0xf14   :  { %v7876_v33 = vpop.f32.mrb[92].mxu1 }
 0xf15   :  { %v10523_v54 = vpop.f32.mrb[93].mxu1 }
 0xf18   :  { %v8241_v34 = vpop.f32.mrb[98].mxu0 }
 0xf19   :  { %v8322_v35 = vadd.f32 %v8320_v31, %v8241_v34  ;;  %v10548_v51 = vpop.f32.mrb[99].mxu0 }
 0xf1b   :  { %v8332_v53 = vadd.f32 %v9290_v50, %v8322_v35 }
 0xf1c   :  { %v8022_v3 = vpop.f32.mrb[94].mxu1 }
 0xf1d   :  { %v8319_v36 = vadd.f32 %v8022_v3, %v7876_v33  ;;  %v10533_v37 = vpop.f32.mrb[95].mxu1  ;;  %v8334_v38 = vadd.f32 %v8332_v53, %v12125_v14 }
 0xf1f   :  { %v8340_v39 = vsel %vm175_vm1, %v8334_v38, 0.0 }
 0xf20   :  { %v8168_v20 = vpop.f32.mrb[96].mxu1  ;;  %8341 = vadd.xlane.f32.xlu0 %v8340_v39 }
 0xf21   :  { %v8321_v40 = vadd.f32 %v8319_v36, %v8168_v20  ;;  %v10543_v59 = vpop.f32.mrb[97].mxu1  ;;  %v9314_v20 = vld [vmem:[%s12993_s18 + $0x28] sm:$0xff] }
 0xf22   :  { %v8461_v41 = vpop.f32.mrb[100].mxu0  ;;  %v9316_v59 = vld [vmem:[%s12993_s18 + $0x38] sm:$0xff] }
 0xf23   :  { %v8462_v42 = vadd.f32 %v9300_v57, %v8461_v41  ;;  %v10564_v45 = vpop.f32.mrb[101].mxu0 }
 0xf24   :  { %v9322_v45 = vld [vmem:[%s12942_s20 + $0x48] sm:$0xff] }
 0xf25   :  { %10574 = vmatmul.mubr.msk.f32.vlgmr.msra.gmra.mrb[100].mxu1 %vm175_vm1, %v8462_v42  ;;  %v9321_v42 = vld [vmem:[%s12942_s20 + $0x40] sm:$0xff] }
 0xf28   :  { %v8314_v47 = vpop.f32.mrb[98].mxu1 }
 0xf29   :  { %v8323_v49 = vadd.f32 %v8321_v40, %v8314_v47  ;;  %v10553_v55 = vpop.f32.mrb[99].mxu1  ;;  %v9315_v40 = vld [vmem:[%s12993_s18 + $0x30] sm:$0xff] }
 0xf2a   :  { %v10957_v41 = vpack.c.bf16 %v9316_v59, %v9315_v40  ;;  %v9323_v47 = vld [vmem:[%s12942_s20 + $0x50] sm:$0xff]  ;;  %v9324_v55 = vld [vmem:[%s12942_s20 + $0x58] sm:$0xff] }
 0xf2b   :  { %v8333_v56 = vadd.f32 %v9290_v50, %v8323_v49  ;;  %v10961_v49 = vpack.c.bf16 %v9322_v45, %v9321_v42 }
 0xf2d   :  { %v8335_v14 = vadd.f32 %v8333_v56, %v12161_v28  ;;  %v10965_v56 = vpack.c.bf16 %v9324_v55, %v9323_v47  ;;  %10962 = vmatprep.subr.bf16.mxu1 %v10961_v49 }
 0xf2e   :  { %10964 = vmatpush3.bf16.msra.mxu1 %v10961_v49  ;;  %v9335_v49 = vld [vmem:[%s12944_s22 + $0x1] ss:$0 sm:$0xff]  ;;  %s11111_s22 = smov [#allocation2]  }
 0xf2f   :  { %v8343_v58 = vsel %vm175_vm1, %v8335_v14, 0.0  ;;  %10966 = vmatprep.subr.bf16.mxu1 %v10965_v56  ;;  %s8973_s27 = sshll.u32 %s11111_s22, 4  ;;  %s8974_s27 = int_to_ptr.vmem [resolvable:$true] %s8973_s27 }
 0xf30   :  { %8344 = vadd.xlane.f32.xlu1 %v8343_v58  ;;  %v9326_v58 = vld [vmem:[%s12942_s20 + $0x68] sm:$0xff]  ;;  %p11088_p1 = scmp.lt.s32.totalorder %s8974_s27, %s8974_s27 }
 0xf32   :  { %10968 = vmatpush3.bf16.msra.mxu1 %v10965_v56 }
 0xfad   :  { %v8342_v60 = vpop.xlane.xlu0 %8341 }
 0xfae   :  { %v8346_v61 = vmul.f32 0.03125, %v8342_v60 }
 0xfb0   :  { %v8348_v62 = vsub.f32 %v8334_v38, %v8346_v61 }
 0xfb2   :  { %v8350_v63 = vmul.f32 %v8348_v62, %v8348_v62 }
 0xfb4   :  { %v8352_v0 = vsel %vm175_vm1, %v8350_v63, 0.0 }
 0xfb5   :  { %8353 = vadd.xlane.f32.xlu0 %v8352_v0 }
 0xfbd   :  { %v8345_v1 = vpop.xlane.xlu1 %8344 }
 0xfbe   :  { %v8347_v2 = vmul.f32 0.03125, %v8345_v1  ;;  %v9311_v1 = vld [vmem:[%s12938_s16 + $0x1] ss:$0 sm:$0xff] }
 0xfc0   :  { %v8349_v4 = vsub.f32 %v8335_v14, %v8347_v2  ;;  %v9325_v14 = vld [vmem:[%s12942_s20 + $0x60] sm:$0xff] }
 0xfc1   :  { %v10969_v60 = vpack.c.bf16 %v9326_v58, %v9325_v14  ;;  %v9336_v58 = vld [vmem:[%s12945_s23 + $0x1] ss:$0 sm:$0xff]  ;;  %s11083_s23 = scalar_lea.vmem %s8974_s27, 256 }
 0xfc2   :  { %v8351_v5 = vmul.f32 %v8349_v4, %v8349_v4  ;;  %p11084_p0 = scmp.ne.s32.totalorder %s8974_s27, %s11083_s23  ;;  %p11089_p2 = scmp.lt.s32.totalorder %s11083_s23, %s11083_s23 }
 0xfc3   :  { %10970 = vmatprep.subr.bf16.mxu1 %v10969_v60 }
 0xfc4   :  { %v8355_v6 = vsel %vm175_vm1, %v8351_v5, 0.0  ;;  %10972 = vmatpush3.bf16.msra.mxu1 %v10969_v60  ;;  %p11090_p3 = por %p11089_p2, %p11088_p1 }
 0xfc5   :  { %8356 = vadd.xlane.f32.xlu1 %v8355_v6  ;;  %v9312_v6 = vld [vmem:[%s12939_s17 + $0x1] ss:$0 sm:$0xff] }
 0xfc6   :  { %p11091_p4 = pnand %p11090_p3, %p11084_p0 }
 0xff8   :  { %v8547_v8 = vpop.f32.mrb[100].mxu1 }
 0xff9   :  { %v10575_v9 = vpop.f32.mrb[101].mxu1  ;;  %v8548_v15 = vadd.f32 %v9307_v13, %v8547_v8 }
 0xffb   :  { %v8558_v16 = vrot.slane %v8548_v15, %v11995_v7 }
 0xffd   :  { %v8566_v17 = vrot.slane %v8558_v16, %v11995_v7  ;;  %v8559_v29 = vcombine.high %v8558_v16, %v8558_v16  ;;  %v9327_v16 = vld [vmem:[%s12942_s20 + $0x70] sm:$0xff] }
 0xfff   :  { %v8577_v18 = vrot.slane %v8566_v17, %v11999_v44  ;;  %v8573_v43 = vrot.slane %v8559_v29, %v11995_v7  ;;  %v9328_v17 = vld [vmem:[%s12942_s20 + $0x78] sm:$0xff] }
0x1001   :  { %v8581_v32 = vrot.slane %v8573_v43, %v11999_v44  ;;  %v9313_v44 = vld [vmem:[%s12993_s18 + $0x20] sm:$0xff] }
0x1002   :  { %v10953_v57 = vpack.c.bf16 %v9314_v20, %v9313_v44 }
0x1004   :  { %10954 = vmatprep.subr.bf16.mxu0 %v10953_v57 }
0x1005   :  { %10956 = vmatpush3.bf16.msra.mxu0 %v10953_v57 }
0x1006   :  { %10958 = vmatprep.subr.bf16.mxu0 %v10957_v41 }
0x1009   :  { %10960 = vmatpush3.bf16.msra.mxu0 %v10957_v41 }
0x1042   :  { %v8354_v28 = vpop.xlane.xlu0 %8353 }
0x1043   :  { %v8358_v10 = vmul.f32 0.03125, %v8354_v28 }
0x1045   :  { %v8360_v12 = vadd.f32 1e-05, %v8358_v10 }
0x1047   :  { %11068 = vrsqrt.f32 %v8360_v12 }
0x1051   :  { %v11069_v19 = vpop.eup %11068 }
0x1052   :  { %v8357_v21 = vpop.xlane.xlu1 %8356  ;;  %v8364_v22 = vmul.f32 %v11069_v19, %v8348_v62  ;;  %v10973_v19 = vpack.c.bf16 %v9328_v17, %v9327_v16 }
0x1053   :  { %v8359_v23 = vmul.f32 0.03125, %v8357_v21 }
0x1054   :  { %v8372_v25 = vmul.f32 %v9293_v48, %v8364_v22  ;;  %10974 = vmatprep.subr.bf16.mxu1 %v10973_v19 }
0x1055   :  { %v8361_v52 = vadd.f32 1e-05, %v8359_v23  ;;  %10976 = vmatpush3.bf16.msra.mxu1 %v10973_v19 }
0x1056   :  { %v8380_v26 = vadd.f32 %v9294_v24, %v8372_v25 }
0x1057   :  { %11070 = vrsqrt.f32 %v8361_v52  ;;  %v9330_v52 = vld [vmem:[%s12943_s21 + $0x1] ss:$0 sm:$0xff]  ;;  %s12994_s21 = sld [smem:[#allocation18_spill]] }
0x1058   :  { %v8584_v11 = vadd.f32 %v8577_v18, %v8380_v26 }
0x105a   :  { %v8590_v27 = vsel %vm175_vm1, %v8584_v11, 0.0 }
0x105b   :  { %8591 = vadd.xlane.f32.xlu0 %v8590_v27 }
0x105d   :  { %v8877_v44 = vld [vmem:[%s12994_s21 + $0x18] sm:$0xff] }
0x1061   :  { %v11071_v46 = vpop.eup %11070 }
0x1062   :  { %v8365_v30 = vmul.f32 %v11071_v46, %v8349_v4 }
0x1064   :  { %v8373_v31 = vmul.f32 %v9293_v48, %v8365_v30  ;;  %v9318_v48 = vld [vmem:[%s12941_s19 + $0x1] ss:$0 sm:$0xff] }
0x1066   :  { %v8381_v33 = vadd.f32 %v9294_v24, %v8373_v31 }
0x1068   :  { %v8585_v54 = vadd.f32 %v8581_v32, %v8381_v33 }
0x106a   :  { %v8593_v34 = vsel %vm175_vm1, %v8585_v54, 0.0 }
0x106b   :  { %8594 = vadd.xlane.f32.xlu1 %v8593_v34 }
0x10e8   :  { %v8592_v50 = vpop.xlane.xlu0 %8591 }
0x10e9   :  { %v8596_v35 = vmul.f32 0.03125, %v8592_v50 }
0x10eb   :  { %v8598_v51 = vsub.f32 %v8584_v11, %v8596_v35 }
0x10ed   :  { %v8600_v53 = vmul.f32 %v8598_v51, %v8598_v51 }
0x10ef   :  { %v8602_v3 = vsel %vm175_vm1, %v8600_v53, 0.0 }
0x10f0   :  { %8603 = vadd.xlane.f32.xlu0 %v8602_v3 }
0x10f8   :  { %v8595_v36 = vpop.xlane.xlu1 %8594 }
0x10f9   :  { %v8597_v37 = vmul.f32 0.03125, %v8595_v36 }
0x10fb   :  { %v8599_v7 = vsub.f32 %v8585_v54, %v8597_v37  ;;  %v8874_v37 = vld [vmem:[%s12994_s21] sm:$0xff] }
0x10fd   :  { %v8601_v38 = vmul.f32 %v8599_v7, %v8599_v7 }
0x10ff   :  { %v8605_v39 = vsel %vm175_vm1, %v8601_v38, 0.0 }
0x1100   :  { %8606 = vadd.xlane.f32.xlu1 %v8605_v39  ;;  %v8876_v39 = vld [vmem:[%s12994_s21 + $0x10] sm:$0xff] }
0x1101   :  { %v10981_v20 = vpack.c.bf16 %v8877_v44, %v8876_v39 }
0x117d   :  { %v8604_v61 = vpop.xlane.xlu0 %8603 }
0x117e   :  { %v8608_v62 = vmul.f32 0.03125, %v8604_v61 }
0x1180   :  { %v8610_v63 = vadd.f32 1e-05, %v8608_v62 }
0x1182   :  { %11072 = vrsqrt.f32 %v8610_v63 }
0x118c   :  { %v11073_v0 = vpop.eup %11072 }
0x118d   :  { %v8607_v2 = vpop.xlane.xlu1 %8606  ;;  %v8614_v4 = vmul.f32 %v11073_v0, %v8598_v51  ;;  %v9337_v0 = vld [vmem:[%s12995_s9] ss:$0 sm:$0xff] }
0x118e   :  { %v8609_v5 = vmul.f32 0.03125, %v8607_v2 }
0x118f   :  { %v8622_v8 = vmul.f32 %v9311_v1, %v8614_v4 }
0x1190   :  { %v8611_v9 = vadd.f32 1e-05, %v8609_v5 }
0x1191   :  { %v8630_v28 = vadd.f32 %v9312_v6, %v8622_v8 }
0x1192   :  { %11074 = vrsqrt.f32 %v8611_v9 }
0x1193   :  { %10584 = vmatprep.mubr.msk.f32.mxu0 %vm175_vm1, %v8630_v28 }
0x119c   :  { %v11075_v10 = vpop.eup %11074 }
0x119d   :  { %v8615_v12 = vmul.f32 %v11075_v10, %v8599_v7  ;;  %v8875_v7 = vld [vmem:[%s12994_s21 + $0x8] sm:$0xff] }
0x119e   :  { %v10977_v38 = vpack.c.bf16 %v8875_v7, %v8874_v37 }
0x119f   :  { %v8623_v13 = vmul.f32 %v9311_v1, %v8615_v12 }
0x11a0   :  { %10978 = vmatprep.subr.bf16.mxu0 %v10977_v38 }
0x11a1   :  { %v8631_v15 = vadd.f32 %v9312_v6, %v8623_v13 }
0x11a3   :  { %10585 = vmatmul.mubr.msk.f32.vlgmr.msra.gmra.mrb[102].mxu0 %vm175_vm1, %v8631_v15 }
0x11a4   :  { %10980 = vmatpush3.bf16.msra.mxu0 %v10977_v38 }
0x11a5   :  { %10982 = vmatprep.subr.bf16.mxu0 %v10981_v20 }
0x11a8   :  { %10984 = vmatpush3.bf16.msra.mxu0 %v10981_v20 }
0x1276   :  { %v10586_v21 = vpop.f32.mrb[102].mxu0 }
0x1277   :  { %v8723_v22 = vadd.f32 %v10586_v21, %v9318_v48  ;;  %v8717_v23 = vpop.f32.mrb[103].mxu0 }
0x1278   :  { %v8718_v24 = vadd.f32 %v9318_v48, %v8717_v23 }
0x1279   :  { %v8727_v18 = vmax.f32 %v8723_v22, 0.0 }
0x127a   :  { %v8726_v25 = vmax.f32 %v8718_v24, 0.0 }
0x127c   :  { %10603 = vmatprep.mubr.msk.f32.mxu1 %vm4345_vm3, %v8726_v25 }
0x127d   :  { %10604 = vmatmul.mubr.msk.f32.vlgmr.msra.gmra.mrb[102].mxu1 %vm4345_vm3, %v8727_v18 }
0x1350   :  { %v10605_v26 = vpop.f32.mrb[102].mxu1 }
0x1351   :  { %v8823_v11 = vadd.f32 %v10605_v26, %v9330_v52  ;;  %v8817_v27 = vpop.f32.mrb[103].mxu1 }
0x1352   :  { %v8818_v29 = vadd.f32 %v9330_v52, %v8817_v27 }
0x1353   :  { %v8827_v43 = vadd.f32 %v8823_v11, %v8631_v15 }
0x1354   :  { %v8826_v46 = vadd.f32 %v8818_v29, %v8630_v28 }
0x1355   :  { %v8835_v30 = vsel %vm175_vm1, %v8827_v43, 0.0 }
0x1356   :  { %8836 = vadd.xlane.f32.xlu1 %v8835_v30  ;;  %v8832_v31 = vsel %vm175_vm1, %v8826_v46, 0.0 }
0x1357   :  { %8833 = vadd.xlane.f32.xlu0 %v8832_v31 }
0x13e3   :  { %v8837_v32 = vpop.xlane.xlu1 %8836 }
0x13e4   :  { %v8839_v33 = vmul.f32 0.03125, %v8837_v32  ;;  %v8834_v54 = vpop.xlane.xlu0 %8833 }
0x13e5   :  { %v8838_v34 = vmul.f32 0.03125, %v8834_v54 }
0x13e6   :  { %v8841_v50 = vsub.f32 %v8827_v43, %v8839_v33 }
0x13e7   :  { %v8840_v35 = vsub.f32 %v8826_v46, %v8838_v34 }
0x13e8   :  { %v8843_v51 = vmul.f32 %v8841_v50, %v8841_v50 }
0x13e9   :  { %v8842_v53 = vmul.f32 %v8840_v35, %v8840_v35 }
0x13ea   :  { %v8847_v3 = vsel %vm175_vm1, %v8843_v51, 0.0 }
0x13eb   :  { %8848 = vadd.xlane.f32.xlu1 %v8847_v3  ;;  %v8844_v36 = vsel %vm175_vm1, %v8842_v53, 0.0 }
0x13ec   :  { %8845 = vadd.xlane.f32.xlu0 %v8844_v36 }
0x1478   :  { %v8849_v57 = vpop.xlane.xlu1 %8848 }
0x1479   :  { %v8851_v40 = vmul.f32 0.03125, %v8849_v57  ;;  %v8846_v59 = vpop.xlane.xlu0 %8845 }
0x147a   :  { %v8850_v41 = vmul.f32 0.03125, %v8846_v59 }
0x147b   :  { %v8853_v42 = vadd.f32 1e-05, %v8851_v40 }
0x147c   :  { %v8852_v45 = vadd.f32 1e-05, %v8850_v41 }
0x147d   :  { %11076 = vrsqrt.f32 %v8853_v42 }
0x147e   :  { %11078 = vrsqrt.f32 %v8852_v45 }
0x1487   :  { %v11077_v47 = vpop.eup %11076 }
0x1488   :  { %v11079_v55 = vpop.eup %11078  ;;  %v8857_v56 = vmul.f32 %v11077_v47, %v8841_v50 }
0x1489   :  { %v8856_v14 = vmul.f32 %v11079_v55, %v8840_v35 }
0x148a   :  { %v8865_v60 = vmul.f32 %v9335_v49, %v8857_v56 }
0x148b   :  { %v8864_v61 = vmul.f32 %v9335_v49, %v8856_v14 }
0x148c   :  { %v8873_v63 = vadd.f32 %v9336_v58, %v8865_v60 }
0x148d   :  { %v8872_v62 = vadd.f32 %v9336_v58, %v8864_v61 }
0x148f   :  { %10614 = vmatprep.mubr.msk.f32.mxu0 %vm175_vm1, %v8872_v62 }
0x1490   :  { %10615 = vmatmul.mubr.msk.f32.vlgmr.msra.gmra.mrb[104].mxu0 %vm175_vm1, %v8873_v63 }
0x1563   :  { %v10616_v1 = vpop.f32.mrb[104].mxu0 }
0x1564   :  { %v8963_v2 = vadd.f32 %v10616_v1, %v9337_v0  ;;  %v8957_v4 = vpop.f32.mrb[105].mxu0 }
0x1565   :  { %v8958_v5 = vadd.f32 %v9337_v0, %v8957_v4 }
0x1566   :  { %8967 = vst [vmem:[#allocation2 + $0x8] sm:$0xff] %v8963_v2 }
0x1567   :  { %8966 = vst [vmem:[#allocation2] sm:$0xff] %v8958_v5 }
0x1568   :  { %11094 = shalt.err (!%p11091_p4)
}
0x1569   :  { %s12996_s1 = sld [smem:[#allocation20_spill]] }
0x156f   :  { %s11095_s13 = scalar_lea.hbm %s12996_s1, 256 }
0x1570   :  { %p11096_p5 = scmp.ne.s32.totalorder %s12996_s1, %s11095_s13  ;;  %p11099_p6 = scmp.lt.u32.totalorder %s11095_s13, %s12996_s1 }
0x1572   :  { %p11101_p7 = pnand %p11099_p6, %p11096_p5 }
0x1574   :  { %11104 = shalt.err (!%p11101_p7)
}
0x1575   :  { %s11112_s17 = smov 128   ;;  %s11113_s29 = smov 8  }
0x1576   :  { %8979 = dma.vmem_to_hbm [thread:$0]  %s8974_s27, 256, %s12996_s1, [#allocation3], %s11112_s17, %s11112_s17, %s11113_s29  }
0x1577   :  { %11105 = dma.done.wait [#allocation3], 256  }
0x1578   :  { %11106 = vsyncadd [#allocation3], 4294967040 }
0x1579   :  { %8983 = vsyncpa [#allocation3], 1 }

</bundles_post_ra>
